<compile_context>
chip_gen: v7x
topology: tpu7x:2x2x1
jax: 0.10.0
libtpu: 0.0.40
codegen_flags: <defaults>
</compile_context>

<pallas_src>
import math
import functools

import jax
import jax.numpy as jnp
from jax.experimental import pallas as pl
from jax.experimental.pallas import tpu as pltpu

_EPS = 1e-6


# --------------------------------------------------------------------------- #
# kernels
# --------------------------------------------------------------------------- #
def _flatten_rows(flat_ref, a2d, H, W):
    """(H, W) f32 value -> (1, H*W) row-major in VMEM scratch.

    Per-row lane-offset stores keep the heavy (F, H*W) compute and the output
    store lane-dense for any W.
    TODO(synk): when W % 128 == 0 the flatten round-trip could be skipped by
    emitting a (F, H, W) block directly (already lane-dense).
    """
    for h in range(H):                                  # static unroll (DETR-scale H)
        flat_ref[:, h * W:(h + 1) * W] = a2d[h:h + 1, :]
    return flat_ref[...]


def _merged_kernel(tri_h_ref, tri_w_ref, inv_ref, phase_ref, nm_ref,
                   out_ref, flat_ref, *, num_pos_feats, normalize, scale):
    """grid=(B,): one step writes both channel halves of one batch element."""
    H = nm_ref.shape[1]
    W = nm_ref.shape[2]
    F = num_pos_feats
    nm = nm_ref[0]                                              # (H, W) bf16 0/1

    # y half: cumsum over rows  y[i, w] = sum_{k <= i} not_mask[k, w]
    y = jnp.dot(tri_h_ref[...], nm, preferred_element_type=jnp.float32)
    if normalize:
        y = y * (scale / (y[H - 1:H, :] + _EPS))                # cheap (1, W) divide
    flat = _flatten_rows(flat_ref, y, H, W)                     # (1, HW)
    arg = flat * inv_ref[...] + phase_ref[...]                  # (F, HW)
    out_ref[0, 0:F, :] = jnp.sin(arg).astype(out_ref.dtype)

    # x half: cumsum over cols  x[h, j] = sum_{w <= j} not_mask[h, w]
    x = jnp.dot(nm, tri_w_ref[...], preferred_element_type=jnp.float32)
    if normalize:
        x = x * (scale / (x[:, W - 1:W] + _EPS))                # cheap (H, 1) divide
    flat = _flatten_rows(flat_ref, x, H, W)
    arg = flat * inv_ref[...] + phase_ref[...]
    out_ref[0, F:2 * F, :] = jnp.sin(arg).astype(out_ref.dtype)


def _split_kernel(tri_h_ref, tri_w_ref, inv_ref, phase_ref, nm_ref,
                  out_ref, flat_ref, *, normalize, scale):
    """grid=(B, 2, nF): batch x {y-half, x-half} x F-tile."""
    H = nm_ref.shape[1]
    W = nm_ref.shape[2]
    half = pl.program_id(1)
    ftile = pl.program_id(2)

    # The flattened (normalized) embed only depends on (b, half): compute it at
    # f-tile 0 and cache it in scratch for the remaining F tiles.
    @pl.when((ftile == 0) & (half == 0))
    def _():
        nm = nm_ref[0]
        y = jnp.dot(tri_h_ref[...], nm, preferred_element_type=jnp.float32)
        if normalize:
            y = y * (scale / (y[H - 1:H, :] + _EPS))
        _flatten_rows(flat_ref, y, H, W)

    @pl.when((ftile == 0) & (half == 1))
    def _():
        nm = nm_ref[0]
        x = jnp.dot(nm, tri_w_ref[...], preferred_element_type=jnp.float32)
        if normalize:
            x = x * (scale / (x[:, W - 1:W] + _EPS))
        _flatten_rows(flat_ref, x, H, W)

    # arg[f, l] = embed[l] * (1/dim_t[f]) + phase[f];  sin(x + pi/2) == cos(x)
    arg = flat_ref[...] * inv_ref[...] + phase_ref[...]          # (F_tile, HW)
    out_ref[0] = jnp.sin(arg).astype(out_ref.dtype)


# --------------------------------------------------------------------------- #
# wrapper
# --------------------------------------------------------------------------- #
def _chip_has_megacore():
    """True on chips with 2 TensorCores per chip (v7x / v4 / v5p)."""
    try:
        kind = (jax.devices()[0].device_kind or "").lower().replace(" ", "")
    except Exception:
        return False
    return ("v7" in kind) or ("v4" in kind) or ("v5p" in kind)


def _vmem_capacity_bytes():
    try:
        return int(pltpu.get_tpu_info().vmem_capacity_bytes)
    except Exception:
        return 64 << 20          # conservative fallback (v7x per-core VMEM)


def _step_bytes(c_blk, H, W, HW, out_itemsize):
    """Approximate per-grid-step VMEM working set (double-buffered blocks)."""
    out_b = 2 * c_blk * HW * out_itemsize       # out block, double-buffered
    temps = 3 * c_blk * HW * 4                  # arg / sin / store temporaries
    mask_b = 2 * H * W * 2                      # bf16 not_mask block
    tri_b = 2 * (H * H + W * W) * 2             # bf16 triangular constants (2 bufs)
    const_b = 2 * 2 * c_blk * 128 * 4           # inv/phase padded to 128 lanes
    scratch = 8 * HW * 4                        # (1, HW) scratch pads to 8 sublanes
    return out_b + temps + mask_b + tri_b + const_b + scratch + (2 << 20)


def position_embedding_sine(mask_bool, *, num_pos_feats=64, temperature=10000,
                            normalize=False, scale=None, out_dtype=jnp.float32,
                            split_halves=None):
    """mask_bool: (B, H, W) bool (True == padded). Returns (B, 2*F, H, W)."""
    if scale is not None and normalize is False:
        raise ValueError('normalize should be True if scale is passed')
    if scale is None:
        scale = 2 * math.pi
    scale = float(scale)

    F = int(num_pos_feats)
    B, H, W = mask_bool.shape
    HW = H * W
    C = 2 * F
    out_itemsize = jnp.dtype(out_dtype).itemsize

    # Host-side constants, resident in VMEM across the whole grid.
    # TODO(synk): single-buffer these constant inputs (pipeline_mode) to save
    # VMEM for very large H/W; negligible at DETR scale.
    not_mask = jnp.logical_not(mask_bool).astype(jnp.bfloat16)       # 0/1 exact
    tri_h = (jnp.arange(H)[None, :] <= jnp.arange(H)[:, None]).astype(jnp.bfloat16)
    tri_w = (jnp.arange(W)[:, None] <= jnp.arange(W)[None, :]).astype(jnp.bfloat16)
    j = jnp.arange(F, dtype=jnp.float32)
    dim_t = jnp.asarray(temperature, jnp.float32) ** (2.0 * jnp.floor(j / 2.0) / F)
    inv_dim_t = (1.0 / dim_t).reshape(F, 1)                                   # (F, 1)
    phase = ((jnp.arange(F) % 2).astype(jnp.float32) * (math.pi / 2)).reshape(F, 1)

    vmem_cap = _vmem_capacity_bytes()
    budget = max(vmem_cap - (8 << 20), 16 << 20)       # physical cap minus headroom

    # ---- choose the grid layout at trace time --------------------------------
    merged_bytes = _step_bytes(C, H, W, HW, out_itemsize)
    if split_halves is None:
        if F % 8 != 0:
            use_split = False                    # split needs 8-aligned channel slabs
        elif _chip_has_megacore() and (B % 2 == 1):
            use_split = True                     # give both TensorCores work
        else:
            use_split = merged_bytes > (24 << 20)   # large shapes: split + F-tiling
    else:
        use_split = bool(split_halves)
        if use_split and F % 8 != 0:
            raise ValueError("split_halves=True requires num_pos_feats % 8 == 0")

    if use_split:
        # Largest multiple-of-8 divisor of F whose working set fits comfortably.
        divisors = [d for d in range(8, F + 1, 8) if F % d == 0]
        target = min(budget, 24 << 20)
        f_tile = divisors[0]
        for d in sorted(divisors, reverse=True):
            if _step_bytes(d, H, W, HW, out_itemsize) <= target:
                f_tile = d
                break
        n_ft = F // f_tile
        step_bytes = _step_bytes(f_tile, H, W, HW, out_itemsize)

        kernel = functools.partial(_split_kernel, normalize=normalize, scale=scale)
        grid = (B, 2, n_ft)
        in_specs = [
            pl.BlockSpec((H, H), lambda b, h, ft: (0, 0)),        # lower-tri (y cumsum)
            pl.BlockSpec((W, W), lambda b, h, ft: (0, 0)),        # upper-tri (x cumsum)
            pl.BlockSpec((f_tile, 1), lambda b, h, ft: (ft, 0)),  # 1/dim_t tile
            pl.BlockSpec((f_tile, 1), lambda b, h, ft: (ft, 0)),  # sin/cos phase tile
            pl.BlockSpec((1, H, W), lambda b, h, ft: (b, 0, 0)),  # not_mask (bf16)
        ]
        out_specs = pl.BlockSpec((1, f_tile, HW),
                                 lambda b, h, ft: (b, h * n_ft + ft, 0))
        dim_sem = ("parallel", "parallel", "arbitrary")
    else:
        step_bytes = merged_bytes
        kernel = functools.partial(_merged_kernel, num_pos_feats=F,
                                   normalize=normalize, scale=scale)
        grid = (B,)
        in_specs = [
            pl.BlockSpec((H, H), lambda b: (0, 0)),
            pl.BlockSpec((W, W), lambda b: (0, 0)),
            pl.BlockSpec((F, 1), lambda b: (0, 0)),
            pl.BlockSpec((F, 1), lambda b: (0, 0)),
            pl.BlockSpec((1, H, W), lambda b: (b, 0, 0)),
        ]
        out_specs = pl.BlockSpec((1, C, HW), lambda b: (b, 0, 0))
        dim_sem = ("parallel",)

    # Only raise the scoped-VMEM limit when needed; never exceed physical VMEM.
    vmem_limit = None
    if step_bytes > (32 << 20):
        vmem_limit = int(min(max(step_bytes, 32 << 20), budget))

    out = pl.pallas_call(
        kernel,
        out_shape=jax.ShapeDtypeStruct((B, C, HW), out_dtype),
        grid_spec=pltpu.PrefetchScalarGridSpec(
            num_scalar_prefetch=0,
            grid=grid,
            in_specs=in_specs,
            out_specs=out_specs,
            scratch_shapes=[pltpu.VMEM((1, HW), jnp.float32)],
        ),
        compiler_params=pltpu.CompilerParams(
            dimension_semantics=dim_sem,
            vmem_limit_bytes=vmem_limit),
    )(tri_h, tri_w, inv_dim_t, phase, not_mask)

    # Free row-major reshape back to the PyTorch NCHW layout.
    return out.reshape(B, C, H, W)


# --------------------------------------------------------------------------- #
# pure-JAX reference (transcription of the PyTorch forward)
# --------------------------------------------------------------------------- #
def _reference(mask_bool, num_pos_feats, temperature, normalize, scale):
    not_mask = (~mask_bool).astype(jnp.float32)
    y_embed = jnp.cumsum(not_mask, axis=1)
    x_embed = jnp.cumsum(not_mask, axis=2)
    if normalize:
        eps = 1e-6
        y_embed = y_embed / (y_embed[:, -1:, :] + eps) * scale
        x_embed = x_embed / (x_embed[:, :, -1:] + eps) * scale
    dim_t = jnp.arange(num_pos_feats, dtype=jnp.float32)
    dim_t = temperature ** (2 * (dim_t // 2) / num_pos_feats)
    pos_x = x_embed[:, :, :, None] / dim_t
    pos_y = y_embed[:, :, :, None] / dim_t
    B, H, W = mask_bool.shape
    pos_x = jnp.stack((jnp.sin(pos_x[:, :, :, 0::2]),
                       jnp.cos(pos_x[:, :, :, 1::2])), axis=4).reshape(B, H, W, -1)
    pos_y = jnp.stack((jnp.sin(pos_y[:, :, :, 0::2]),
                       jnp.cos(pos_y[:, :, :, 1::2])), axis=4).reshape(B, H, W, -1)
    pos = jnp.concatenate((pos_y, pos_x), axis=3).transpose(0, 3, 1, 2)
    return pos


if __name__ == "__main__":
    key = jax.random.PRNGKey(0)
    B, Cin, H, W = 2, 4, 16, 16          # x tensors (unused by the math)
    num_pos_feats = 32
    temperature = 10000

    kx, km = jax.random.split(key)
    _x = jax.random.normal(kx, (B, Cin, H, W), dtype=jnp.float32)  # unused, like PyTorch
    mask = jax.random.bernoulli(km, p=0.3, shape=(B, H, W))        # True == padded

    # normalized variant (DETR default usage) -- auto grid layout
    pos = position_embedding_sine(mask, num_pos_feats=num_pos_feats,
                                  temperature=temperature,
                                  normalize=True, scale=2 * math.pi)
    pos = jax.block_until_ready(pos)
    ref = _reference(mask, num_pos_feats, temperature, True, 2 * math.pi)
    assert pos.shape == (B, 2 * num_pos_feats, H, W), pos.shape
    assert jnp.allclose(pos, ref, atol=1e-4, rtol=1e-4), \
        float(jnp.max(jnp.abs(pos - ref)))

    # unnormalized variant
    pos2 = position_embedding_sine(mask, num_pos_feats=num_pos_feats,
                                   temperature=temperature, normalize=False)
    pos2 = jax.block_until_ready(pos2)
    ref2 = _reference(mask, num_pos_feats, temperature, False, 2 * math.pi)
    assert jnp.allclose(pos2, ref2, atol=1e-4, rtol=1e-4), \
        float(jnp.max(jnp.abs(pos2 - ref2)))

    # explicitly exercise the split (half + F-tile) grid layout as well
    pos3 = position_embedding_sine(mask, num_pos_feats=num_pos_feats,
                                   temperature=temperature,
                                   normalize=True, scale=2 * math.pi,
                                   split_halves=True)
    pos3 = jax.block_until_ready(pos3)
    assert jnp.allclose(pos3, ref, atol=1e-4, rtol=1e-4), \
        float(jnp.max(jnp.abs(pos3 - ref)))

    print("KERNEL_OK")
</pallas_src>

<mosaic_0001>
module attributes {stable_mosaic.version = 11 : i64} {
  func.func @_merged_kernel(%arg0: i32, %arg1: memref<16x16xbf16, #tpu.memory_space<vmem>>, %arg2: memref<16x16xbf16, #tpu.memory_space<vmem>>, %arg3: memref<32x1xf32, #tpu.memory_space<vmem>>, %arg4: memref<32x1xf32, #tpu.memory_space<vmem>>, %arg5: memref<1x16x16xbf16, #tpu.memory_space<vmem>>, %arg6: memref<1x64x256xf32, #tpu.memory_space<vmem>>, %arg7: memref<1x256xf32, #tpu.memory_space<vmem>>) attributes {dimension_semantics = [#tpu.dimension_semantics<parallel>], iteration_bounds = array<i64: 2>, scalar_prefetch = 0 : i64, scratch_operands = 1 : i64, tpu.core_type = #tpu.core_type<tc>, window_params = [{pipeline_mode = #tpu.pipeline_mode<synchronous>, transform_indices = @transform_0, window_bounds = array<i64: 16, 16>}, {pipeline_mode = #tpu.pipeline_mode<synchronous>, transform_indices = @transform_1, window_bounds = array<i64: 16, 16>}, {pipeline_mode = #tpu.pipeline_mode<synchronous>, transform_indices = @transform_2, window_bounds = array<i64: 32, 1>}, {pipeline_mode = #tpu.pipeline_mode<synchronous>, transform_indices = @transform_3, window_bounds = array<i64: 32, 1>}, {transform_indices = @transform_4, window_bounds = array<i64: 1, 16, 16>}, {transform_indices = @transform_5, window_bounds = array<i64: 1, 64, 256>}]} {
    %c0 = arith.constant 0 : index
    %c0_0 = arith.constant 0 : index
    %c0_1 = arith.constant 0 : index
    %0 = vector.load %arg5[%c0, %c0_0, %c0_1] : memref<1x16x16xbf16, #tpu.memory_space<vmem>>, vector<1x16x16xbf16>
    %1 = vector.shape_cast %0 : vector<1x16x16xbf16> to vector<16x16xbf16>
    %c0_2 = arith.constant 0 : index
    %c0_3 = arith.constant 0 : index
    %2 = vector.load %arg1[%c0_2, %c0_3] : memref<16x16xbf16, #tpu.memory_space<vmem>>, vector<16x16xbf16>
    %cst = arith.constant dense<0.000000e+00> : vector<16x16xf32>
    %3 = tpu.matmul %2, %1, %cst {dimension_numbers = #tpu.dot_dimension_numbers<[1], [0], [0], [1], [0, 0, 1, 1], [], []>} : vector<16x16xbf16>, vector<16x16xbf16>, vector<16x16xf32> -> vector<16x16xf32>
    %4 = vector.extract_strided_slice %3 {offsets = [15, 0], sizes = [1, 16], strides = [1, 1]} : vector<16x16xf32> to vector<1x16xf32>
    %cst_4 = arith.constant 9.99999997E-7 : f32
    %5 = vector.broadcast %cst_4 : f32 to vector<1x16xf32>
    %6 = arith.addf %4, %5 : vector<1x16xf32>
    %cst_5 = arith.constant 6.28318548 : f32
    %7 = vector.broadcast %cst_5 : f32 to vector<1x16xf32>
    %8 = arith.divf %7, %6 : vector<1x16xf32>
    %9 = vector.broadcast %8 : vector<1x16xf32> to vector<16x16xf32>
    %10 = arith.mulf %3, %9 : vector<16x16xf32>
    %11 = vector.extract_strided_slice %10 {offsets = [0, 0], sizes = [1, 16], strides = [1, 1]} : vector<16x16xf32> to vector<1x16xf32>
    %c0_6 = arith.constant 0 : index
    %c0_7 = arith.constant 0 : index
    %12 = vector.load %arg7[%c0_6, %c0_7] : memref<1x256xf32, #tpu.memory_space<vmem>>, vector<1x16xf32>
    tpu.vector_store %arg7[%c0_6, %c0_7], %11 {strides = array<i32>} : memref<1x256xf32, #tpu.memory_space<vmem>>, vector<1x16xf32>,
    %13 = vector.extract_strided_slice %10 {offsets = [1, 0], sizes = [1, 16], strides = [1, 1]} : vector<16x16xf32> to vector<1x16xf32>
    %c0_8 = arith.constant 0 : index
    %c16 = arith.constant 16 : index
    %14 = vector.load %arg7[%c0_8, %c16] : memref<1x256xf32, #tpu.memory_space<vmem>>, vector<1x16xf32>
    tpu.vector_store %arg7[%c0_8, %c16], %13 {strides = array<i32>} : memref<1x256xf32, #tpu.memory_space<vmem>>, vector<1x16xf32>,
    %15 = vector.extract_strided_slice %10 {offsets = [2, 0], sizes = [1, 16], strides = [1, 1]} : vector<16x16xf32> to vector<1x16xf32>
    %c0_9 = arith.constant 0 : index
    %c32 = arith.constant 32 : index
    %16 = vector.load %arg7[%c0_9, %c32] : memref<1x256xf32, #tpu.memory_space<vmem>>, vector<1x16xf32>
    tpu.vector_store %arg7[%c0_9, %c32], %15 {strides = array<i32>} : memref<1x256xf32, #tpu.memory_space<vmem>>, vector<1x16xf32>,
    %17 = vector.extract_strided_slice %10 {offsets = [3, 0], sizes = [1, 16], strides = [1, 1]} : vector<16x16xf32> to vector<1x16xf32>
    %c0_10 = arith.constant 0 : index
    %c48 = arith.constant 48 : index
    %18 = vector.load %arg7[%c0_10, %c48] : memref<1x256xf32, #tpu.memory_space<vmem>>, vector<1x16xf32>
    tpu.vector_store %arg7[%c0_10, %c48], %17 {strides = array<i32>} : memref<1x256xf32, #tpu.memory_space<vmem>>, vector<1x16xf32>,
    %19 = vector.extract_strided_slice %10 {offsets = [4, 0], sizes = [1, 16], strides = [1, 1]} : vector<16x16xf32> to vector<1x16xf32>
    %c0_11 = arith.constant 0 : index
    %c64 = arith.constant 64 : index
    %20 = vector.load %arg7[%c0_11, %c64] : memref<1x256xf32, #tpu.memory_space<vmem>>, vector<1x16xf32>
    tpu.vector_store %arg7[%c0_11, %c64], %19 {strides = array<i32>} : memref<1x256xf32, #tpu.memory_space<vmem>>, vector<1x16xf32>,
    %21 = vector.extract_strided_slice %10 {offsets = [5, 0], sizes = [1, 16], strides = [1, 1]} : vector<16x16xf32> to vector<1x16xf32>
    %c0_12 = arith.constant 0 : index
    %c80 = arith.constant 80 : index
    %22 = vector.load %arg7[%c0_12, %c80] : memref<1x256xf32, #tpu.memory_space<vmem>>, vector<1x16xf32>
    tpu.vector_store %arg7[%c0_12, %c80], %21 {strides = array<i32>} : memref<1x256xf32, #tpu.memory_space<vmem>>, vector<1x16xf32>,
    %23 = vector.extract_strided_slice %10 {offsets = [6, 0], sizes = [1, 16], strides = [1, 1]} : vector<16x16xf32> to vector<1x16xf32>
    %c0_13 = arith.constant 0 : index
    %c96 = arith.constant 96 : index
    %24 = vector.load %arg7[%c0_13, %c96] : memref<1x256xf32, #tpu.memory_space<vmem>>, vector<1x16xf32>
    tpu.vector_store %arg7[%c0_13, %c96], %23 {strides = array<i32>} : memref<1x256xf32, #tpu.memory_space<vmem>>, vector<1x16xf32>,
    %25 = vector.extract_strided_slice %10 {offsets = [7, 0], sizes = [1, 16], strides = [1, 1]} : vector<16x16xf32> to vector<1x16xf32>
    %c0_14 = arith.constant 0 : index
    %c112 = arith.constant 112 : index
    %26 = vector.load %arg7[%c0_14, %c112] : memref<1x256xf32, #tpu.memory_space<vmem>>, vector<1x16xf32>
    tpu.vector_store %arg7[%c0_14, %c112], %25 {strides = array<i32>} : memref<1x256xf32, #tpu.memory_space<vmem>>, vector<1x16xf32>,
    %27 = vector.extract_strided_slice %10 {offsets = [8, 0], sizes = [1, 16], strides = [1, 1]} : vector<16x16xf32> to vector<1x16xf32>
    %c0_15 = arith.constant 0 : index
    %c128 = arith.constant 128 : index
    %28 = vector.load %arg7[%c0_15, %c128] : memref<1x256xf32, #tpu.memory_space<vmem>>, vector<1x16xf32>
    tpu.vector_store %arg7[%c0_15, %c128], %27 {strides = array<i32>} : memref<1x256xf32, #tpu.memory_space<vmem>>, vector<1x16xf32>,
    %29 = vector.extract_strided_slice %10 {offsets = [9, 0], sizes = [1, 16], strides = [1, 1]} : vector<16x16xf32> to vector<1x16xf32>
    %c0_16 = arith.constant 0 : index
    %c144 = arith.constant 144 : index
    %30 = vector.load %arg7[%c0_16, %c144] : memref<1x256xf32, #tpu.memory_space<vmem>>, vector<1x16xf32>
    tpu.vector_store %arg7[%c0_16, %c144], %29 {strides = array<i32>} : memref<1x256xf32, #tpu.memory_space<vmem>>, vector<1x16xf32>,
    %31 = vector.extract_strided_slice %10 {offsets = [10, 0], sizes = [1, 16], strides = [1, 1]} : vector<16x16xf32> to vector<1x16xf32>
    %c0_17 = arith.constant 0 : index
    %c160 = arith.constant 160 : index
    %32 = vector.load %arg7[%c0_17, %c160] : memref<1x256xf32, #tpu.memory_space<vmem>>, vector<1x16xf32>
    tpu.vector_store %arg7[%c0_17, %c160], %31 {strides = array<i32>} : memref<1x256xf32, #tpu.memory_space<vmem>>, vector<1x16xf32>,
    %33 = vector.extract_strided_slice %10 {offsets = [11, 0], sizes = [1, 16], strides = [1, 1]} : vector<16x16xf32> to vector<1x16xf32>
    %c0_18 = arith.constant 0 : index
    %c176 = arith.constant 176 : index
    %34 = vector.load %arg7[%c0_18, %c176] : memref<1x256xf32, #tpu.memory_space<vmem>>, vector<1x16xf32>
    tpu.vector_store %arg7[%c0_18, %c176], %33 {strides = array<i32>} : memref<1x256xf32, #tpu.memory_space<vmem>>, vector<1x16xf32>,
    %35 = vector.extract_strided_slice %10 {offsets = [12, 0], sizes = [1, 16], strides = [1, 1]} : vector<16x16xf32> to vector<1x16xf32>
    %c0_19 = arith.constant 0 : index
    %c192 = arith.constant 192 : index
    %36 = vector.load %arg7[%c0_19, %c192] : memref<1x256xf32, #tpu.memory_space<vmem>>, vector<1x16xf32>
    tpu.vector_store %arg7[%c0_19, %c192], %35 {strides = array<i32>} : memref<1x256xf32, #tpu.memory_space<vmem>>, vector<1x16xf32>,
    %37 = vector.extract_strided_slice %10 {offsets = [13, 0], sizes = [1, 16], strides = [1, 1]} : vector<16x16xf32> to vector<1x16xf32>
    %c0_20 = arith.constant 0 : index
    %c208 = arith.constant 208 : index
    %38 = vector.load %arg7[%c0_20, %c208] : memref<1x256xf32, #tpu.memory_space<vmem>>, vector<1x16xf32>
    tpu.vector_store %arg7[%c0_20, %c208], %37 {strides = array<i32>} : memref<1x256xf32, #tpu.memory_space<vmem>>, vector<1x16xf32>,
    %39 = vector.extract_strided_slice %10 {offsets = [14, 0], sizes = [1, 16], strides = [1, 1]} : vector<16x16xf32> to vector<1x16xf32>
    %c0_21 = arith.constant 0 : index
    %c224 = arith.constant 224 : index
    %40 = vector.load %arg7[%c0_21, %c224] : memref<1x256xf32, #tpu.memory_space<vmem>>, vector<1x16xf32>
    tpu.vector_store %arg7[%c0_21, %c224], %39 {strides = array<i32>} : memref<1x256xf32, #tpu.memory_space<vmem>>, vector<1x16xf32>,
    %41 = vector.extract_strided_slice %10 {offsets = [15, 0], sizes = [1, 16], strides = [1, 1]} : vector<16x16xf32> to vector<1x16xf32>
    %c0_22 = arith.constant 0 : index
    %c240 = arith.constant 240 : index
    %42 = vector.load %arg7[%c0_22, %c240] : memref<1x256xf32, #tpu.memory_space<vmem>>, vector<1x16xf32>
    tpu.vector_store %arg7[%c0_22, %c240], %41 {strides = array<i32>} : memref<1x256xf32, #tpu.memory_space<vmem>>, vector<1x16xf32>,
    %c0_23 = arith.constant 0 : index
    %c0_24 = arith.constant 0 : index
    %43 = vector.load %arg7[%c0_23, %c0_24] : memref<1x256xf32, #tpu.memory_space<vmem>>, vector<1x256xf32>
    %c0_25 = arith.constant 0 : index
    %c0_26 = arith.constant 0 : index
    %44 = vector.load %arg3[%c0_25, %c0_26] : memref<32x1xf32, #tpu.memory_space<vmem>>, vector<32x1xf32>
    %45 = vector.broadcast %43 : vector<1x256xf32> to vector<32x256xf32>
    %46 = vector.broadcast %44 : vector<32x1xf32> to vector<32x256xf32>
    %47 = arith.mulf %45, %46 : vector<32x256xf32>
    %c0_27 = arith.constant 0 : index
    %c0_28 = arith.constant 0 : index
    %48 = vector.load %arg4[%c0_27, %c0_28] : memref<32x1xf32, #tpu.memory_space<vmem>>, vector<32x1xf32>
    %49 = vector.broadcast %48 : vector<32x1xf32> to vector<32x256xf32>
    %50 = arith.addf %47, %49 : vector<32x256xf32>
    %51 = math.sin %50 : vector<32x256xf32>
    %c0_29 = arith.constant 0 : index
    %c0_30 = arith.constant 0 : index
    %c0_31 = arith.constant 0 : index
    %52 = vector.load %arg6[%c0_29, %c0_30, %c0_31] : memref<1x64x256xf32, #tpu.memory_space<vmem>>, vector<1x32x256xf32>
    %53 = vector.shape_cast %52 : vector<1x32x256xf32> to vector<32x256xf32>
    %54 = vector.shape_cast %51 : vector<32x256xf32> to vector<1x32x256xf32>
    tpu.vector_store %arg6[%c0_29, %c0_30, %c0_31], %54 {strides = array<i32>} : memref<1x64x256xf32, #tpu.memory_space<vmem>>, vector<1x32x256xf32>,
    %c0_32 = arith.constant 0 : index
    %c0_33 = arith.constant 0 : index
    %55 = vector.load %arg2[%c0_32, %c0_33] : memref<16x16xbf16, #tpu.memory_space<vmem>>, vector<16x16xbf16>
    %cst_34 = arith.constant dense<0.000000e+00> : vector<16x16xf32>
    %56 = tpu.matmul %1, %55, %cst_34 {dimension_numbers = #tpu.dot_dimension_numbers<[1], [0], [0], [1], [0, 0, 1, 1], [], []>} : vector<16x16xbf16>, vector<16x16xbf16>, vector<16x16xf32> -> vector<16x16xf32>
    %57 = vector.extract_strided_slice %56 {offsets = [0, 15], sizes = [16, 1], strides = [1, 1]} : vector<16x16xf32> to vector<16x1xf32>
    %cst_35 = arith.constant 9.99999997E-7 : f32
    %58 = vector.broadcast %cst_35 : f32 to vector<16x1xf32>
    %59 = arith.addf %57, %58 : vector<16x1xf32>
    %cst_36 = arith.constant 6.28318548 : f32
    %60 = vector.broadcast %cst_36 : f32 to vector<16x1xf32>
    %61 = arith.divf %60, %59 : vector<16x1xf32>
    %62 = vector.broadcast %61 : vector<16x1xf32> to vector<16x16xf32>
    %63 = arith.mulf %56, %62 : vector<16x16xf32>
    %64 = vector.extract_strided_slice %63 {offsets = [0, 0], sizes = [1, 16], strides = [1, 1]} : vector<16x16xf32> to vector<1x16xf32>
    %c0_37 = arith.constant 0 : index
    %c0_38 = arith.constant 0 : index
    %65 = vector.load %arg7[%c0_37, %c0_38] : memref<1x256xf32, #tpu.memory_space<vmem>>, vector<1x16xf32>
    tpu.vector_store %arg7[%c0_37, %c0_38], %64 {strides = array<i32>} : memref<1x256xf32, #tpu.memory_space<vmem>>, vector<1x16xf32>,
    %66 = vector.extract_strided_slice %63 {offsets = [1, 0], sizes = [1, 16], strides = [1, 1]} : vector<16x16xf32> to vector<1x16xf32>
    %c0_39 = arith.constant 0 : index
    %c16_40 = arith.constant 16 : index
    %67 = vector.load %arg7[%c0_39, %c16_40] : memref<1x256xf32, #tpu.memory_space<vmem>>, vector<1x16xf32>
    tpu.vector_store %arg7[%c0_39, %c16_40], %66 {strides = array<i32>} : memref<1x256xf32, #tpu.memory_space<vmem>>, vector<1x16xf32>,
    %68 = vector.extract_strided_slice %63 {offsets = [2, 0], sizes = [1, 16], strides = [1, 1]} : vector<16x16xf32> to vector<1x16xf32>
    %c0_41 = arith.constant 0 : index
    %c32_42 = arith.constant 32 : index
    %69 = vector.load %arg7[%c0_41, %c32_42] : memref<1x256xf32, #tpu.memory_space<vmem>>, vector<1x16xf32>
    tpu.vector_store %arg7[%c0_41, %c32_42], %68 {strides = array<i32>} : memref<1x256xf32, #tpu.memory_space<vmem>>, vector<1x16xf32>,
    %70 = vector.extract_strided_slice %63 {offsets = [3, 0], sizes = [1, 16], strides = [1, 1]} : vector<16x16xf32> to vector<1x16xf32>
    %c0_43 = arith.constant 0 : index
    %c48_44 = arith.constant 48 : index
    %71 = vector.load %arg7[%c0_43, %c48_44] : memref<1x256xf32, #tpu.memory_space<vmem>>, vector<1x16xf32>
    tpu.vector_store %arg7[%c0_43, %c48_44], %70 {strides = array<i32>} : memref<1x256xf32, #tpu.memory_space<vmem>>, vector<1x16xf32>,
    %72 = vector.extract_strided_slice %63 {offsets = [4, 0], sizes = [1, 16], strides = [1, 1]} : vector<16x16xf32> to vector<1x16xf32>
    %c0_45 = arith.constant 0 : index
    %c64_46 = arith.constant 64 : index
    %73 = vector.load %arg7[%c0_45, %c64_46] : memref<1x256xf32, #tpu.memory_space<vmem>>, vector<1x16xf32>
    tpu.vector_store %arg7[%c0_45, %c64_46], %72 {strides = array<i32>} : memref<1x256xf32, #tpu.memory_space<vmem>>, vector<1x16xf32>,
    %74 = vector.extract_strided_slice %63 {offsets = [5, 0], sizes = [1, 16], strides = [1, 1]} : vector<16x16xf32> to vector<1x16xf32>
    %c0_47 = arith.constant 0 : index
    %c80_48 = arith.constant 80 : index
    %75 = vector.load %arg7[%c0_47, %c80_48] : memref<1x256xf32, #tpu.memory_space<vmem>>, vector<1x16xf32>
    tpu.vector_store %arg7[%c0_47, %c80_48], %74 {strides = array<i32>} : memref<1x256xf32, #tpu.memory_space<vmem>>, vector<1x16xf32>,
    %76 = vector.extract_strided_slice %63 {offsets = [6, 0], sizes = [1, 16], strides = [1, 1]} : vector<16x16xf32> to vector<1x16xf32>
    %c0_49 = arith.constant 0 : index
    %c96_50 = arith.constant 96 : index
    %77 = vector.load %arg7[%c0_49, %c96_50] : memref<1x256xf32, #tpu.memory_space<vmem>>, vector<1x16xf32>
    tpu.vector_store %arg7[%c0_49, %c96_50], %76 {strides = array<i32>} : memref<1x256xf32, #tpu.memory_space<vmem>>, vector<1x16xf32>,
    %78 = vector.extract_strided_slice %63 {offsets = [7, 0], sizes = [1, 16], strides = [1, 1]} : vector<16x16xf32> to vector<1x16xf32>
    %c0_51 = arith.constant 0 : index
    %c112_52 = arith.constant 112 : index
    %79 = vector.load %arg7[%c0_51, %c112_52] : memref<1x256xf32, #tpu.memory_space<vmem>>, vector<1x16xf32>
    tpu.vector_store %arg7[%c0_51, %c112_52], %78 {strides = array<i32>} : memref<1x256xf32, #tpu.memory_space<vmem>>, vector<1x16xf32>,
    %80 = vector.extract_strided_slice %63 {offsets = [8, 0], sizes = [1, 16], strides = [1, 1]} : vector<16x16xf32> to vector<1x16xf32>
    %c0_53 = arith.constant 0 : index
    %c128_54 = arith.constant 128 : index
    %81 = vector.load %arg7[%c0_53, %c128_54] : memref<1x256xf32, #tpu.memory_space<vmem>>, vector<1x16xf32>
    tpu.vector_store %arg7[%c0_53, %c128_54], %80 {strides = array<i32>} : memref<1x256xf32, #tpu.memory_space<vmem>>, vector<1x16xf32>,
    %82 = vector.extract_strided_slice %63 {offsets = [9, 0], sizes = [1, 16], strides = [1, 1]} : vector<16x16xf32> to vector<1x16xf32>
    %c0_55 = arith.constant 0 : index
    %c144_56 = arith.constant 144 : index
    %83 = vector.load %arg7[%c0_55, %c144_56] : memref<1x256xf32, #tpu.memory_space<vmem>>, vector<1x16xf32>
    tpu.vector_store %arg7[%c0_55, %c144_56], %82 {strides = array<i32>} : memref<1x256xf32, #tpu.memory_space<vmem>>, vector<1x16xf32>,
    %84 = vector.extract_strided_slice %63 {offsets = [10, 0], sizes = [1, 16], strides = [1, 1]} : vector<16x16xf32> to vector<1x16xf32>
    %c0_57 = arith.constant 0 : index
    %c160_58 = arith.constant 160 : index
    %85 = vector.load %arg7[%c0_57, %c160_58] : memref<1x256xf32, #tpu.memory_space<vmem>>, vector<1x16xf32>
    tpu.vector_store %arg7[%c0_57, %c160_58], %84 {strides = array<i32>} : memref<1x256xf32, #tpu.memory_space<vmem>>, vector<1x16xf32>,
    %86 = vector.extract_strided_slice %63 {offsets = [11, 0], sizes = [1, 16], strides = [1, 1]} : vector<16x16xf32> to vector<1x16xf32>
    %c0_59 = arith.constant 0 : index
    %c176_60 = arith.constant 176 : index
    %87 = vector.load %arg7[%c0_59, %c176_60] : memref<1x256xf32, #tpu.memory_space<vmem>>, vector<1x16xf32>
    tpu.vector_store %arg7[%c0_59, %c176_60], %86 {strides = array<i32>} : memref<1x256xf32, #tpu.memory_space<vmem>>, vector<1x16xf32>,
    %88 = vector.extract_strided_slice %63 {offsets = [12, 0], sizes = [1, 16], strides = [1, 1]} : vector<16x16xf32> to vector<1x16xf32>
    %c0_61 = arith.constant 0 : index
    %c192_62 = arith.constant 192 : index
    %89 = vector.load %arg7[%c0_61, %c192_62] : memref<1x256xf32, #tpu.memory_space<vmem>>, vector<1x16xf32>
    tpu.vector_store %arg7[%c0_61, %c192_62], %88 {strides = array<i32>} : memref<1x256xf32, #tpu.memory_space<vmem>>, vector<1x16xf32>,
    %90 = vector.extract_strided_slice %63 {offsets = [13, 0], sizes = [1, 16], strides = [1, 1]} : vector<16x16xf32> to vector<1x16xf32>
    %c0_63 = arith.constant 0 : index
    %c208_64 = arith.constant 208 : index
    %91 = vector.load %arg7[%c0_63, %c208_64] : memref<1x256xf32, #tpu.memory_space<vmem>>, vector<1x16xf32>
    tpu.vector_store %arg7[%c0_63, %c208_64], %90 {strides = array<i32>} : memref<1x256xf32, #tpu.memory_space<vmem>>, vector<1x16xf32>,
    %92 = vector.extract_strided_slice %63 {offsets = [14, 0], sizes = [1, 16], strides = [1, 1]} : vector<16x16xf32> to vector<1x16xf32>
    %c0_65 = arith.constant 0 : index
    %c224_66 = arith.constant 224 : index
    %93 = vector.load %arg7[%c0_65, %c224_66] : memref<1x256xf32, #tpu.memory_space<vmem>>, vector<1x16xf32>
    tpu.vector_store %arg7[%c0_65, %c224_66], %92 {strides = array<i32>} : memref<1x256xf32, #tpu.memory_space<vmem>>, vector<1x16xf32>,
    %94 = vector.extract_strided_slice %63 {offsets = [15, 0], sizes = [1, 16], strides = [1, 1]} : vector<16x16xf32> to vector<1x16xf32>
    %c0_67 = arith.constant 0 : index
    %c240_68 = arith.constant 240 : index
    %95 = vector.load %arg7[%c0_67, %c240_68] : memref<1x256xf32, #tpu.memory_space<vmem>>, vector<1x16xf32>
    tpu.vector_store %arg7[%c0_67, %c240_68], %94 {strides = array<i32>} : memref<1x256xf32, #tpu.memory_space<vmem>>, vector<1x16xf32>,
    %c0_69 = arith.constant 0 : index
    %c0_70 = arith.constant 0 : index
    %96 = vector.load %arg7[%c0_69, %c0_70] : memref<1x256xf32, #tpu.memory_space<vmem>>, vector<1x256xf32>
    %c0_71 = arith.constant 0 : index
    %c0_72 = arith.constant 0 : index
    %97 = vector.load %arg3[%c0_71, %c0_72] : memref<32x1xf32, #tpu.memory_space<vmem>>, vector<32x1xf32>
    %98 = vector.broadcast %96 : vector<1x256xf32> to vector<32x256xf32>
    %99 = vector.broadcast %97 : vector<32x1xf32> to vector<32x256xf32>
    %100 = arith.mulf %98, %99 : vector<32x256xf32>
    %c0_73 = arith.constant 0 : index
    %c0_74 = arith.constant 0 : index
    %101 = vector.load %arg4[%c0_73, %c0_74] : memref<32x1xf32, #tpu.memory_space<vmem>>, vector<32x1xf32>
    %102 = vector.broadcast %101 : vector<32x1xf32> to vector<32x256xf32>
    %103 = arith.addf %100, %102 : vector<32x256xf32>
    %104 = math.sin %103 : vector<32x256xf32>
    %c0_75 = arith.constant 0 : index
    %c32_76 = arith.constant 32 : index
    %c0_77 = arith.constant 0 : index
    %105 = vector.load %arg6[%c0_75, %c32_76, %c0_77] : memref<1x64x256xf32, #tpu.memory_space<vmem>>, vector<1x32x256xf32>
    %106 = vector.shape_cast %105 : vector<1x32x256xf32> to vector<32x256xf32>
    %107 = vector.shape_cast %104 : vector<32x256xf32> to vector<1x32x256xf32>
    tpu.vector_store %arg6[%c0_75, %c32_76, %c0_77], %107 {strides = array<i32>} : memref<1x64x256xf32, #tpu.memory_space<vmem>>, vector<1x32x256xf32>,
    return
  }
  func.func @transform_0(%arg0: i32) -> (i32, i32) {
    %c0_i32 = arith.constant 0 : i32
    %c0_i32_0 = arith.constant 0 : i32
    %c0_i32_1 = arith.constant 0 : i32
    return %c0_i32, %c0_i32_0 : i32, i32
  }
  func.func @transform_1(%arg0: i32) -> (i32, i32) {
    %c0_i32 = arith.constant 0 : i32
    %c0_i32_0 = arith.constant 0 : i32
    %c0_i32_1 = arith.constant 0 : i32
    return %c0_i32, %c0_i32_0 : i32, i32
  }
  func.func @transform_2(%arg0: i32) -> (i32, i32) {
    %c0_i32 = arith.constant 0 : i32
    %c0_i32_0 = arith.constant 0 : i32
    %c0_i32_1 = arith.constant 0 : i32
    return %c0_i32, %c0_i32_0 : i32, i32
  }
  func.func @transform_3(%arg0: i32) -> (i32, i32) {
    %c0_i32 = arith.constant 0 : i32
    %c0_i32_0 = arith.constant 0 : i32
    %c0_i32_1 = arith.constant 0 : i32
    return %c0_i32, %c0_i32_0 : i32, i32
  }
  func.func @transform_4(%arg0: i32) -> (i32, i32, i32) {
    %c0_i32 = arith.constant 0 : i32
    %c0_i32_0 = arith.constant 0 : i32
    %c0_i32_1 = arith.constant 0 : i32
    return %arg0, %c0_i32, %c0_i32_0 : i32, i32, i32
  }
  func.func @transform_5(%arg0: i32) -> (i32, i32, i32) {
    %c0_i32 = arith.constant 0 : i32
    %c0_i32_0 = arith.constant 0 : i32
    %c0_i32_1 = arith.constant 0 : i32
    return %arg0, %c0_i32, %c0_i32_0 : i32, i32, i32
  }
}

</mosaic_0001>

<bundles_post_ra>
// kernel: tpu_custom_call.1
= control target key start
LH: loop header
LB: loop body
LE: loop exit
PB: predicated region body
PF: predicated region fallthrough
CT: control target
= control target key end

     0   :  { %10 = vsyncpa [#allocation4], 0  ;;  %s4694_s0 = inlined_call_operand.vmem [shape: bf16[16,16], index: 0, kind: input, shape index: {}]   ;;  %s4695_s1 = inlined_call_operand.vmem [shape: bf16[16,16], index: 1, kind: input, shape index: {}]   ;;  %s4696_s2 = inlined_call_operand.vmem [shape: f32[32,1], index: 2, kind: input, shape index: {}]   ;;  %s4697_s3 = inlined_call_operand.vmem [shape: f32[32,1], index: 3, kind: input, shape index: {}]   ;;  %s4698_s4 = inlined_call_operand.vmem [shape: bf16[2,16,16], index: 4, kind: input, shape index: {}]   ;;  %s4699_s5 = inlined_call_operand.hbm [shape: f32[2,64,256], index: 5, kind: output, shape index: {}]  }
   0x1   :  { %12 = vsyncpa [#allocation4 + $0x1], 0  ;;  %s3024_s18 = smov 0   ;;  %s3026_s19 = smov 0  }
   0x2   :  { %s3028_s20 = smov 0   ;;  %s3030_s21 = smov 0  }
   0x3 LB: > { %s3045_s22 = sadd.s32 4294967295, %s2972_s21   ;;  %s2612_s23 = sadd.s32 4294967294, %s2972_s21   ;;  %s2972_s21 = sphi %s3030_s21, %s4763_s21   ;;  %s2968_s20 = sphi %s3028_s20, %s4762_s20   ;;  %s2964_s19 = sphi %s3026_s19, %s4761_s19   ;;  %s2960_s18 = sphi %s3024_s18, %s4760_s18  }
   0x4   : > { %s3049_s24 = sadd.s32 1, %s2972_s21   ;;  %s135_s25 = sadd.s32 1, %s2968_s20 }
   0x5   : > { %s132_s26 = ssub.s32 %s2972_s21, %s3049_s24  ;;  %p145_p0 = scmp.ne.s32.totalorder %s2968_s20, %s2964_s19 }
   0x6   : > { %p133_p1 = scmp.eq.s32.totalorder %s132_s26, 0  ;;  %p146_p2 = scmp.eq.s32.totalorder %s3045_s22, 1 }
   0x7   : > { %p151_p3 = scmp.ne.s32.totalorder %s2964_s19, %s2960_s18  ;;  %p152_p4 = scmp.eq.s32.totalorder %s2612_s23, 1 }
   0x8   : > { %s3060_s27 = scalar_select %p133_p1, %s2968_s20, %s135_s25  }
   0x9   : > { %p3062_p5 = por %p146_p2, %p145_p0  ;;  %p3066_p6 = por %p152_p4, %p151_p3 }
   0xa   : > { %p2615_p7 = scmp.ge.s32.totalorder %s2972_s21, 1  ;;  %p190_p8 = scmp.lt.s32.totalorder %s2972_s21, 3 }
   0xc   : > { %p191_p9 = pnand %p2615_p7, %p190_p8 }
   0xd   : > { %v2837_v0 = vld [vmem:[%s4695_s1] sm:$0xff] (!%p191_p9)   ;;  %v2974_v1 = vmov (!%p191_p9), 0.0   ;;  %p218_p10 = scmp.lt.s32.totalorder (!%p191_p9), %s3045_s22, 1  ;;  %vm2975_vm0 = vmmov (!%p191_p9), 0   ;;  %vm239_vm1 = vcmask (!%p191_p9), 130048   ;;  %v478_v5 = vld [vmem:[%s4696_s2 + $0x8] sm:$0xff] (!%p191_p9)  ;;  %v287_v22 = vlaneseq (!%p191_p9) }
   0xe   : > { %194 = sbr.rel (%p191_p9) target bundleno = 895 (0x37f), region = 40  ;;  %2705 = vmatprep.subr.bf16.mxu1 (!%p191_p9), %v2974_v1  ;;  %2699 = vmatprep.subr.bf16.mxu0 (!%p191_p9), %v2974_v1  ;;  %v2839_v3 = vld [vmem:[%s4694_s0] sm:$0xff] (!%p191_p9)   ;;  %v2976_v6 = vmov (!%p191_p9), 0   ;;  %v2977_v7 = vmov (!%p191_p9), 15   ;;  %v479_v8 = vld [vmem:[%s4696_s2 + $0x10] sm:$0xff] (!%p191_p9)  ;;  %v480_v36 = vld [vmem:[%s4696_s2 + $0x18] sm:$0xff] (!%p191_p9) }
   0xf   : > { %2706 = vmatpush3.bf16.msra.mxu1 (!%p191_p9), %v2837_v0  ;;  %2707 = vmatprep.mubr.msk.bf16.mxu1 (!%p191_p9), %vm2975_vm0, %v2974_v1  ;;  %v477_v4 = vld [vmem:[%s4696_s2] sm:$0xff] (!%p191_p9)  ;;  %v3101_v10 = vld [vmem:[%s4697_s3 + $0x10] sm:$0xff] (!%p191_p9)  ;;  %v3111_v24 = vshrl.u32 (!%p191_p9), %v287_v22, 7  ;;  %v2978_v25 = vmov (!%p191_p9), 1966171168   ;;  %vm3121_vm2 = vcmp.lt.s32.totalorder (!%p191_p9), %v287_v22, 16 }
  0x10   : > { %2701 = vmatprep.mubr.msk.bf16.mxu0 (!%p191_p9), %vm2975_vm0, %v2974_v1  ;;  %2833 = vset.pattern.permute.xlu0 (!%p191_p9), %v2976_v6  ;;  %v3095_v9 = vld [vmem:[%s4697_s3] sm:$0xff] (!%p191_p9)  ;;  %v300_v26 = vunpack.c.l.s4 (!%p191_p9), %v2978_v25  ;;  %s2979_s10 = smov (!%p191_p9), 16   ;;  %v3138_v48 = vld [vmem:[%s4697_s3 + $0x8] sm:$0xff] (!%p191_p9)  ;;  %v3147_v53 = vld [vmem:[%s4697_s3 + $0x18] sm:$0xff] (!%p191_p9)  ;;  %s2980_s15 = smov (!%p191_p9), 32   ;;  %vm324_vm3 = vcmp.ge.s32.totalorder (!%p191_p9), %v287_v22, 16 }
  0x11   : > { %2834 = vset.pattern.permute.xlu1 (!%p191_p9), %v2976_v6  ;;  %494 = vperm.xlu0 (!%p191_p9), %2833, %v477_v4   ;;  %v289_v29 = vsub.s32 (!%p191_p9), 7, %v3111_v24  ;;  %s2981_s16 = smov (!%p191_p9), 64   ;;  %s2982_s17 = smov (!%p191_p9), 48   ;;  %vm325_vm4 = vcmp.lt.s32.totalorder (!%p191_p9), %v287_v22, 32  ;;  %vm332_vm6 = vcmp.ge.s32.totalorder (!%p191_p9), %v287_v22, 32  ;;  %vm333_vm7 = vcmp.lt.s32.totalorder (!%p191_p9), %v287_v22, 48 }
  0x12   : > { %499 = vperm.xlu1 (!%p191_p9), %2834, %v478_v5   ;;  %v301_v30 = vunpack.c.0.s8 (!%p191_p9), %v300_v26  ;;  %s2983_s23 = smov (!%p191_p9), 80   ;;  %s2984_s25 = smov (!%p191_p9), 96   ;;  %vm3183_vm5 = vmand (!%p191_p9), %vm324_vm3, %vm325_vm4  ;;  %vm340_vm9 = vcmp.ge.s32.totalorder (!%p191_p9), %v287_v22, 48  ;;  %vm341_vm10 = vcmp.lt.s32.totalorder (!%p191_p9), %v287_v22, 64  ;;  %vm362_vm11 = vcmp.ge.s32.totalorder (!%p191_p9), %v287_v22, 64 }
  0x13   : > { %s2985_s26 = smov (!%p191_p9), 112   ;;  %vm3207_vm8 = vmand (!%p191_p9), %vm332_vm6, %vm333_vm7  ;;  %vm363_vm12 = vcmp.lt.s32.totalorder (!%p191_p9), %v287_v22, 80  ;;  %vm377_vm15 = vcmp.ge.s32.totalorder (!%p191_p9), %v287_v22, 80  ;;  %vm378_vm0 = vcmp.lt.s32.totalorder (!%p191_p9), %v287_v22, 96  ;;  %vm385_vm3 = vcmp.ge.s32.totalorder (!%p191_p9), %v287_v22, 96  ;;  %s215_s30 = sand.u32 (!%p191_p9), 1, %s2964_s19  }
  0x14   : > { %v3115_v35 = vsub.s32 (!%p191_p9), %v301_v30, %v3111_v24  ;;  %vm3231_vm13 = vmand (!%p191_p9), %vm340_vm9, %vm341_vm10  ;;  %vm386_vm4 = vcmp.lt.s32.totalorder (!%p191_p9), %v287_v22, 112  ;;  %vm393_vm7 = vcmp.ge.s32.totalorder (!%p191_p9), %v287_v22, 112  ;;  %vm394_vm9 = vcmp.lt.s32.totalorder (!%p191_p9), %v287_v22, 128  ;;  %s3637_s6 = sshll.u32 (!%p191_p9), %s215_s30, 7 }
  0x15   : > { %s219_s7 = scalar_select %p218_p10, %s3045_s22, 1  ;;  %2835 = vset.pattern.permute.xlu0 %v2977_v7  ;;  %vm3239_vm14 = vmand %vm362_vm11, %vm363_vm12 }
  0x16   : > { %504 = vperm.xlu1 %2834, %v479_v8   ;;  %vm3263_vm6 = vmand %vm385_vm3, %vm386_vm4 }
  0x17   : > { %s2693_s8 = sshll.u32 %s219_s7, 3  ;;  %vm3274_vm10 = vmand %vm393_vm7, %vm394_vm9  ;;  %s3681_s7 = scalar_lea.vmem [#allocation3], %s3637_s6 }
  0x18   : > { %s222_s11 = scalar_lea.vmem %s4698_s4, %s2693_s8  ;;  %s2694_s8 = sshll.u32 %s3045_s22, 11 }
  0x19   : > { %v2838_v2 = vld [vmem:[%s222_s11] sm:$0xff]   ;;  %s2550_s9 = sshll.u32 %s3681_s7, 4  ;;  %s4644_s13 = scalar_lea.hbm %s4699_s5, %s2694_s8  ;;  %s4647_s9 = int_to_ptr.vmem [resolvable:$true] %s2550_s9 }
  0x1a   : > { %2708 = vmatmul.mubr.msk.bf16.vlgmr.msra.gmra.mrb[0].mxu1 %vm239_vm1, %v2838_v2  ;;  %2700 = vmatpush3.bf16.msra.mxu0 %v2838_v2  ;;  %s4652_s22 = scalar_lea.sflag [#allocation4], %s215_s30  ;;  %s2910_s14 = scalar_lea.vmem %s4647_s9, 2048 }
  0x1b   : > { %1638 = vperm.xlu1 %2834, %v477_v4   ;;  %p2911_p11 = scmp.ne.s32.totalorder %s4647_s9, %s2910_s14 }
  0x1d   : > { %2702 = vmatmul.mubr.msk.bf16.vlgmr.msra.gmra.mrb[0].mxu0 %vm239_vm1, %v2839_v3  ;;  %vm3248_vm1 = vmand %vm377_vm15, %vm378_vm0  ;;  %p2912_p12 = pnand %p2911_p11, %p3062_p5 }
  0x1f   : > { %1648 = vperm.xlu1 %2834, %v479_v8   ;;  %p2913_p13 = pneg %p2912_p12 }
  0x23   : > { %526 = vperm.xlu1 %2834, %v3095_v9  }
  0x27   : > { %536 = vperm.xlu1 %2834, %v3101_v10  }
  0x91   : > { %v3167_v4 = vpop.permute.xlu1 %499 }
  0xed   : > { %v3104_v11 = vpop.f32.mrb[0].mxu1 }
  0xee   : > { %v1444_v12 = vadd.f32 1e-06, %v3104_v11  ;;  %v2709_v13 = vpop.f32.mrb[1].mxu1 }
  0xef   : > { %v3107_v14 = vpop.f32.mrb[2].mxu1 }
  0xf0   : > { %2840 = vrcp.f32 %v1444_v12  ;;  %v1445_v15 = vadd.f32 1e-06, %v3107_v14  ;;  %v2710_v16 = vpop.f32.mrb[3].mxu1  ;;  %v277_v17 = vpop.f32.mrb[0].mxu0 }
  0xf1   : > { %v2703_v18 = vpop.f32.mrb[1].mxu0  ;;  %v3177_v12 = vpop.permute.xlu0 %494 }
  0xf2   : > { %2842 = vrcp.f32 %v1445_v15  ;;  %v280_v19 = vpop.f32.mrb[2].mxu0 }
  0xf3   : > { %v284_v20 = vadd.f32 1e-06, %v280_v19  ;;  %v2704_v21 = vpop.f32.mrb[3].mxu0 }
  0xf5   : > { %2844 = vrcp.f32 %v284_v20 }
  0xfa   : > { %v2841_v23 = vpop.eup %2840 }
  0xfb   : > { %v1447_v27 = vmul.f32 6.2831855, %v2841_v23 }
  0xfc   : > { %v2843_v28 = vpop.eup %2842 }
  0xfd   : > { %1452 = vperm.xlu0 %2835, %v1447_v27   ;;  %v1449_v32 = vmul.f32 6.2831855, %v2843_v28 }
  0xff   : > { %v2845_v31 = vpop.eup %2844 }
 0x100   : > { %v286_v33 = vmul.f32 6.2831855, %v2845_v31 }
 0x101   : > { %1457 = vperm.xlu0 %2835, %v1449_v32  }
 0x102   : > { %v290_v34 = vrot.slane %v286_v33, %v289_v29 }
 0x104   : > { %v291_v38 = vmul.f32 %v290_v34, %v277_v17  ;;  %v292_v39 = vmul.f32 %v290_v34, %v280_v19 }
 0x105   : > { %2836 = vset.pattern.permute.xlu0 %v2976_v6 }
 0x106   : > { %v405_v40 = vrot.slane %v292_v39, %v3115_v35  ;;  %509 = vperm.xlu0 %2836, %v480_v36   ;;  %v305_v41 = vrot.slane %v291_v38, %v3115_v35  ;;  %297 = vst.msk [vmem:[#allocation2] sm:$0x1] %vm3121_vm2, %v291_v38  ;;  %397 = vst.msk [vmem:[#allocation2 + $0x1] sm:$0x1] %vm3121_vm2, %v292_v39  ;;  %v435_v45 = vcombine.high %v292_v39, %v292_v39 }
 0x107   : > { %v344_v52 = vcombine.high %v291_v38, %v291_v38 }
 0x108   : > { %v306_v42 = vcombine.high %v305_v41, %v305_v41  ;;  %v406_v43 = vcombine.high %v405_v40, %v405_v40  ;;  %v413_v47 = vrot.slane %v405_v40, %v3115_v35  ;;  %v442_v50 = vrot.slane %v435_v45, %v3115_v35 }
 0x109   : > { %v313_v51 = vrot.slane %v305_v41, %v3115_v35  ;;  %v351_v56 = vrot.slane %v344_v52, %v3115_v35 }
 0x10a   : > { %1643 = vperm.xlu0 %2836, %v478_v5   ;;  %v320_v44 = vrot.slane %v306_v42, %v3115_v35  ;;  %v420_v46 = vrot.slane %v406_v43, %v3115_v35  ;;  %v425_v49 = vcombine.high %v413_v47, %v413_v47  ;;  %v449_v54 = vrot.slane %v442_v50, %v3115_v35  ;;  %v3169_v5 = vpop.permute.xlu1 %504 }
 0x10b   : > { %v328_v55 = vcombine.high %v313_v51, %v313_v51  ;;  %v454_v58 = vcombine.high %v442_v50, %v442_v50  ;;  %v358_v59 = vrot.slane %v351_v56, %v3115_v35  ;;  %v366_v62 = vcombine.high %v351_v56, %v351_v56 }
 0x10c   : > { %321 = vrot.lane.b32.xlu1 %v320_v44, %s2979_s10  ;;  %v430_v57 = vcombine.high %v420_v46, %v420_v46  ;;  %v336_v61 = vcombine.high %v320_v44, %v320_v44  ;;  %v466_v63 = vcombine.high %v449_v54, %v449_v54 }
 0x10d   : > { %v461_v60 = vrot.slane %v454_v58, %v3115_v35  ;;  %v373_v0 = vrot.slane %v366_v62, %v3115_v35  ;;  %v381_v2 = vcombine.high %v358_v59, %v358_v59 }
 0x10e   : > { %1653 = vperm.xlu0 %2836, %v480_v36   ;;  %v3171_v6 = vpop.permute.xlu1 %1638 }
 0x10f   : > { %v471_v1 = vcombine.high %v461_v60, %v461_v60  ;;  %v389_v3 = vcombine.high %v373_v0, %v373_v0 }
 0x110   : > { %421 = vrot.lane.b32.xlu1 %v420_v46, %s2979_s10 }
 0x112   : > { %531 = vperm.xlu0 %2836, %v3138_v48   ;;  %v3173_v7 = vpop.permute.xlu1 %1648 }
 0x114   : > { %426 = vrot.lane.b32.xlu1 %v425_v49, %s2980_s15 }
 0x116   : > { %541 = vperm.xlu0 %2836, %v3147_v53   ;;  %v3175_v8 = vpop.permute.xlu1 %526 }
 0x118   : > { %450 = vrot.lane.b32.xlu1 %v449_v54, %s2981_s16 }
 0x11a   : > { %329 = vrot.lane.b32.xlu0 %v328_v55, %s2980_s15  ;;  %v3179_v13 = vpop.permute.xlu1 %536 }
 0x11c   : > { %431 = vrot.lane.b32.xlu1 %v430_v57, %s2982_s17 }
 0x11e   : > { %359 = vrot.lane.b32.xlu0 %v358_v59, %s2981_s16 }
 0x120   : > { %462 = vrot.lane.b32.xlu1 %v461_v60, %s2983_s23 }
 0x122   : > { %337 = vrot.lane.b32.xlu0 %v336_v61, %s2982_s17 }
 0x124   : > { %467 = vrot.lane.b32.xlu1 %v466_v63, %s2984_s25 }
 0x126   : > { %374 = vrot.lane.b32.xlu0 %v373_v0, %s2983_s23 }
 0x128   : > { %472 = vrot.lane.b32.xlu1 %v471_v1, %s2985_s26 }
 0x12a   : > { %382 = vrot.lane.b32.xlu0 %v381_v2, %s2984_s25 }
 0x12e   : > { %390 = vrot.lane.b32.xlu0 %v389_v3, %s2985_s26 }
 0x17c   : > { %v1453_v15 = vpop.permute.xlu0 %1452 }
 0x17d   : > { %v3188_v17 = vmul.f32 %v1453_v15, %v3104_v11 }
 0x17e   : > { %v322_v18 = vpop.permute.xlu1 %321 }
 0x17f   : > { %v1470_v19 = vrot.slane %v3188_v17, %v3115_v35  ;;  %327 = vst.msk [vmem:[#allocation2] sm:$0x1] %vm3183_vm5, %v322_v18  ;;  %v1500_v11 = vcombine.high %v3188_v17, %v3188_v17 }
 0x180   : > { %v1458_v20 = vpop.permute.xlu0 %1457 }
 0x181   : > { %v3195_v21 = vmul.f32 %v1458_v20, %v3107_v14  ;;  %v1471_v23 = vcombine.high %v1470_v19, %v1470_v19  ;;  %v1478_v28 = vrot.slane %v1470_v19, %v3115_v35  ;;  %v1507_v31 = vrot.slane %v1500_v11, %v3115_v35 }
 0x182   : > { %v422_v25 = vpop.permute.xlu1 %421 }
 0x183   : > { %v1549_v26 = vrot.slane %v3195_v21, %v3115_v35  ;;  %v1485_v27 = vrot.slane %v1471_v23, %v3115_v35  ;;  %424 = vst.msk [vmem:[#allocation2 + $0x1] sm:$0x1] %vm3183_vm5, %v422_v25  ;;  %v1579_v33 = vcombine.high %v3195_v21, %v3195_v21  ;;  %v1490_v36 = vcombine.high %v1478_v28, %v1478_v28 }
 0x184   : > { %v1514_v42 = vrot.slane %v1507_v31, %v3115_v35  ;;  %v1519_v51 = vcombine.high %v1507_v31, %v1507_v31  ;;  %v4701_v23 = vsub.s32 0, %v3111_v24 }
 0x185   : > { %v3211_v29 = vpop.permute.xlu0 %509  ;;  %1486 = vrot.lane.b32.xlu0 %v1485_v27, %s2979_s10  ;;  %v1550_v30 = vcombine.high %v1549_v26, %v1549_v26  ;;  %v1557_v38 = vrot.slane %v1549_v26, %v3115_v35  ;;  %v1586_v43 = vrot.slane %v1579_v33, %v3115_v35  ;;  %v1495_v50 = vcombine.high %v1485_v27, %v1485_v27 }
 0x186   : > { %v427_v32 = vpop.permute.xlu1 %426  ;;  %v1526_v57 = vrot.slane %v1519_v51, %v3115_v35  ;;  %v1531_v63 = vcombine.high %v1514_v42, %v1514_v42 }
 0x187   : > { %v1564_v34 = vrot.slane %v1550_v30, %v3115_v35  ;;  %429 = vst.msk [vmem:[#allocation2 + $0x1] sm:$0x1] %vm3207_vm8, %v427_v32  ;;  %v1569_v41 = vcombine.high %v1557_v38, %v1557_v38  ;;  %v1593_v49 = vrot.slane %v1586_v43, %v3115_v35  ;;  %v1598_v58 = vcombine.high %v1586_v43, %v1586_v43 }
 0x188   : > { %v1536_v3 = vcombine.high %v1526_v57, %v1526_v57 }
 0x189   : > { %v3221_v39 = vpop.permute.xlu0 %1643  ;;  %1565 = vrot.lane.b32.xlu1 %v1564_v34, %s2979_s10  ;;  %1491 = vrot.lane.b32.xlu0 %v1490_v36, %s2980_s15  ;;  %v1574_v56 = vcombine.high %v1564_v34, %v1564_v34  ;;  %v1605_v62 = vrot.slane %v1598_v58, %v3115_v35  ;;  %v1610_v2 = vcombine.high %v1593_v49, %v1593_v49 }
 0x18a   : > { %v451_v40 = vpop.permute.xlu1 %450 }
 0x18b   : > { %v1615_v15 = vcombine.high %v1605_v62, %v1605_v62 }
 0x18d   : > { %v3235_v45 = vpop.permute.xlu0 %1653  ;;  %1570 = vrot.lane.b32.xlu1 %v1569_v41, %s2980_s15  ;;  %1515 = vrot.lane.b32.xlu0 %v1514_v42, %s2981_s16  ;;  %s2992_s15 = smov [#allocation3]  }
 0x18e   : > { %v432_v47 = vpop.permute.xlu1 %431 }
 0x18f   : > { %434 = vst.msk [vmem:[#allocation2 + $0x1] sm:$0x1] %vm3231_vm13, %v432_v47 }
 0x190   : > { %453 = vst.msk [vmem:[#allocation2 + $0x1] sm:$0x1] %vm3239_vm14, %v451_v40 }
 0x191   : > { %v3254_v54 = vpop.permute.xlu0 %531  ;;  %1594 = vrot.lane.b32.xlu1 %v1593_v49, %s2981_s16  ;;  %1496 = vrot.lane.b32.xlu0 %v1495_v50, %s2982_s17  ;;  %s2914_s16 = sshll.u32 %s2992_s15, 4  ;;  %s2915_s16 = int_to_ptr.vmem [resolvable:$false] %s2914_s16 }
 0x192   : > { %v463_v55 = vpop.permute.xlu1 %462  ;;  %p2917_p0 = scmp.lt.s32.totalorder %s4647_s9, %s2915_s16 }
 0x193   : > { %465 = vst.msk [vmem:[#allocation2 + $0x1] sm:$0x1] %vm3248_vm1, %v463_v55 }
 0x195   : > { %v542_v60 = vpop.permute.xlu0 %541  ;;  %1575 = vrot.lane.b32.xlu1 %v1574_v56, %s2982_s17  ;;  %1527 = vrot.lane.b32.xlu0 %v1526_v57, %s2983_s23  ;;  %s2916_s17 = scalar_lea.vmem %s2915_s16, 4096 }
 0x196   : > { %v468_v61 = vpop.permute.xlu1 %467  ;;  %p2918_p1 = scmp.lt.s32.totalorder %s2916_s17, %s2910_s14 }
 0x197   : > { %470 = vst.msk [vmem:[#allocation2 + $0x1] sm:$0x1] %vm3263_vm6, %v468_v61 }
 0x198   : > { %p2919_p2 = por %p2918_p1, %p2917_p0 }
 0x199   : > { %v330_v1 = vpop.permute.xlu0 %329  ;;  %1606 = vrot.lane.b32.xlu1 %v1605_v62, %s2983_s23  ;;  %1532 = vrot.lane.b32.xlu0 %v1531_v63, %s2984_s25 }
 0x19a   : > { %335 = vst.msk [vmem:[#allocation2] sm:$0x1] %vm3207_vm8, %v330_v1  ;;  %v473_v22 = vpop.permute.xlu1 %472  ;;  %p2920_p3 = pnand %p2919_p2, %p2913_p13 }
 0x19b   : > { %475 = vst.msk [vmem:[#allocation2 + $0x1] sm:$0x1] %vm3274_vm10, %v473_v22 }
 0x19d   : > { %v360_v35 = vpop.permute.xlu0 %359  ;;  %1611 = vrot.lane.b32.xlu1 %v1610_v2, %s2984_s25  ;;  %1537 = vrot.lane.b32.xlu0 %v1536_v3, %s2985_s26 }
 0x1a1   : > { %1616 = vrot.lane.b32.xlu1 %v1615_v15, %s2985_s26  ;;  %1675 = vperm.xlu0 %2836, %v3138_v48   ;;  %v338_v18 = vpop.permute.xlu0 %337 }
 0x1a2   : > { %343 = vst.msk [vmem:[#allocation2] sm:$0x1] %vm3231_vm13, %v338_v18 }
 0x1a3   : > { %365 = vst.msk [vmem:[#allocation2] sm:$0x1] %vm3239_vm14, %v360_v35 }
 0x1a5   : > { %1670 = vperm.xlu1 %2834, %v3095_v9   ;;  %1685 = vperm.xlu0 %2836, %v3147_v53   ;;  %v375_v19 = vpop.permute.xlu0 %374  ;;  %v4700_v9 = vsub.s32 1, %v3111_v24 }
 0x1a6   : > { %380 = vst.msk [vmem:[#allocation2] sm:$0x1] %vm3248_vm1, %v375_v19  ;;  %v2986_v19 = vmov 683565275  }
 0x1a9   : > { %1680 = vperm.xlu1 %2834, %v3101_v10   ;;  %v383_v20 = vpop.permute.xlu0 %382 }
 0x1aa   : > { %388 = vst.msk [vmem:[#allocation2] sm:$0x1] %vm3263_vm6, %v383_v20 }
 0x1ad   : > { %v391_v48 = vpop.permute.xlu0 %390 }
 0x1ae   : > { %396 = vst.msk [vmem:[#allocation2] sm:$0x1] %vm3274_vm10, %v391_v48 }
 0x1b5   : > { %v476_v11 = vld [vmem:[#allocation2] sm:$0x3] }
 0x1b6   : > { %1462 = vst.msk [vmem:[#allocation2] sm:$0x1] %vm3121_vm2, %v3188_v17  ;;  %1541 = vst.msk [vmem:[#allocation2 + $0x1] sm:$0x1] %vm3121_vm2, %v3195_v21  ;;  %v485_v10 = vrot.slane %v476_v11, %v4701_v23  ;;  %v489_v53 = vrot.slane %v476_v11, %v4700_v9  ;;  %v2987_v11 = vmov 2475754826  }
 0x1b8   : > { %v512_v25 = vmul.f32 %v3177_v12, %v485_v10  ;;  %v513_v26 = vmul.f32 %v3177_v12, %v489_v53  ;;  %v514_v27 = vmul.f32 %v3167_v4, %v485_v10  ;;  %v516_v28 = vmul.f32 %v3169_v5, %v485_v10 }
 0x1b9   : > { %v517_v17 = vmul.f32 %v3169_v5, %v489_v53  ;;  %v518_v30 = vmul.f32 %v3211_v29, %v485_v10  ;;  %v519_v37 = vmul.f32 %v3211_v29, %v489_v53  ;;  %v515_v51 = vmul.f32 %v3167_v4, %v489_v53 }
 0x1ba   : > { %v3321_v21 = vadd.f32 %v3175_v8, %v512_v25  ;;  %v3324_v31 = vadd.f32 %v3175_v8, %v513_v26  ;;  %v3327_v32 = vadd.f32 %v3254_v54, %v514_v27  ;;  %v3330_v12 = vadd.f32 %v3179_v13, %v516_v28 }
 0x1bb   : > { %v3333_v33 = vadd.f32 %v3179_v13, %v517_v17  ;;  %v3335_v5 = vadd.f32 %v542_v60, %v518_v30  ;;  %v3337_v34 = vadd.f32 %v542_v60, %v519_v37  ;;  %v3351_v63 = vadd.f32 %v3254_v54, %v515_v51 }
 0x1bc   : > { %v552_v29 = vand.u32 2147483647, %v3321_v21  ;;  %v555_v36 = vand.u32 2139095040, %v3321_v21  ;;  %v656_v8 = vand.u32 2147483647, %v3324_v31  ;;  %v659_v38 = vand.u32 2139095040, %v3324_v31 }
 0x1bd   : > { %v763_v43 = vand.u32 2139095040, %v3327_v32  ;;  %v4703_v60 = vand.u32 2147483647, %v3327_v32  ;;  %v2988_v53 = vmov 2131351028  }
 0x1be   : > { %v556_v40 = vshrl.u32 %v555_v36, 23  ;;  %v559_v41 = vand.u32 8388607, %v552_v29  ;;  %v660_v42 = vshrl.u32 %v659_v38, 23  ;;  %v663_v13 = vand.u32 8388607, %v656_v8 }
 0x1bf   : > { %v764_v50 = vshrl.u32 %v763_v43, 23  ;;  %v3359_v4 = vand.u32 8388607, %v4703_v60  ;;  %v2989_v26 = vmov 2102212464  }
 0x1c0   : > { %v2622_v47 = vadd.s32 4294967169, %v556_v40  ;;  %v2626_v49 = vadd.s32 4294967169, %v660_v42  ;;  %v560_v55 = vor.u32 8388608, %v559_v41  ;;  %v664_v57 = vor.u32 8388608, %v663_v13 }
 0x1c1   : > { %v2630_v61 = vadd.s32 4294967169, %v764_v50  ;;  %v4706_v28 = vmov 920167782   ;;  %v4704_v41 = vmov 1326507024  }
 0x1c2   : > { %v562_v56 = vadd.s32 1, %v2622_v47  ;;  %v666_v58 = vadd.s32 1, %v2626_v49  ;;  %v3353_v3 = vshll.u32 %v560_v55, 8  ;;  %v3355_v35 = vshll.u32 %v664_v57, 8 }
 0x1c3   : > { %v3361_v15 = vadd.s32 1, %v2630_v61 }
 0x1c4   : > { %vm563_vm2 = vcmp.gt.s32.totalorder %v562_v56, 0  ;;  %vm667_vm11 = vcmp.gt.s32.totalorder %v666_v58, 0 }
 0x1c5   : > { %v564_v62 = vsel %vm563_vm2, %v562_v56, 0  ;;  %v668_v2 = vsel %vm667_vm11, %v666_v58, 0  ;;  %vm771_vm4 = vcmp.gt.s32.totalorder %v3361_v15, 0 }
 0x1c6   : > { %v565_v1 = vshrl.u32 %v564_v62, 5  ;;  %v566_v22 = vand.u32 31, %v564_v62  ;;  %v3364_v48 = vshrl.u32 %v668_v2, 5  ;;  %v670_v54 = vand.u32 31, %v668_v2 }
 0x1c8   : > { %v567_v18 = vsub.s32 32, %v566_v22  ;;  %v569_v20 = vshll.u32 %v2986_v19, %v566_v22  ;;  %v572_v10 = vshll.u32 %v2987_v11, %v566_v22  ;;  %v575_v25 = vshll.u32 %v2988_v53, %v566_v22 }
 0x1c9   : > { %v578_v27 = vshll.u32 %v2989_v26, %v566_v22  ;;  %v581_v17 = vshll.u32 %v4706_v28, %v566_v22  ;;  %vm584_vm12 = vcmp.lt.s32.totalorder %v565_v1, 1  ;;  %vm585_vm15 = vcmp.lt.s32.totalorder %v565_v1, 2 }
 0x1ca   : > { %v570_v30 = vshrl.u32 %v2987_v11, %v567_v18  ;;  %v573_v37 = vshrl.u32 %v2988_v53, %v567_v18  ;;  %v576_v36 = vshrl.u32 %v2989_v26, %v567_v18  ;;  %v568_v38 = vshrl.u32 %v2986_v19, %v567_v18 }
 0x1cb   : > { %v579_v40 = vshrl.u32 %v4706_v28, %v567_v18  ;;  %v582_v42 = vshrl.u32 %v4704_v41, %v567_v18  ;;  %v671_v49 = vsub.s32 32, %v670_v54  ;;  %vm586_vm0 = vcmp.lt.s32.totalorder %v565_v1, 3 }
 0x1cc   : > { %v571_v13 = vor.u32 %v570_v30, %v569_v20  ;;  %v574_v43 = vor.u32 %v573_v37, %v572_v10  ;;  %v577_v47 = vor.u32 %v576_v36, %v575_v25  ;;  %vm587_vm3 = vcmp.lt.s32.totalorder %v565_v1, 4 }
 0x1cd   : > { %v580_v50 = vor.u32 %v579_v40, %v578_v27  ;;  %v583_v51 = vor.u32 %v582_v42, %v581_v17  ;;  %v673_v2 = vshll.u32 %v2986_v19, %v670_v54  ;;  %v674_v10 = vshrl.u32 %v2987_v11, %v671_v49 }
 0x1ce   : > { %v588_v55 = vsel %vm584_vm12, %v568_v38, %v571_v13  ;;  %v589_v56 = vsel %vm587_vm3, %v577_v47, 2102212464  ;;  %v592_v57 = vsel %vm584_vm12, %v571_v13, %v574_v43  ;;  %v596_v58 = vsel %vm584_vm12, %v574_v43, %v577_v47 }
 0x1cf   : > { %v590_v61 = vsel %vm586_vm0, %v574_v43, %v589_v56  ;;  %v593_v62 = vsel %vm587_vm3, %v580_v50, 920167782  ;;  %v597_v22 = vsel %vm587_vm3, %v583_v51, 1326507024  ;;  %v676_v25 = vshll.u32 %v2987_v11, %v670_v54 }
 0x1d0   : > { %v594_v18 = vsel %vm586_vm0, %v577_v47, %v593_v62  ;;  %v598_v20 = vsel %vm586_vm0, %v580_v50, %v597_v22  ;;  %v591_v27 = vsel %vm585_vm15, %v588_v55, %v590_v61  ;;  %v677_v37 = vshrl.u32 %v2988_v53, %v671_v49 }
 0x1d1   : > { %v595_v17 = vsel %vm585_vm15, %v592_v57, %v594_v18  ;;  %v599_v30 = vsel %vm585_vm15, %v596_v58, %v598_v20  ;;  %v675_v13 = vor.u32 %v674_v10, %v673_v2  ;;  %v679_v47 = vshll.u32 %v2988_v53, %v670_v54 }
 0x1d2   : > { %v3388_v36 = vmul.u32.u64.low %v3353_v3, %v599_v30  ;;  %v3389_v38 = vmul.u32.u64.high %v3353_v3, %v599_v30, %v3388_v36  ;;  %v3392_v40 = vmul.u32.u64.low %v3353_v3, %v595_v17  ;;  %v3393_v42 = vmul.u32.u64.high %v3353_v3, %v595_v17, %v3392_v40 }
 0x1d3   : > { %v678_v43 = vor.u32 %v677_v37, %v676_v25  ;;  %v680_v50 = vshrl.u32 %v2989_v26, %v671_v49  ;;  %v672_v1 = vshrl.u32 %v2986_v19, %v671_v49  ;;  %v682_v51 = vshll.u32 %v2989_v26, %v670_v54 }
 0x1d4   : > { %v683_v55 = vshrl.u32 %v4706_v28, %v671_v49  ;;  %v686_v56 = vshrl.u32 %v4704_v41, %v671_v49  ;;  %v607_v57 = vmul.u32 %v3353_v3, %v591_v27  ;;  %v685_v61 = vshll.u32 %v4706_v28, %v670_v54 }
 0x1d5   : > { %v681_v58 = vor.u32 %v680_v50, %v679_v47  ;;  %vm688_vm7 = vcmp.lt.s32.totalorder %v3364_v48, 1  ;;  %vm609_vm9 = vc.u32 %v3389_v38, %v3392_v40  ;;  %v610_v62 = vadd.s32 1, %v3393_v42 }
 0x1d6   : > { %v684_v22 = vor.u32 %v683_v55, %v682_v51  ;;  %vm689_vm2 = vcmp.lt.s32.totalorder %v3364_v48, 2  ;;  %v687_v2 = vor.u32 %v686_v56, %v685_v61  ;;  %vm690_vm11 = vcmp.lt.s32.totalorder %v3364_v48, 3 }
 0x1d7   : > { %vm691_vm12 = vcmp.lt.s32.totalorder %v3364_v48, 4  ;;  %v696_v49 = vsel %vm688_vm7, %v675_v13, %v678_v43  ;;  %v611_v3 = vsel %vm609_vm9, %v610_v62, %v3393_v42  ;;  %v700_v20 = vsel %vm688_vm7, %v678_v43, %v681_v58 }
 0x1d8   : > { %v693_v18 = vsel %vm691_vm12, %v681_v58, 2102212464  ;;  %v697_v54 = vsel %vm691_vm12, %v684_v22, 920167782  ;;  %v612_v10 = vadd.s32 %v611_v3, %v607_v57  ;;  %v692_v25 = vsel %vm688_vm7, %v672_v1, %v675_v13 }
 0x1d9   : > { %v698_v27 = vsel %vm690_vm11, %v681_v58, %v697_v54  ;;  %v701_v17 = vsel %vm691_vm12, %v687_v2, 1326507024  ;;  %v694_v30 = vsel %vm690_vm11, %v678_v43, %v693_v18  ;;  %v772_v47 = vsel %vm771_vm4, %v3361_v15, 0 }
 0x1da   : > { %v699_v37 = vsel %vm689_vm2, %v696_v49, %v698_v27  ;;  %v702_v36 = vsel %vm690_vm11, %v684_v22, %v701_v17  ;;  %v613_v50 = vadd.s32 536870912, %v612_v10  ;;  %v4702_v1 = vand.u32 2147483647, %v3351_v63 }
 0x1db   : > { %v703_v42 = vsel %vm689_vm2, %v700_v20, %v702_v36  ;;  %v3420_v51 = vmul.u32.u64.low %v3355_v35, %v699_v37  ;;  %v3421_v55 = vmul.u32.u64.high %v3355_v35, %v699_v37, %v3420_v51  ;;  %v695_v57 = vsel %vm689_vm2, %v692_v25, %v694_v30 }
 0x1dc   : > { %v3425_v13 = vmul.u32.u64.low %v3355_v35, %v703_v42  ;;  %v3426_v43 = vmul.u32.u64.high %v3355_v35, %v703_v42, %v3425_v13  ;;  %v614_v56 = vshrl.u32 %v613_v50, 30  ;;  %v768_v15 = vor.u32 8388608, %v3359_v4 }
 0x1dd   : > { %v774_v58 = vand.u32 31, %v772_v47  ;;  %vm554_vm15 = vcmp.lt.s32.totalorder %v3321_v21, 0  ;;  %v714_v62 = vadd.s32 1, %v3421_v55  ;;  %v711_v2 = vmul.u32 %v3355_v35, %v695_v57 }
 0x1de   : > { %v615_v61 = vshll.u32 %v614_v56, 30  ;;  %vm713_vm0 = vc.u32 %v3426_v43, %v3420_v51  ;;  %v867_v49 = vand.u32 2139095040, %v3351_v63  ;;  %v3440_v48 = vand.u32 8388607, %v4702_v1 }
 0x1df   : > { %v775_v22 = vsub.s32 32, %v774_v58  ;;  %v715_v4 = vsel %vm713_vm0, %v714_v62, %v3421_v55  ;;  %v3445_v18 = vshrl.u32 %v772_v47, 5  ;;  %v3447_v54 = vshll.u32 %v768_v15, 8 }
 0x1e0   : > { %v3442_v3 = vsub.s32 %v612_v10, %v615_v61  ;;  %vm3451_vm3 = vcmp.le.f32.partialorder %v552_v29, 0.7853982  ;;  %v716_v20 = vadd.s32 %v715_v4, %v711_v2  ;;  %v777_v25 = vshll.u32 %v2986_v19, %v774_v58 }
 0x1e1   : > { %v778_v27 = vshrl.u32 %v2987_v11, %v775_v22  ;;  %v780_v10 = vshll.u32 %v2987_v11, %v774_v58  ;;  %v781_v30 = vshrl.u32 %v2988_v53, %v775_v22  ;;  %v783_v37 = vshll.u32 %v2988_v53, %v774_v58 }
 0x1e2   : > { %v618_v17 = vsub.s32 0, %v3442_v3  ;;  %v784_v36 = vshrl.u32 %v2989_v26, %v775_v22  ;;  %v638_v47 = vsub.s32 4, %v614_v56  ;;  %v717_v29 = vadd.s32 536870912, %v716_v20 }
 0x1e3   : > { %v786_v50 = vshll.u32 %v2989_v26, %v774_v58  ;;  %v868_v42 = vshrl.u32 %v867_v49, 23  ;;  %v787_v13 = vshrl.u32 %v4706_v28, %v775_v22  ;;  %vm792_vm4 = vcmp.lt.s32.totalorder %v3445_v18, 1 }
 0x1e4   : > { %v2623_v55 = vmin.u32 %v618_v17, %v3442_v3  ;;  %vm794_vm7 = vcmp.lt.s32.totalorder %v3445_v18, 3  ;;  %v3467_v57 = vshrl.u32 %v717_v29, 30  ;;  %v789_v15 = vshll.u32 %v4706_v28, %v774_v58 }
 0x1e5   : > { %v790_v61 = vshrl.u32 %v4704_v41, %v775_v22  ;;  %vm795_vm9 = vcmp.lt.s32.totalorder %v3445_v18, 4  ;;  %v779_v2 = vor.u32 %v778_v27, %v777_v25  ;;  %v782_v4 = vor.u32 %v781_v30, %v780_v10 }
 0x1e6   : > { %v620_v62 = vclz %v2623_v55  ;;  %v785_v49 = vor.u32 %v784_v36, %v783_v37  ;;  %v639_v17 = vsel %vm554_vm15, %v638_v47, %v614_v56  ;;  %v719_v9 = vshll.u32 %v3467_v57, 30 }
 0x1e7   : > { %v776_v23 = vshrl.u32 %v2986_v19, %v775_v22  ;;  %v788_v1 = vor.u32 %v787_v13, %v786_v50  ;;  %v608_v29 = vadd.s32 %v3392_v40, %v3389_v38  ;;  %v791_v60 = vor.u32 %v790_v61, %v789_v15 }
 0x1e8   : > { %v2624_v58 = vadd.s32 4294967294, %v620_v62  ;;  %v2634_v41 = vadd.s32 4294967169, %v868_v42  ;;  %v3478_v28 = vsub.s32 %v716_v20, %v719_v9  ;;  %vm793_vm2 = vcmp.lt.s32.totalorder %v3445_v18, 2 }
 0x1e9   : > { %v797_v25 = vsel %vm795_vm9, %v785_v49, 2102212464  ;;  %v801_v56 = vsel %vm795_vm9, %v788_v1, 920167782  ;;  %v641_v22 = vsel %vm3451_vm3, 0, %v639_v17  ;;  %v800_v38 = vsel %vm792_vm4, %v779_v2, %v782_v4 }
 0x1ea   : > { %vm2625_vm11 = vcmp.lt.s32.totalorder %v2624_v58, 0  ;;  %v802_v40 = vsel %vm794_vm7, %v785_v49, %v801_v56  ;;  %v722_v20 = vsub.s32 0, %v3478_v28  ;;  %v796_v27 = vsel %vm792_vm4, %v776_v23, %v779_v2 }
 0x1eb   : > { %v623_v9 = vsel %vm2625_vm11, 0, %v2624_v58  ;;  %v804_v10 = vsel %vm792_vm4, %v782_v4, %v785_v49  ;;  %vm658_vm12 = vcmp.lt.s32.totalorder %v3324_v31, 0  ;;  %v798_v36 = vsel %vm794_vm7, %v782_v4, %v797_v25 }
 0x1ec   : > { %v624_v30 = vsub.s32 32, %v623_v9  ;;  %v628_v37 = vsub.s32 4294967266, %v623_v9  ;;  %v805_v47 = vsel %vm795_vm9, %v791_v60, 1326507024  ;;  %v625_v50 = vshll.u32 %v3442_v3, %v623_v9 }
 0x1ed   : > { %v2627_v42 = vmin.u32 %v722_v20, %v3478_v28  ;;  %v803_v23 = vsel %vm793_vm2, %v800_v38, %v802_v40  ;;  %v806_v55 = vsel %vm794_vm7, %v788_v1, %v805_v47  ;;  %v874_v62 = vadd.s32 1, %v2634_v41 }
 0x1ee   : > { %v626_v13 = vshrl.u32 %v608_v29, %v624_v30  ;;  %v629_v15 = vadd.s32 127, %v628_v37  ;;  %v807_v61 = vsel %vm793_vm2, %v804_v10, %v806_v55  ;;  %v645_v2 = vadd.s32 3, %v641_v22 }
 0x1ef   : > { %v724_v4 = vclz %v2627_v42  ;;  %v742_v60 = vsub.s32 4, %v3467_v57  ;;  %v799_v3 = vsel %vm793_vm2, %v796_v27, %v798_v36  ;;  %vm875_vm0 = vcmp.gt.s32.totalorder %v874_v62, 0 }
 0x1f0   : > { %v627_v49 = vor.u32 %v626_v13, %v625_v50  ;;  %v630_v17 = vshll.u32 %v629_v15, 23  ;;  %v3513_v58 = vmul.u32.u64.low %v3447_v54, %v807_v61  ;;  %v3514_v25 = vmul.u32.u64.high %v3447_v54, %v807_v61, %v3513_v58 }
 0x1f1   : > { %v2628_v1 = vadd.s32 4294967294, %v724_v4  ;;  %v3517_v29 = vmul.u32.u64.low %v3447_v54, %v803_v23  ;;  %v3518_v56 = vmul.u32.u64.high %v3447_v54, %v803_v23, %v3517_v29  ;;  %v712_v22 = vadd.s32 %v3420_v51, %v3426_v43 }
 0x1f2   : > { %v631_v41 = vor.u32 4788187, %v630_v17  ;;  %v872_v18 = vor.u32 8388608, %v3440_v48  ;;  %v876_v38 = vsel %vm875_vm0, %v874_v62, 0  ;;  %v3524_v40 = vand.u32 3, %v645_v2 }
 0x1f3   : > { %vm2629_vm4 = vcmp.lt.s32.totalorder %v2628_v1, 0  ;;  %v815_v9 = vmul.u32 %v3447_v54, %v799_v3  ;;  %v878_v20 = vand.u32 31, %v876_v38  ;;  %v634_v10 = vcvt.s32.f32 %v627_v49 }
 0x1f4   : > { %v632_v27 = vand.u32 2147483647, %v631_v41  ;;  %v727_v30 = vsel %vm2629_vm4, 0, %v2628_v1  ;;  %vm817_vm7 = vc.u32 %v3514_v25, %v3517_v29  ;;  %vm3531_vm9 = vcmp.le.f32.partialorder %v656_v8, 0.7853982 }
 0x1f5   : > { %v728_v51 = vsub.s32 32, %v727_v30  ;;  %v732_v43 = vsub.s32 4294967266, %v727_v30  ;;  %v3538_v36 = vsel %vm658_vm12, %v742_v60, %v3467_v57  ;;  %v818_v54 = vadd.s32 1, %v3518_v56 }
 0x1f6   : > { %v635_v50 = vmul.f32 %v634_v10, %v632_v27  ;;  %v729_v42 = vshll.u32 %v3478_v28, %v727_v30  ;;  %v3542_v23 = vshrl.u32 %v876_v38, 5  ;;  %v879_v55 = vsub.s32 32, %v878_v20 }
 0x1f7   : > { %v1487_v47 = vpop.permute.xlu0 %1486  ;;  %v730_v8 = vshrl.u32 %v712_v22, %v728_v51  ;;  %v733_v13 = vadd.s32 127, %v732_v43  ;;  %v819_v15 = vsel %vm817_vm7, %v818_v54, %v3518_v56  ;;  %v881_v61 = vshll.u32 %v2986_v19, %v878_v20 }
 0x1f8   : > { %1489 = vst.msk [vmem:[#allocation2] sm:$0x1] %vm3183_vm5, %v1487_v47  ;;  %v636_v57 = vxor.u32 2147483648, %v635_v50  ;;  %v820_v62 = vadd.s32 %v819_v15, %v815_v9  ;;  %v882_v2 = vshrl.u32 %v2987_v11, %v879_v55  ;;  %v884_v4 = vshll.u32 %v2987_v11, %v878_v20 }
 0x1f9   : > { %v731_v60 = vor.u32 %v730_v8, %v729_v42  ;;  %v734_v28 = vshll.u32 %v733_v13, 23  ;;  %v885_v3 = vshrl.u32 %v2988_v53, %v879_v55  ;;  %v887_v49 = vshll.u32 %v2988_v53, %v878_v20 }
 0x1fa   : > { %v637_v1 = vsel %vm554_vm15, %v636_v57, %v635_v50  ;;  %v821_v56 = vadd.s32 536870912, %v820_v62  ;;  %v888_v41 = vshrl.u32 %v2989_v26, %v879_v55  ;;  %v890_v22 = vshll.u32 %v2989_v26, %v878_v20 }
 0x1fb   : > { %v1566_v17 = vpop.permute.xlu1 %1565  ;;  %v1492_v58 = vpop.permute.xlu0 %1491  ;;  %v640_v38 = vsel %vm3451_vm3, %v3321_v21, %v637_v1  ;;  %v735_v9 = vor.u32 4788187, %v734_v28  ;;  %v738_v27 = vcvt.s32.f32 %v731_v60  ;;  %v883_v10 = vor.u32 %v882_v2, %v881_v61 }
 0x1fc   : > { %1568 = vst.msk [vmem:[#allocation2 + $0x1] sm:$0x1] %vm3183_vm5, %v1566_v17  ;;  %2846 = vcosq.f32 %v640_v38  ;;  %v3563_v30 = vshrl.u32 %v821_v56, 30  ;;  %v886_v51 = vor.u32 %v885_v3, %v884_v4  ;;  %v4730_v43 = vmov 920167782  }
 0x1fd   : > { %1494 = vst.msk [vmem:[#allocation2] sm:$0x1] %vm3207_vm8, %v1492_v58  ;;  %v891_v54 = vshrl.u32 %v4730_v43, %v879_v55  ;;  %2848 = vsinq.f32 %v640_v38  ;;  %v736_v47 = vand.u32 2147483647, %v735_v9  ;;  %v893_v16 = vshll.u32 %v4730_v43, %v878_v20 }
 0x1fe   : > { %v4731_v50 = vmov 1326507024   ;;  %v745_v35 = vsel %vm3531_vm9, 0, %v3538_v36  ;;  %v823_v15 = vshll.u32 %v3563_v30, 30  ;;  %vm896_vm5 = vcmp.lt.s32.totalorder %v3542_v23, 1 }
 0x1ff   : > { %v894_v42 = vshrl.u32 %v4731_v50, %v879_v55  ;;  %v1571_v8 = vpop.permute.xlu1 %1570  ;;  %v1516_v13 = vpop.permute.xlu0 %1515  ;;  %v892_v61 = vor.u32 %v891_v54, %v890_v22  ;;  %v739_v57 = vmul.f32 %v738_v27, %v736_v47  ;;  %v880_v2 = vshrl.u32 %v2986_v19, %v879_v55 }
 0x200   : > { %1573 = vst.msk [vmem:[#allocation2 + $0x1] sm:$0x1] %vm3207_vm8, %v1571_v8  ;;  %v889_v20 = vor.u32 %v888_v41, %v887_v49  ;;  %v3578_v4 = vshll.u32 %v872_v18, 8  ;;  %v3580_v60 = vsub.s32 %v820_v62, %v823_v15  ;;  %vm898_vm15 = vcmp.lt.s32.totalorder %v3542_v23, 3 }
 0x201   : > { %v895_v28 = vor.u32 %v894_v42, %v893_v16  ;;  %vm899_vm3 = vcmp.lt.s32.totalorder %v3542_v23, 4  ;;  %v740_v36 = vxor.u32 2147483648, %v739_v57  ;;  %vm762_vm2 = vcmp.lt.s32.totalorder %v3327_v32, 0 }
 0x202   : > { %vm897_vm8 = vcmp.lt.s32.totalorder %v3542_v23, 2  ;;  %v901_v14 = vsel %vm899_vm3, %v889_v20, 2102212464  ;;  %v904_v48 = vsel %vm896_vm5, %v883_v10, %v886_v51  ;;  %vm647_vm11 = vcmp.lt.s32.totalorder %v3524_v40, 2 }
 0x203   : > { %v1595_v18 = vpop.permute.xlu1 %1594  ;;  %v1497_v55 = vpop.permute.xlu0 %1496  ;;  %v749_v62 = vadd.s32 3, %v745_v35  ;;  %v826_v3 = vsub.s32 0, %v3580_v60  ;;  %v905_v49 = vsel %vm899_vm3, %v892_v61, 920167782  ;;  %vm644_vm0 = vweird.f32 %v3321_v21 }
 0x204   : > { %1499 = vst.msk [vmem:[#allocation2] sm:$0x1] %vm3231_vm13, %v1497_v55  ;;  %v741_v17 = vsel %vm658_vm12, %v740_v36, %v739_v57  ;;  %v900_v58 = vsel %vm896_vm5, %v880_v2, %v883_v10  ;;  %v902_v1 = vsel %vm898_vm15, %v886_v51, %v901_v14  ;;  %v906_v56 = vsel %vm898_vm15, %v889_v20, %v905_v49 }
 0x205   : > { %1518 = vst.msk [vmem:[#allocation2] sm:$0x1] %vm3239_vm14, %v1516_v13  ;;  %v744_v41 = vsel %vm3531_vm9, %v3324_v31, %v741_v17  ;;  %v4732_v22 = vand.u32 2147483647, %v3327_v32  ;;  %v2631_v9 = vmin.u32 %v826_v3, %v3580_v60  ;;  %v907_v27 = vsel %vm897_vm8, %v904_v48, %v906_v56 }
 0x206   : > { %v908_v10 = vsel %vm896_vm5, %v886_v51, %v889_v20  ;;  %2850 = vcosq.f32 %v744_v41  ;;  %v909_v37 = vsel %vm899_vm3, %v895_v28, 1326507024  ;;  %v2847_v16 = vpop.eup %2846  ;;  %vm648_vm4 = vcmp.eq.s32.totalorder %v3524_v40, 0 }
 0x207   : > { %vm3613_vm12 = vcmp.le.f32.partialorder %v4732_v22, 0.7853982  ;;  %v3625_v54 = vmul.u32.u64.low %v3578_v4, %v907_v27  ;;  %v3626_v47 = vmul.u32.u64.high %v3578_v4, %v907_v27, %v3625_v54  ;;  %v1576_v42 = vpop.permute.xlu1 %1575  ;;  %v1528_v8 = vpop.permute.xlu0 %1527  ;;  %2852 = vsinq.f32 %v744_v41 }
 0x208   : > { %v828_v13 = vclz %v2631_v9  ;;  %v846_v35 = vsub.s32 4, %v3563_v30  ;;  %v2849_v15 = vpop.eup %2848  ;;  %1578 = vst.msk [vmem:[#allocation2 + $0x1] sm:$0x1] %vm3231_vm13, %v1576_v42  ;;  %vm651_vm7 = vcmp.eq.s32.totalorder %v3524_v40, 2  ;;  %v652_v51 = vxor.u32 2147483648, %v2847_v16 }
 0x209   : > { %1530 = vst.msk [vmem:[#allocation2] sm:$0x1] %vm3248_vm1, %v1528_v8  ;;  %v3640_v57 = vand.u32 3, %v749_v62  ;;  %v910_v2 = vsel %vm898_vm15, %v892_v61, %v909_v37  ;;  %v649_v20 = vxor.u32 2147483648, %v2849_v15  ;;  %v903_v28 = vsel %vm897_vm8, %v900_v58, %v902_v1 }
 0x20a   : > { %1597 = vst.msk [vmem:[#allocation2 + $0x1] sm:$0x1] %vm3239_vm14, %v1595_v18  ;;  %v2632_v44 = vadd.s32 4294967294, %v828_v13  ;;  %v911_v36 = vsel %vm897_vm8, %v908_v10, %v910_v2  ;;  %v653_v14 = vsel %vm651_vm7, %v652_v51, %v2849_v15  ;;  %v968_v62 = vand.u32 2147483647, %v3330_v12 }
 0x20b   : > { %v3651_v48 = vmul.u32.u64.low %v3578_v4, %v911_v36  ;;  %v3652_v55 = vmul.u32.u64.high %v3578_v4, %v911_v36, %v3651_v48  ;;  %v1607_v3 = vpop.permute.xlu1 %1606  ;;  %v1533_v61 = vpop.permute.xlu0 %1532  ;;  %v650_v46 = vsel %vm648_vm4, %v2847_v16, %v649_v20  ;;  %v847_v18 = vsel %vm762_vm2, %v846_v35, %v3563_v30 }
 0x20c   : > { %vm2633_vm13 = vcmp.lt.s32.totalorder %v2632_v44, 0  ;;  %v922_v23 = vadd.s32 1, %v3626_v47  ;;  %1609 = vst.msk [vmem:[#allocation2 + $0x1] sm:$0x1] %vm3248_vm1, %v1607_v3  ;;  %v654_v49 = vsel %vm647_vm11, %v650_v46, %v653_v14  ;;  %v919_v58 = vmul.u32 %v3578_v4, %v903_v28 }
 0x20d   : > { %1535 = vst.msk [vmem:[#allocation2] sm:$0x1] %vm3263_vm6, %v1533_v61  ;;  %v831_v17 = vsel %vm2633_vm13, 0, %v2632_v44  ;;  %v971_v1 = vand.u32 2139095040, %v3330_v12  ;;  %v655_v30 = vsel %vm644_vm0, nan, %v654_v49  ;;  %vm748_vm14 = vweird.f32 %v3324_v31 }
 0x20e   : > { %v816_v52 = vadd.s32 %v3517_v29, %v3514_v25  ;;  %v832_v56 = vsub.s32 32, %v831_v17  ;;  %v836_v41 = vsub.s32 4294967266, %v831_v17  ;;  %v849_v22 = vsel %vm3613_vm12, 0, %v847_v18  ;;  %1384 = vst [vmem:[%s3681_s7] sm:$0xff] %v655_v30 }
 0x20f   : > { %vm921_vm1 = vc.u32 %v3652_v55, %v3625_v54  ;;  %v972_v40 = vshrl.u32 %v971_v1, 23  ;;  %v975_v4 = vand.u32 8388607, %v968_v62  ;;  %v1612_v21 = vpop.permute.xlu1 %1611  ;;  %v1538_v9 = vpop.permute.xlu0 %1537  ;;  %v833_v25 = vshll.u32 %v3580_v60, %v831_v17 }
 0x210   : > { %v834_v29 = vshrl.u32 %v816_v52, %v832_v56  ;;  %v837_v27 = vadd.s32 127, %v836_v41  ;;  %v923_v10 = vsel %vm921_vm1, %v922_v23, %v3626_v47  ;;  %v2851_v37 = vpop.eup %2850  ;;  %1614 = vst.msk [vmem:[#allocation2 + $0x1] sm:$0x1] %vm3263_vm6, %v1612_v21  ;;  %vm751_vm9 = vcmp.lt.s32.totalorder %v3640_v57, 2 }
 0x211   : > { %1540 = vst.msk [vmem:[#allocation2] sm:$0x1] %vm3274_vm10, %v1538_v9  ;;  %vm752_vm5 = vcmp.eq.s32.totalorder %v3640_v57, 0  ;;  %v924_v16 = vadd.s32 %v923_v10, %v919_v58  ;;  %v2638_v42 = vadd.s32 4294967169, %v972_v40  ;;  %v2853_v8 = vpop.eup %2852  ;;  %vm755_vm15 = vcmp.eq.s32.totalorder %v3640_v57, 2 }
 0x212   : > { %v756_v60 = vxor.u32 2147483648, %v2851_v37  ;;  %v835_v13 = vor.u32 %v834_v29, %v833_v25  ;;  %v838_v35 = vshll.u32 %v837_v27, 23  ;;  %v753_v47 = vxor.u32 2147483648, %v2853_v8 }
 0x213   : > { %v853_v15 = vadd.s32 3, %v849_v22  ;;  %v925_v51 = vadd.s32 536870912, %v924_v16  ;;  %v978_v59 = vadd.s32 1, %v2638_v42  ;;  %v1617_v2 = vpop.permute.xlu1 %1616  ;;  %v976_v28 = vor.u32 8388608, %v975_v4 }
 0x214   : > { %v757_v20 = vsel %vm755_vm15, %v756_v60, %v2853_v8  ;;  %v839_v44 = vor.u32 4788187, %v838_v35  ;;  %v1075_v36 = vand.u32 2139095040, %v3333_v33  ;;  %1619 = vst.msk [vmem:[#allocation2 + $0x1] sm:$0x1] %vm3274_vm10, %v1617_v2  ;;  %v754_v14 = vsel %vm752_vm5, %v2851_v37, %v753_v47 }
 0x215   : > { %v926_v48 = vshrl.u32 %v925_v51, 30  ;;  %vm979_vm6 = vcmp.gt.s32.totalorder %v978_v59, 0  ;;  %v1072_v3 = vand.u32 2147483647, %v3333_v33  ;;  %v758_v61 = vsel %vm751_vm9, %v754_v14, %v757_v20 }
 0x216   : > { %v840_v46 = vand.u32 2147483647, %v839_v44  ;;  %v842_v18 = vcvt.s32.f32 %v835_v13  ;;  %v980_v23 = vsel %vm979_vm6, %v978_v59, 0  ;;  %v759_v49 = vsel %vm748_vm14, nan, %v758_v61 }
 0x217   : > { %v927_v17 = vshll.u32 %v926_v48, 30  ;;  %v1076_v0 = vshrl.u32 %v1075_v36, 23  ;;  %v3703_v1 = vand.u32 3, %v853_v15  ;;  %vm866_vm10 = vcmp.lt.s32.totalorder %v3351_v63, 0  ;;  %1385 = vst [vmem:[%s3681_s7 + $0x8] sm:$0xff] %v759_v49 }
 0x218   : > { %v843_v58 = vmul.f32 %v842_v18, %v840_v46  ;;  %v982_v30 = vand.u32 31, %v980_v23  ;;  %v4735_v52 = vand.u32 2147483647, %v3351_v63  ;;  %v920_v56 = vadd.s32 %v3625_v54, %v3652_v55 }
 0x219   : > { %v3715_v31 = vsub.s32 %v924_v16, %v927_v17  ;;  %v3717_v41 = vshll.u32 %v976_v28, 8  ;;  %v3721_v22 = vand.u32 8388607, %v1072_v3  ;;  %v950_v4 = vsub.s32 4, %v926_v48 }
 0x21a   : > { %vm3709_vm3 = vcmp.le.f32.partialorder %v4735_v52, 0.7853982  ;;  %v844_v40 = vxor.u32 2147483648, %v843_v58  ;;  %v981_v21 = vshrl.u32 %v980_v23, 5  ;;  %v983_v9 = vsub.s32 32, %v982_v30 }
 0x21b   : > { %v930_v25 = vsub.s32 0, %v3715_v31  ;;  %v985_v29 = vshll.u32 %v2986_v19, %v982_v30  ;;  %v988_v27 = vshll.u32 %v2987_v11, %v982_v30  ;;  %v2642_v10 = vadd.s32 4294967169, %v1076_v0 }
 0x21c   : > { %v845_v54 = vsel %vm762_vm2, %v844_v40, %v843_v58  ;;  %v986_v55 = vshrl.u32 %v2987_v11, %v983_v9  ;;  %v989_v37 = vshrl.u32 %v2988_v53, %v983_v9  ;;  %v991_v16 = vshll.u32 %v2988_v53, %v982_v30 }
 0x21d   : > { %v848_v42 = vsel %vm3613_vm12, %v3327_v32, %v845_v54  ;;  %v2635_v8 = vmin.u32 %v930_v25, %v3715_v31  ;;  %v992_v60 = vshrl.u32 %v2989_v26, %v983_v9  ;;  %v1080_v13 = vor.u32 8388608, %v3721_v22 }
 0x21e   : > { %2854 = vcosq.f32 %v848_v42  ;;  %v951_v35 = vsel %vm866_vm10, %v950_v4, %v926_v48  ;;  %v984_v47 = vshrl.u32 %v2986_v19, %v983_v9  ;;  %v994_v15 = vshll.u32 %v2989_v26, %v982_v30 }
 0x21f   : > { %2856 = vsinq.f32 %v848_v42  ;;  %v932_v51 = vclz %v2635_v8  ;;  %v987_v59 = vor.u32 %v986_v55, %v985_v29  ;;  %v990_v2 = vor.u32 %v989_v37, %v988_v27 }
 0x220   : > { %v993_v38 = vor.u32 %v992_v60, %v991_v16  ;;  %v995_v20 = vshrl.u32 %v4730_v43, %v983_v9  ;;  %v997_v44 = vshll.u32 %v4730_v43, %v982_v30  ;;  %vm1000_vm2 = vcmp.lt.s32.totalorder %v981_v21, 1 }
 0x221   : > { %v2636_v28 = vadd.s32 4294967294, %v932_v51  ;;  %v998_v36 = vshrl.u32 %v4731_v50, %v983_v9  ;;  %vm1001_vm8 = vcmp.lt.s32.totalorder %v981_v21, 2  ;;  %vm1003_vm11 = vcmp.lt.s32.totalorder %v981_v21, 4 }
 0x222   : > { %vm859_vm0 = vcmp.eq.s32.totalorder %v3703_v1, 2  ;;  %v953_v14 = vsel %vm3709_vm3, 0, %v951_v35  ;;  %v996_v48 = vor.u32 %v995_v20, %v994_v15  ;;  %vm1002_vm12 = vcmp.lt.s32.totalorder %v981_v21, 3 }
 0x223   : > { %v1005_v61 = vsel %vm1003_vm11, %v993_v38, 2102212464  ;;  %vm856_vm4 = vcmp.eq.s32.totalorder %v3703_v1, 0  ;;  %vm2637_vm7 = vcmp.lt.s32.totalorder %v2636_v28, 0  ;;  %v999_v46 = vor.u32 %v998_v36, %v997_v44 }
 0x224   : > { %v1004_v18 = vsel %vm1000_vm2, %v984_v47, %v987_v59  ;;  %v1008_v23 = vsel %vm1000_vm2, %v987_v59, %v990_v2  ;;  %vm855_vm13 = vcmp.lt.s32.totalorder %v3703_v1, 2  ;;  %v935_v49 = vsel %vm2637_vm7, 0, %v2636_v28 }
 0x225   : > { %v1006_v17 = vsel %vm1002_vm12, %v990_v2, %v1005_v61  ;;  %v1009_v0 = vsel %vm1003_vm11, %v996_v48, 920167782  ;;  %v1082_v58 = vadd.s32 1, %v2642_v10  ;;  %vm852_vm14 = vweird.f32 %v3327_v32 }
 0x226   : > { %v936_v30 = vsub.s32 32, %v935_v49  ;;  %v940_v52 = vsub.s32 4294967266, %v935_v49  ;;  %v1010_v40 = vsel %vm1002_vm12, %v993_v38, %v1009_v0  ;;  %v1012_v4 = vsel %vm1000_vm2, %v990_v2, %v993_v38 }
 0x227   : > { %v937_v9 = vshll.u32 %v3715_v31, %v935_v49  ;;  %v1011_v25 = vsel %vm1001_vm8, %v1008_v23, %v1010_v40  ;;  %v1013_v29 = vsel %vm1003_vm11, %v999_v46, 1326507024  ;;  %vm1083_vm1 = vcmp.gt.s32.totalorder %v1082_v58, 0 }
 0x228   : > { %v938_v27 = vshrl.u32 %v920_v56, %v936_v30  ;;  %v941_v54 = vadd.s32 127, %v940_v52  ;;  %v1014_v55 = vsel %vm1002_vm12, %v996_v48, %v1013_v29  ;;  %v1084_v10 = vsel %vm1083_vm1, %v1082_v58, 0  ;;  %v2855_v37 = vpop.eup %2854 }
 0x229   : > { %v1007_v16 = vsel %vm1001_vm8, %v1004_v18, %v1006_v17  ;;  %v1015_v42 = vsel %vm1001_vm8, %v1012_v4, %v1014_v55  ;;  %v3764_v8 = vmul.u32.u64.low %v3717_v41, %v1011_v25  ;;  %v3765_v60 = vmul.u32.u64.high %v3717_v41, %v1011_v25, %v3764_v8  ;;  %v2857_v31 = vpop.eup %2856 }
 0x22a   : > { %v860_v35 = vxor.u32 2147483648, %v2855_v37  ;;  %v939_v47 = vor.u32 %v938_v27, %v937_v9  ;;  %v942_v15 = vshll.u32 %v941_v54, 23  ;;  %v1086_v51 = vand.u32 31, %v1084_v10 }
 0x22b   : > { %v857_v56 = vxor.u32 2147483648, %v2857_v31  ;;  %v957_v59 = vadd.s32 3, %v953_v14  ;;  %v3769_v2 = vmul.u32.u64.low %v3717_v41, %v1015_v42  ;;  %v3770_v38 = vmul.u32.u64.high %v3717_v41, %v1015_v42, %v3769_v2 }
 0x22c   : > { %v861_v21 = vsel %vm859_vm0, %v860_v35, %v2857_v31  ;;  %v943_v20 = vor.u32 4788187, %v942_v15  ;;  %v1023_v44 = vmul.u32 %v3717_v41, %v1007_v16  ;;  %v1087_v28 = vsub.s32 32, %v1086_v51 }
 0x22d   : > { %v858_v36 = vsel %vm856_vm4, %v2855_v37, %v857_v56  ;;  %v1026_v48 = vadd.s32 1, %v3765_v60  ;;  %v1089_v61 = vshll.u32 %v2986_v19, %v1086_v51  ;;  %v1092_v14 = vshll.u32 %v2987_v11, %v1086_v51 }
 0x22e   : > { %v862_v46 = vsel %vm855_vm13, %v858_v36, %v861_v21  ;;  %v944_v18 = vand.u32 2147483647, %v943_v20  ;;  %v946_v23 = vcvt.s32.f32 %v939_v47  ;;  %v1090_v49 = vshrl.u32 %v2987_v11, %v1087_v28 }
 0x22f   : > { %v863_v41 = vsel %vm852_vm14, nan, %v862_v46  ;;  %vm1025_vm9 = vc.u32 %v3770_v38, %v3764_v8  ;;  %v1085_v17 = vshrl.u32 %v1084_v10, 5  ;;  %v1093_v0 = vshrl.u32 %v2988_v53, %v1087_v28 }
 0x230   : > { %v947_v58 = vmul.f32 %v946_v23, %v944_v18  ;;  %v1027_v30 = vsel %vm1025_vm9, %v1026_v48, %v3765_v60  ;;  %v1091_v52 = vor.u32 %v1090_v49, %v1089_v61  ;;  %v1095_v1 = vshll.u32 %v2988_v53, %v1086_v51  ;;  %1386 = vst [vmem:[%s3681_s7 + $0x10] sm:$0xff] %v863_v41 }
 0x231   : > { %v1028_v40 = vadd.s32 %v1027_v30, %v1023_v44  ;;  %v1094_v4 = vor.u32 %v1093_v0, %v1092_v14  ;;  %v1096_v9 = vshrl.u32 %v2989_v26, %v1087_v28  ;;  %v1098_v32 = vshll.u32 %v2989_v26, %v1086_v51 }
 0x232   : > { %v948_v25 = vxor.u32 2147483648, %v947_v58  ;;  %v1099_v29 = vshrl.u32 %v4730_v43, %v1087_v28  ;;  %v1101_v27 = vshll.u32 %v4730_v43, %v1086_v51  ;;  %v1102_v54 = vshrl.u32 %v4731_v50, %v1087_v28 }
 0x233   : > { %v1029_v55 = vadd.s32 536870912, %v1028_v40  ;;  %v1088_v10 = vshrl.u32 %v2986_v19, %v1087_v28  ;;  %v1097_v37 = vor.u32 %v1096_v9, %v1095_v1  ;;  %vm1104_vm5 = vcmp.lt.s32.totalorder %v1085_v17, 1 }
 0x234   : > { %v949_v16 = vsel %vm866_vm10, %v948_v25, %v947_v58  ;;  %v1100_v42 = vor.u32 %v1099_v29, %v1098_v32  ;;  %v1103_v60 = vor.u32 %v1102_v54, %v1101_v27  ;;  %vm1107_vm15 = vcmp.lt.s32.totalorder %v1085_v17, 4 }
 0x235   : > { %v952_v31 = vsel %vm3709_vm3, %v3351_v63, %v949_v16  ;;  %v1030_v35 = vshrl.u32 %v1029_v55, 30  ;;  %vm1106_vm6 = vcmp.lt.s32.totalorder %v1085_v17, 3  ;;  %v1109_v47 = vsel %vm1107_vm15, %v1097_v37, 2102212464 }
 0x236   : > { %2858 = vcosq.f32 %v952_v31  ;;  %vm1105_vm2 = vcmp.lt.s32.totalorder %v1085_v17, 2  ;;  %v1112_v15 = vsel %vm1104_vm5, %v1091_v52, %v1094_v4  ;;  %v1113_v51 = vsel %vm1107_vm15, %v1100_v42, 920167782 }
 0x237   : > { %2860 = vsinq.f32 %v952_v31  ;;  %v1031_v56 = vshll.u32 %v1030_v35, 30  ;;  %v1108_v2 = vsel %vm1104_vm5, %v1088_v10, %v1091_v52  ;;  %v1110_v21 = vsel %vm1106_vm6, %v1094_v4, %v1109_v47 }
 0x238   : > { %v1114_v20 = vsel %vm1106_vm6, %v1097_v37, %v1113_v51  ;;  %v1116_v44 = vsel %vm1104_vm5, %v1094_v4, %v1097_v37  ;;  %v1117_v57 = vsel %vm1107_vm15, %v1103_v60, 1326507024  ;;  %v1120_v28 = vshll.u32 %v1080_v13, 8 }
 0x239   : > { %v3809_v36 = vsub.s32 %v1028_v40, %v1031_v56  ;;  %v1054_v48 = vsub.s32 4, %v1030_v35  ;;  %v1115_v61 = vsel %vm1105_vm2, %v1112_v15, %v1114_v20  ;;  %v1118_v14 = vsel %vm1106_vm6, %v1100_v42, %v1117_v57 }
 0x23a   : > { %v958_v46 = vand.u32 3, %v957_v59  ;;  %v1119_v18 = vsel %vm1105_vm2, %v1116_v44, %v1118_v14  ;;  %v3814_v23 = vmul.u32.u64.low %v1120_v28, %v1115_v61  ;;  %v3815_v49 = vmul.u32.u64.high %v1120_v28, %v1115_v61, %v3814_v23 }
 0x23b   : > { %v1034_v41 = vsub.s32 0, %v3809_v36  ;;  %v1111_v0 = vsel %vm1105_vm2, %v1108_v2, %v1110_v21  ;;  %v3819_v58 = vmul.u32.u64.low %v1120_v28, %v1119_v18  ;;  %v3820_v22 = vmul.u32.u64.high %v1120_v28, %v1119_v18, %v3819_v58 }
 0x23c   : > { %vm970_vm10 = vcmp.lt.s32.totalorder %v3330_v12, 0  ;;  %v1176_v59 = vand.u32 2147483647, %v3335_v5  ;;  %v1179_v52 = vand.u32 2139095040, %v3335_v5  ;;  %v1127_v1 = vmul.u32 %v1120_v28, %v1111_v0 }
 0x23d   : > { %v2639_v13 = vmin.u32 %v1034_v41, %v3809_v36  ;;  %v1055_v30 = vsel %vm970_vm10, %v1054_v48, %v1030_v35  ;;  %v1130_v40 = vadd.s32 1, %v3815_v49  ;;  %vm956_vm3 = vweird.f32 %v3351_v63 }
 0x23e   : > { %vm959_vm8 = vcmp.lt.s32.totalorder %v958_v46, 2  ;;  %vm3832_vm11 = vcmp.le.f32.partialorder %v968_v62, 0.7853982  ;;  %vm960_vm0 = vcmp.eq.s32.totalorder %v958_v46, 0  ;;  %vm1129_vm12 = vc.u32 %v3820_v22, %v3814_v23 }
 0x23f   : > { %v1036_v4 = vclz %v2639_v13  ;;  %v1057_v32 = vsel %vm3832_vm11, 0, %v1055_v30  ;;  %v1180_v25 = vshrl.u32 %v1179_v52, 23  ;;  %v1131_v55 = vsel %vm1129_vm12, %v1130_v40, %v3815_v49 }
 0x240   : > { %v2859_v9 = vpop.eup %2858  ;;  %v1183_v62 = vand.u32 8388607, %v1176_v59  ;;  %vm963_vm4 = vcmp.eq.s32.totalorder %v958_v46, 2  ;;  %v1132_v37 = vadd.s32 %v1131_v55, %v1127_v1  ;;  %v1024_v60 = vadd.s32 %v3764_v8, %v3770_v38 }
 0x241   : > { %v2861_v29 = vpop.eup %2860  ;;  %v964_v27 = vxor.u32 2147483648, %v2859_v9  ;;  %v2640_v54 = vadd.s32 4294967294, %v1036_v4  ;;  %v2646_v16 = vadd.s32 4294967169, %v1180_v25  ;;  %v1061_v31 = vadd.s32 3, %v1057_v32 }
 0x242   : > { %v961_v10 = vxor.u32 2147483648, %v2861_v29  ;;  %v1133_v15 = vadd.s32 536870912, %v1132_v37  ;;  %v1184_v20 = vor.u32 8388608, %v1183_v62  ;;  %v1283_v8 = vand.u32 2139095040, %v3337_v34 }
 0x243   : > { %v965_v42 = vsel %vm963_vm4, %v964_v27, %v2861_v29  ;;  %vm2641_vm7 = vcmp.lt.s32.totalorder %v2640_v54, 0  ;;  %v1186_v51 = vadd.s32 1, %v2646_v16  ;;  %vm1074_vm14 = vcmp.lt.s32.totalorder %v3333_v33, 0 }
 0x244   : > { %v962_v35 = vsel %vm960_vm0, %v2859_v9, %v961_v10  ;;  %v1039_v47 = vsel %vm2641_vm7, 0, %v2640_v54  ;;  %v1134_v57 = vshrl.u32 %v1133_v15, 30  ;;  %v3852_v0 = vand.u32 3, %v1061_v31 }
 0x245   : > { %v966_v56 = vsel %vm959_vm8, %v962_v35, %v965_v42  ;;  %v1040_v2 = vsub.s32 32, %v1039_v47  ;;  %v1044_v21 = vsub.s32 4294967266, %v1039_v47  ;;  %vm1187_vm13 = vcmp.gt.s32.totalorder %v1186_v51, 0 }
 0x246   : > { %v967_v44 = vsel %vm956_vm3, nan, %v966_v56  ;;  %v1041_v38 = vshll.u32 %v3809_v36, %v1039_v47  ;;  %v1188_v61 = vsel %vm1187_vm13, %v1186_v51, 0  ;;  %v1135_v14 = vshll.u32 %v1134_v57, 30 }
 0x247   : > { %v1042_v28 = vshrl.u32 %v1024_v60, %v1040_v2  ;;  %v1045_v48 = vadd.s32 127, %v1044_v21  ;;  %1387 = vst [vmem:[%s3681_s7 + $0x18] sm:$0xff] %v967_v44  ;;  %v1158_v46 = vsub.s32 4, %v1134_v57  ;;  %v1190_v18 = vand.u32 31, %v1188_v61 }
 0x248   : > { %vm3856_vm1 = vcmp.le.f32.partialorder %v1072_v3, 0.7853982  ;;  %v1128_v36 = vadd.s32 %v3814_v23, %v3820_v22  ;;  %v3861_v58 = vsub.s32 %v1132_v37, %v1135_v14  ;;  %v1280_v30 = vand.u32 2147483647, %v3337_v34 }
 0x249   : > { %v1043_v49 = vor.u32 %v1042_v28, %v1041_v38  ;;  %v1046_v41 = vshll.u32 %v1045_v48, 23  ;;  %v1191_v13 = vsub.s32 32, %v1190_v18  ;;  %v3866_v1 = vsel %vm1074_vm14, %v1158_v46, %v1134_v57 }
 0x24a   : > { %v3868_v40 = vshll.u32 %v1184_v20, 8  ;;  %v1284_v4 = vshrl.u32 %v1283_v8, 23  ;;  %v1138_v3 = vsub.s32 0, %v3861_v58  ;;  %v1193_v9 = vshll.u32 %v2986_v19, %v1190_v18 }
 0x24b   : > { %v1047_v52 = vor.u32 4788187, %v1046_v41  ;;  %v1194_v32 = vshrl.u32 %v2987_v11, %v1191_v13  ;;  %v1196_v23 = vshll.u32 %v2987_v11, %v1190_v18  ;;  %v1050_v25 = vcvt.s32.f32 %v1043_v49 }
 0x24c   : > { %v1189_v29 = vshrl.u32 %v1188_v61, 5  ;;  %v1197_v27 = vshrl.u32 %v2988_v53, %v1191_v13  ;;  %v2643_v54 = vmin.u32 %v1138_v3, %v3861_v58  ;;  %v1199_v55 = vshll.u32 %v2988_v53, %v1190_v18 }
 0x24d   : > { %v1048_v22 = vand.u32 2147483647, %v1047_v52  ;;  %v1200_v62 = vshrl.u32 %v2989_v26, %v1191_v13  ;;  %v1202_v10 = vshll.u32 %v2989_v26, %v1190_v18  ;;  %v1161_v16 = vsel %vm3856_vm1, 0, %v3866_v1 }
 0x24e   : > { %v1203_v42 = vshrl.u32 %v4730_v43, %v1191_v13  ;;  %v2650_v60 = vadd.s32 4294967169, %v1284_v4  ;;  %v1140_v31 = vclz %v2643_v54  ;;  %v1192_v35 = vshrl.u32 %v2986_v19, %v1191_v13 }
 0x24f   : > { %v1051_v37 = vmul.f32 %v1050_v25, %v1048_v22  ;;  %v1195_v47 = vor.u32 %v1194_v32, %v1193_v9  ;;  %v1198_v15 = vor.u32 %v1197_v27, %v1196_v23  ;;  %v1205_v2 = vshll.u32 %v4730_v43, %v1190_v18 }
 0x250   : > { %v1204_v56 = vor.u32 %v1203_v42, %v1202_v10  ;;  %v1206_v21 = vshrl.u32 %v4731_v50, %v1191_v13  ;;  %v2644_v20 = vadd.s32 4294967294, %v1140_v31  ;;  %v1201_v44 = vor.u32 %v1200_v62, %v1199_v55 }
 0x251   : > { %v1052_v51 = vxor.u32 2147483648, %v1051_v37  ;;  %vm1208_vm9 = vcmp.lt.s32.totalorder %v1189_v29, 1  ;;  %vm1209_vm5 = vcmp.lt.s32.totalorder %v1189_v29, 2  ;;  %vm1210_vm15 = vcmp.lt.s32.totalorder %v1189_v29, 3 }
 0x252   : > { %v1207_v8 = vor.u32 %v1206_v21, %v1205_v2  ;;  %vm1211_vm6 = vcmp.lt.s32.totalorder %v1189_v29, 4  ;;  %vm2645_vm2 = vcmp.lt.s32.totalorder %v2644_v20, 0  ;;  %v1212_v28 = vsel %vm1208_vm9, %v1192_v35, %v1195_v47 }
 0x253   : > { %v1053_v57 = vsel %vm970_vm10, %v1052_v51, %v1051_v37  ;;  %v1213_v48 = vsel %vm1211_vm6, %v1201_v44, 2102212464  ;;  %v1143_v61 = vsel %vm2645_vm2, 0, %v2644_v20  ;;  %v1216_v14 = vsel %vm1208_vm9, %v1195_v47, %v1198_v15 }
 0x254   : > { %v1056_v38 = vsel %vm3832_vm11, %v3330_v12, %v1053_v57  ;;  %v1217_v46 = vsel %vm1211_vm6, %v1204_v56, 920167782  ;;  %v1144_v18 = vsub.s32 32, %v1143_v61  ;;  %v1148_v49 = vsub.s32 4294967266, %v1143_v61 }
 0x255   : > { %2862 = vcosq.f32 %v1056_v38  ;;  %v1214_v41 = vsel %vm1210_vm15, %v1198_v15, %v1213_v48  ;;  %v1145_v13 = vshll.u32 %v3861_v58, %v1143_v61  ;;  %v1218_v17 = vsel %vm1210_vm15, %v1201_v44, %v1217_v46 }
 0x256   : > { %2864 = vsinq.f32 %v1056_v38  ;;  %v1220_v52 = vsel %vm1208_vm9, %v1198_v15, %v1201_v44  ;;  %v1221_v1 = vsel %vm1211_vm6, %v1207_v8, 1326507024  ;;  %v1146_v4 = vshrl.u32 %v1128_v36, %v1144_v18  ;;  %v1620_v18 = vld [vmem:[#allocation2] sm:$0x3] }
 0x257   : > { %v1149_v3 = vadd.s32 127, %v1148_v49  ;;  %v1219_v9 = vsel %vm1209_vm5, %v1216_v14, %v1218_v17  ;;  %v1222_v32 = vsel %vm1210_vm15, %v1204_v56, %v1221_v1  ;;  %v1215_v23 = vsel %vm1209_vm5, %v1212_v28, %v1214_v41 }
 0x258   : > { %v1223_v22 = vsel %vm1209_vm5, %v1220_v52, %v1222_v32  ;;  %v3905_v25 = vmul.u32.u64.low %v3868_v40, %v1219_v9  ;;  %v3906_v27 = vmul.u32.u64.high %v3868_v40, %v1219_v9, %v3905_v25  ;;  %v1147_v58 = vor.u32 %v1146_v4, %v1145_v13 }
 0x259   : > { %v1150_v54 = vshll.u32 %v1149_v3, 23  ;;  %v3910_v55 = vmul.u32.u64.low %v3868_v40, %v1223_v22  ;;  %v3911_v62 = vmul.u32.u64.high %v3868_v40, %v1223_v22, %v3910_v55  ;;  %v1287_v36 = vand.u32 8388607, %v1280_v30 }
 0x25a   : > { %v1290_v10 = vadd.s32 1, %v2650_v60  ;;  %vm1060_vm10 = vweird.f32 %v3330_v12  ;;  %v1165_v29 = vadd.s32 3, %v1161_v16  ;;  %v1231_v42 = vmul.u32 %v3868_v40, %v1215_v23 }
 0x25b   : > { %v1151_v37 = vor.u32 4788187, %v1150_v54  ;;  %vm1063_vm3 = vcmp.lt.s32.totalorder %v3852_v0, 2  ;;  %vm1064_vm8 = vcmp.eq.s32.totalorder %v3852_v0, 0  ;;  %v1234_v31 = vadd.s32 1, %v3906_v27 }
 0x25c   : > { %vm1291_vm11 = vcmp.gt.s32.totalorder %v1290_v10, 0  ;;  %v1154_v47 = vcvt.s32.f32 %v1147_v58  ;;  %vm1233_vm0 = vc.u32 %v3911_v62, %v3905_v25  ;;  %vm1067_vm12 = vcmp.eq.s32.totalorder %v3852_v0, 2 }
 0x25d   : > { %v1152_v35 = vand.u32 2147483647, %v1151_v37  ;;  %v1292_v15 = vsel %vm1291_vm11, %v1290_v10, 0  ;;  %v1235_v16 = vsel %vm1233_vm0, %v1234_v31, %v3906_v27  ;;  %v1288_v51 = vor.u32 8388608, %v1287_v36 }
 0x25e   : > { %v1294_v40 = vand.u32 31, %v1292_v15  ;;  %v3924_v20 = vand.u32 3, %v1165_v29  ;;  %v1236_v44 = vadd.s32 %v1235_v16, %v1231_v42  ;;  %v3926_v8 = vshrl.u32 %v1292_v15, 5  ;;  %v1676_v15 = vpop.permute.xlu0 %1675 }
 0x25f   : > { %v2863_v60 = vpop.eup %2862  ;;  %v1155_v21 = vmul.f32 %v1154_v47, %v1152_v35  ;;  %v4742_v22 = vsub.s32 0, %v3111_v24  ;;  %vm1178_vm4 = vcmp.lt.s32.totalorder %v3335_v5, 0  ;;  %v1328_v42 = vshll.u32 %v1288_v51, 8 }
 0x260   : > { %v2865_v56 = vpop.eup %2864  ;;  %v1068_v2 = vxor.u32 2147483648, %v2863_v60  ;;  %v1295_v38 = vsub.s32 32, %v1294_v40  ;;  %v1297_v28 = vshll.u32 %v2986_v19, %v1294_v40  ;;  %v1237_v14 = vadd.s32 536870912, %v1236_v44 }
 0x261   : > { %v1065_v57 = vxor.u32 2147483648, %v2865_v56  ;;  %v1156_v61 = vxor.u32 2147483648, %v1155_v21  ;;  %v1300_v46 = vshll.u32 %v2987_v11, %v1294_v40  ;;  %v1303_v17 = vshll.u32 %v2988_v53, %v1294_v40 }
 0x262   : > { %v1069_v48 = vsel %vm1067_vm12, %v1068_v2, %v2865_v56  ;;  %v1298_v41 = vshrl.u32 %v2987_v11, %v1295_v38  ;;  %v1301_v13 = vshrl.u32 %v2988_v53, %v1295_v38  ;;  %v1238_v4 = vshrl.u32 %v1237_v14, 30 }
 0x263   : > { %v1066_v49 = vsel %vm1064_vm8, %v2863_v60, %v1065_v57  ;;  %v1157_v1 = vsel %vm1074_vm14, %v1156_v61, %v1155_v21  ;;  %v1304_v3 = vshrl.u32 %v2989_v26, %v1295_v38  ;;  %v1296_v23 = vshrl.u32 %v2986_v19, %v1295_v38 }
 0x264   : > { %v1070_v52 = vsel %vm1063_vm3, %v1066_v49, %v1069_v48  ;;  %v1160_v32 = vsel %vm3856_vm1, %v3333_v33, %v1157_v1  ;;  %v3948_v27 = vrot.slane %v1620_v18, %v4742_v22  ;;  %v1239_v0 = vshll.u32 %v1238_v4, 30 }
 0x265   : > { %v1071_v9 = vsel %vm1060_vm10, nan, %v1070_v52  ;;  %2866 = vcosq.f32 %v1160_v32  ;;  %v1299_v58 = vor.u32 %v1298_v41, %v1297_v28  ;;  %v1302_v54 = vor.u32 %v1301_v13, %v1300_v46 }
 0x266   : > { %1388 = vst [vmem:[%s3681_s7 + $0x20] sm:$0xff] %v1071_v9  ;;  %2868 = vsinq.f32 %v1160_v32  ;;  %v1306_v55 = vshll.u32 %v2989_v26, %v1294_v40  ;;  %v1307_v12 = vshrl.u32 %v4730_v43, %v1295_v38  ;;  %v1309_v36 = vshll.u32 %v4730_v43, %v1294_v40 }
 0x267   : > { %v3955_v63 = vsub.s32 %v1236_v44, %v1239_v0  ;;  %v1305_v10 = vor.u32 %v1304_v3, %v1303_v17  ;;  %v1310_v37 = vshrl.u32 %v4731_v50, %v1295_v38  ;;  %vm1312_vm7 = vcmp.lt.s32.totalorder %v3926_v8, 1 }
 0x268   : > { %v1308_v29 = vor.u32 %v1307_v12, %v1306_v55  ;;  %vm1314_vm13 = vcmp.lt.s32.totalorder %v3926_v8, 3  ;;  %v1658_v31 = vmul.f32 %v3221_v39, %v3948_v27  ;;  %vm1313_vm14 = vcmp.lt.s32.totalorder %v3926_v8, 2 }
 0x269   : > { %v1242_v35 = vsub.s32 0, %v3955_v63  ;;  %v1311_v47 = vor.u32 %v1310_v37, %v1309_v36  ;;  %vm1315_vm1 = vcmp.lt.s32.totalorder %v3926_v8, 4  ;;  %vm3967_vm9 = vcmp.le.f32.partialorder %v1176_v59, 0.7853982 }
 0x26a   : > { %v1317_v16 = vsel %vm1315_vm1, %v1305_v10, 2102212464  ;;  %v1320_v51 = vsel %vm1312_vm7, %v1299_v58, %v1302_v54  ;;  %v1321_v40 = vsel %vm1315_vm1, %v1308_v29, 920167782  ;;  %v4745_v56 = vsub.s32 1, %v3111_v24 }
 0x26b   : > { %vm1167_vm5 = vcmp.lt.s32.totalorder %v3924_v20, 2  ;;  %v2647_v59 = vmin.u32 %v1242_v35, %v3955_v63  ;;  %v1316_v21 = vsel %vm1312_vm7, %v1296_v23, %v1299_v58  ;;  %v1318_v44 = vsel %vm1314_vm13, %v1302_v54, %v1317_v16 }
 0x26c   : > { %v3979_v2 = vrot.slane %v1620_v18, %v4745_v56  ;;  %v1322_v57 = vsel %vm1314_vm13, %v1305_v10, %v1321_v40  ;;  %vm1164_vm15 = vweird.f32 %v3333_v33  ;;  %v1262_v38 = vsub.s32 4, %v1238_v4 }
 0x26d   : > { %v1323_v24 = vsel %vm1313_vm14, %v1320_v51, %v1322_v57  ;;  %v1324_v28 = vsel %vm1312_vm7, %v1302_v54, %v1305_v10  ;;  %v1325_v48 = vsel %vm1315_vm1, %v1311_v47, 1326507024  ;;  %vm1168_vm6 = vcmp.eq.s32.totalorder %v3924_v20, 0 }
 0x26e   : > { %vm1171_vm2 = vcmp.eq.s32.totalorder %v3924_v20, 2  ;;  %v1244_v61 = vclz %v2647_v59  ;;  %v3998_v14 = vadd.f32 %v1676_v15, %v1658_v31  ;;  %v1319_v46 = vsel %vm1313_vm14, %v1316_v21, %v1318_v44 }
 0x26f   : > { %v1326_v18 = vsel %vm1314_vm13, %v1308_v29, %v1325_v48  ;;  %v4004_v49 = vmul.u32.u64.low %v1328_v42, %v1323_v24  ;;  %v4005_v41 = vmul.u32.u64.high %v1328_v42, %v1323_v24, %v4004_v49  ;;  %v2867_v13 = vpop.eup %2866  ;;  %v1232_v17 = vadd.s32 %v3905_v25, %v3911_v62 }
 0x270   : > { %v2648_v52 = vadd.s32 4294967294, %v1244_v61  ;;  %v1327_v1 = vsel %vm1313_vm14, %v1324_v28, %v1326_v18  ;;  %v1659_v3 = vmul.f32 %v3221_v39, %v3979_v2  ;;  %v2869_v9 = vpop.eup %2868  ;;  %v1172_v32 = vxor.u32 2147483648, %v2867_v13 }
 0x271   : > { %v1263_v23 = vsel %vm1178_vm4, %v1262_v38, %v1238_v4  ;;  %v4015_v22 = vmul.u32.u64.low %v1328_v42, %v1327_v1  ;;  %v4016_v0 = vmul.u32.u64.high %v1328_v42, %v1327_v1, %v4015_v22  ;;  %v1169_v58 = vxor.u32 2147483648, %v2869_v9 }
 0x272   : > { %vm2649_vm10 = vcmp.lt.s32.totalorder %v2648_v52, 0  ;;  %v1335_v54 = vmul.u32 %v1328_v42, %v1319_v46  ;;  %v1907_v25 = vand.u32 2139095040, %v3998_v14  ;;  %v1173_v62 = vsel %vm1171_vm2, %v1172_v32, %v2869_v9 }
 0x273   : > { %v1247_v8 = vsel %vm2649_vm10, 0, %v2648_v52  ;;  %v1338_v39 = vadd.s32 1, %v4005_v41  ;;  %v1904_v55 = vand.u32 2147483647, %v3998_v14  ;;  %v1170_v4 = vsel %vm1168_vm6, %v2867_v13, %v1169_v58 }
 0x274   : > { %v1248_v12 = vsub.s32 32, %v1247_v8  ;;  %v1252_v36 = vsub.s32 4294967266, %v1247_v8  ;;  %v1265_v10 = vsel %vm3967_vm9, 0, %v1263_v23  ;;  %v1174_v37 = vsel %vm1167_vm5, %v1170_v4, %v1173_v62 }
 0x275   : > { %v1249_v29 = vshll.u32 %v3955_v63, %v1247_v8  ;;  %vm1337_vm3 = vc.u32 %v4016_v0, %v4004_v49  ;;  %v1908_v42 = vshrl.u32 %v1907_v25, 23  ;;  %v1175_v31 = vsel %vm1164_vm15, nan, %v1174_v37 }
 0x276   : > { %v1250_v35 = vshrl.u32 %v1232_v17, %v1248_v12  ;;  %v1253_v47 = vadd.s32 127, %v1252_v36  ;;  %v1339_v16 = vsel %vm1337_vm3, %v1338_v39, %v4005_v41  ;;  %1389 = vst [vmem:[%s3681_s7 + $0x28] sm:$0xff] %v1175_v31  ;;  %v4035_v40 = vadd.f32 %v1676_v15, %v1659_v3 }
 0x277   : > { %v1340_v51 = vadd.s32 %v1339_v16, %v1335_v54  ;;  %v2664_v56 = vadd.s32 4294967169, %v1908_v42  ;;  %v1911_v20 = vand.u32 8388607, %v1904_v55  ;;  %v1269_v38 = vadd.s32 3, %v1265_v10 }
 0x278   : > { %v1251_v59 = vor.u32 %v1250_v35, %v1249_v29  ;;  %v1254_v63 = vshll.u32 %v1253_v47, 23  ;;  %v2008_v28 = vand.u32 2147483647, %v4035_v40  ;;  %v2011_v46 = vand.u32 2139095040, %v4035_v40 }
 0x279   : > { %v1341_v21 = vadd.s32 536870912, %v1340_v51  ;;  %v1914_v44 = vadd.s32 1, %v2664_v56  ;;  %v1912_v24 = vor.u32 8388608, %v1911_v20  ;;  %v4046_v17 = vmul.f32 %v3171_v6, %v3948_v27 }
 0x27a   : > { %v1255_v57 = vor.u32 4788187, %v1254_v63  ;;  %v1258_v61 = vcvt.s32.f32 %v1251_v59  ;;  %v4048_v52 = vand.u32 3, %v1269_v38  ;;  %v1336_v1 = vadd.s32 %v4004_v49, %v4016_v0 }
 0x27b   : > { %v4039_v33 = vshrl.u32 %v1341_v21, 30  ;;  %vm1915_vm8 = vcmp.gt.s32.totalorder %v1914_v44, 0  ;;  %v4053_v23 = vshll.u32 %v1912_v24, 8  ;;  %v2012_v22 = vshrl.u32 %v2011_v46, 23 }
 0x27c   : > { %v1256_v48 = vand.u32 2147483647, %v1255_v57  ;;  %v1916_v15 = vsel %vm1915_vm8, %v1914_v44, 0  ;;  %v4057_v58 = vand.u32 8388607, %v2008_v28  ;;  %vm1282_vm11 = vcmp.lt.s32.totalorder %v3337_v34, 0 }
 0x27d   : > { %v1343_v18 = vshll.u32 %v4039_v33, 30  ;;  %v1918_v41 = vand.u32 31, %v1916_v15  ;;  %v1917_v25 = vshrl.u32 %v1916_v15, 5  ;;  %v1366_v47 = vsub.s32 4, %v4039_v33 }
 0x27e   : > { %v1259_v13 = vmul.f32 %v1258_v61, %v1256_v48  ;;  %v2668_v63 = vadd.s32 4294967169, %v2012_v22  ;;  %vm1271_vm14 = vcmp.lt.s32.totalorder %v4048_v52, 2  ;;  %vm1268_vm1 = vweird.f32 %v3335_v5 }
 0x27f   : > { %v4051_v3 = vsub.s32 %v1340_v51, %v1343_v18  ;;  %v1919_v9 = vsub.s32 32, %v1918_v41  ;;  %v1921_v62 = vshll.u32 %v2986_v19, %v1918_v41  ;;  %v1924_v0 = vshll.u32 %v2987_v11, %v1918_v41 }
 0x280   : > { %v1260_v32 = vxor.u32 2147483648, %v1259_v13  ;;  %v1927_v10 = vshll.u32 %v2988_v53, %v1918_v41  ;;  %v1930_v37 = vshll.u32 %v2989_v26, %v1918_v41  ;;  %v1933_v56 = vshll.u32 %v4730_v43, %v1918_v41 }
 0x281   : > { %v1346_v54 = vsub.s32 0, %v4051_v3  ;;  %v1922_v8 = vshrl.u32 %v2987_v11, %v1919_v9  ;;  %v1925_v39 = vshrl.u32 %v2988_v53, %v1919_v9  ;;  %v1928_v4 = vshrl.u32 %v2989_v26, %v1919_v9 }
 0x282   : > { %v1261_v49 = vsel %vm1178_vm4, %v1260_v32, %v1259_v13  ;;  %v1931_v31 = vshrl.u32 %v4730_v43, %v1919_v9  ;;  %v1920_v51 = vshrl.u32 %v2986_v19, %v1919_v9  ;;  %v1934_v20 = vshrl.u32 %v4731_v50, %v1919_v9 }
 0x283   : > { %v1264_v12 = vsel %vm3967_vm9, %v3335_v5, %v1261_v49  ;;  %v2651_v36 = vmin.u32 %v1346_v54, %v4051_v3  ;;  %v1923_v29 = vor.u32 %v1922_v8, %v1921_v62  ;;  %v1926_v42 = vor.u32 %v1925_v39, %v1924_v0 }
 0x284   : > { %2870 = vcosq.f32 %v1264_v12  ;;  %v1929_v16 = vor.u32 %v1928_v4, %v1927_v10  ;;  %v1932_v60 = vor.u32 %v1931_v31, %v1930_v37  ;;  %vm1936_vm0 = vcmp.lt.s32.totalorder %v1917_v25, 1 }
 0x285   : > { %2872 = vsinq.f32 %v1264_v12  ;;  %v1348_v35 = vclz %v2651_v36  ;;  %vm1938_vm12 = vcmp.lt.s32.totalorder %v1917_v25, 3  ;;  %vm4081_vm4 = vcmp.le.f32.partialorder %v1280_v30, 0.7853982 }
 0x286   : > { %v1935_v44 = vor.u32 %v1934_v20, %v1933_v56  ;;  %vm1939_vm7 = vcmp.lt.s32.totalorder %v1917_v25, 4  ;;  %v1940_v57 = vsel %vm1936_vm0, %v1920_v51, %v1923_v29  ;;  %v1944_v38 = vsel %vm1936_vm0, %v1923_v29, %v1926_v42  ;;  %v4108_v51 = vpop.permute.xlu1 %1670 }
 0x287   : > { %v2652_v59 = vadd.s32 4294967294, %v1348_v35  ;;  %v1941_v24 = vsel %vm1939_vm7, %v1929_v16, 2102212464  ;;  %v1945_v48 = vsel %vm1939_vm7, %v1932_v60, 920167782  ;;  %v1948_v61 = vsel %vm1936_vm0, %v1926_v42, %v1929_v16 }
 0x288   : > { %v1942_v46 = vsel %vm1938_vm12, %v1926_v42, %v1941_v24  ;;  %v1946_v18 = vsel %vm1938_vm12, %v1929_v16, %v1945_v48  ;;  %v1949_v41 = vsel %vm1939_vm7, %v1935_v44, 1326507024  ;;  %v1367_v9 = vsel %vm1282_vm11, %v1366_v47, %v4039_v33 }
 0x289   : > { %vm2653_vm13 = vcmp.lt.s32.totalorder %v2652_v59, 0  ;;  %vm1937_vm9 = vcmp.lt.s32.totalorder %v1917_v25, 2  ;;  %v1950_v54 = vsel %vm1938_vm12, %v1932_v60, %v1949_v41  ;;  %v2018_v62 = vadd.s32 1, %v2668_v63 }
 0x28a   : > { %v1351_v15 = vsel %vm2653_vm13, 0, %v2652_v59  ;;  %v1947_v22 = vsel %vm1937_vm9, %v1944_v38, %v1946_v18  ;;  %v1943_v0 = vsel %vm1937_vm9, %v1940_v57, %v1942_v46  ;;  %v1951_v39 = vsel %vm1937_vm9, %v1948_v61, %v1950_v54 }
 0x28b   : > { %v1352_v30 = vsub.s32 32, %v1351_v15  ;;  %v1356_v13 = vsub.s32 4294967266, %v1351_v15  ;;  %v1353_v32 = vshll.u32 %v4051_v3, %v1351_v15  ;;  %vm2019_vm5 = vcmp.gt.s32.totalorder %v2018_v62, 0 }
 0x28c   : > { %v4095_v12 = vmul.u32.u64.low %v4053_v23, %v1951_v39  ;;  %v4096_v36 = vmul.u32.u64.high %v4053_v23, %v1951_v39, %v4095_v12  ;;  %v4099_v10 = vmul.u32.u64.low %v4053_v23, %v1947_v22  ;;  %v4100_v37 = vmul.u32.u64.high %v4053_v23, %v1947_v22, %v4099_v10 }
 0x28d   : > { %v1354_v8 = vshrl.u32 %v1336_v1, %v1352_v30  ;;  %v1357_v49 = vadd.s32 127, %v1356_v13  ;;  %vm1275_vm15 = vcmp.eq.s32.totalorder %v4048_v52, 2  ;;  %v2016_v1 = vor.u32 8388608, %v4057_v58 }
 0x28e   : > { %v2871_v4 = vpop.eup %2870  ;;  %v2020_v31 = vsel %vm2019_vm5, %v2018_v62, 0  ;;  %vm1272_vm6 = vcmp.eq.s32.totalorder %v4048_v52, 0  ;;  %v1369_v16 = vsel %vm4081_vm4, 0, %v1367_v9  ;;  %v1959_v56 = vmul.u32 %v4053_v23, %v1943_v0 }
 0x28f   : > { %v2873_v33 = vpop.eup %2872  ;;  %v1276_v3 = vxor.u32 2147483648, %v2871_v4  ;;  %v1355_v29 = vor.u32 %v1354_v8, %v1353_v32  ;;  %v1358_v25 = vshll.u32 %v1357_v49, 23  ;;  %vm1961_vm2 = vc.u32 %v4096_v36, %v4099_v10 }
 0x290   : > { %v1273_v42 = vxor.u32 2147483648, %v2873_v33  ;;  %v1962_v20 = vadd.s32 1, %v4100_v37  ;;  %v2022_v44 = vand.u32 31, %v2020_v31  ;;  %v4119_v24 = vshll.u32 %v2016_v1, 8 }
 0x291   : > { %v1277_v35 = vsel %vm1275_vm15, %v1276_v3, %v2873_v33  ;;  %v1359_v47 = vor.u32 4788187, %v1358_v25  ;;  %v1362_v63 = vcvt.s32.f32 %v1355_v29  ;;  %v4123_v23 = vadd.f32 %v4108_v51, %v4046_v17 }
 0x292   : > { %v1274_v60 = vsel %vm1272_vm6, %v2871_v4, %v1273_v42  ;;  %v1963_v38 = vsel %vm1961_vm2, %v1962_v20, %v4100_v37  ;;  %v1373_v61 = vadd.s32 3, %v1369_v16  ;;  %v2023_v52 = vsub.s32 32, %v2022_v44 }
 0x293   : > { %v1278_v58 = vsel %vm1271_vm14, %v1274_v60, %v1277_v35  ;;  %v1360_v59 = vand.u32 2147483647, %v1359_v47  ;;  %v1964_v15 = vadd.s32 %v1963_v38, %v1959_v56  ;;  %v2021_v46 = vshrl.u32 %v2020_v31, 5 }
 0x294   : > { %v1279_v57 = vsel %vm1268_vm1, nan, %v1278_v58  ;;  %v2025_v18 = vshll.u32 %v2986_v19, %v2022_v44  ;;  %v2028_v41 = vshll.u32 %v2987_v11, %v2022_v44  ;;  %v2031_v5 = vshll.u32 %v2988_v53, %v2022_v44 }
 0x295   : > { %v1363_v48 = vmul.f32 %v1362_v63, %v1360_v59  ;;  %1390 = vst [vmem:[%s3681_s7 + $0x30] sm:$0xff] %v1279_v57  ;;  %v1965_v13 = vadd.s32 536870912, %v1964_v15  ;;  %v2026_v9 = vshrl.u32 %v2987_v11, %v2023_v52  ;;  %v2034_v32 = vshll.u32 %v2989_v26, %v2022_v44 }
 0x296   : > { %v2029_v17 = vshrl.u32 %v2988_v53, %v2023_v52  ;;  %v2032_v22 = vshrl.u32 %v2989_v26, %v2023_v52  ;;  %v2035_v54 = vshrl.u32 %v4730_v43, %v2023_v52  ;;  %v2038_v62 = vshrl.u32 %v4731_v50, %v2023_v52 }
 0x297   : > { %v1364_v30 = vxor.u32 2147483648, %v1363_v48  ;;  %v4137_v49 = vshrl.u32 %v1965_v13, 30  ;;  %v2027_v0 = vor.u32 %v2026_v9, %v2025_v18  ;;  %v2037_v39 = vshll.u32 %v4730_v43, %v2022_v44 }
 0x298   : > { %v2030_v12 = vor.u32 %v2029_v17, %v2028_v41  ;;  %v2033_v37 = vor.u32 %v2032_v22, %v2031_v5  ;;  %v2036_v33 = vor.u32 %v2035_v54, %v2034_v32  ;;  %vm2040_vm10 = vcmp.lt.s32.totalorder %v2021_v46, 1 }
 0x299   : > { %v1365_v8 = vsel %vm1282_vm11, %v1364_v30, %v1363_v48  ;;  %v1967_v3 = vshll.u32 %v4137_v49, 30  ;;  %v2039_v29 = vor.u32 %v2038_v62, %v2037_v39  ;;  %vm2042_vm3 = vcmp.lt.s32.totalorder %v2021_v46, 3 }
 0x29a   : > { %v1368_v4 = vsel %vm4081_vm4, %v3337_v34, %v1365_v8  ;;  %vm2043_vm8 = vcmp.lt.s32.totalorder %v2021_v46, 4  ;;  %v2048_v25 = vsel %vm2040_vm10, %v2027_v0, %v2030_v12  ;;  %v2024_v1 = vshrl.u32 %v2986_v19, %v2023_v52 }
 0x29b   : > { %2874 = vcosq.f32 %v1368_v4  ;;  %v4144_v42 = vsub.s32 %v1964_v15, %v1967_v3  ;;  %v2045_v31 = vsel %vm2043_vm8, %v2033_v37, 2102212464  ;;  %v2049_v35 = vsel %vm2043_vm8, %v2036_v33, 920167782 }
 0x29c   : > { %2876 = vsinq.f32 %v1368_v4  ;;  %v1374_v21 = vand.u32 3, %v1373_v61  ;;  %vm2041_vm11 = vcmp.lt.s32.totalorder %v2021_v46, 2  ;;  %v2050_v47 = vsel %vm2042_vm3, %v2033_v37, %v2049_v35 }
 0x29d   : > { %v2052_v16 = vsel %vm2040_vm10, %v2030_v12, %v2033_v37  ;;  %v1970_v60 = vsub.s32 0, %v4144_v42  ;;  %v2044_v56 = vsel %vm2040_vm10, %v2024_v1, %v2027_v0  ;;  %v2051_v20 = vsel %vm2041_vm11, %v2048_v25, %v2050_v47 }
 0x29e   : > { %v2053_v58 = vsel %vm2043_vm8, %v2039_v29, 1326507024  ;;  %v2046_v59 = vsel %vm2042_vm3, %v2030_v12, %v2045_v31  ;;  %v4153_v44 = vmul.u32.u64.low %v4119_v24, %v2051_v20  ;;  %v4154_v57 = vmul.u32.u64.high %v4119_v24, %v2051_v20, %v4153_v44 }
 0x29f   : > { %v2054_v63 = vsel %vm2042_vm3, %v2036_v33, %v2053_v58  ;;  %vm1906_vm0 = vcmp.lt.s32.totalorder %v3998_v14, 0  ;;  %v2665_v38 = vmin.u32 %v1970_v60, %v4144_v42  ;;  %vm1372_vm12 = vweird.f32 %v3337_v34 }
 0x2a0   : > { %v2055_v48 = vsel %vm2041_vm11, %v2052_v16, %v2054_v63  ;;  %v1657_v52 = vmul.f32 %v3171_v6, %v3979_v2  ;;  %v1699_v18 = vand.u32 2139095040, %v4123_v23  ;;  %vm1375_vm4 = vcmp.lt.s32.totalorder %v1374_v21, 2 }
 0x2a1   : > { %v4161_v61 = vmul.u32.u64.low %v4119_v24, %v2055_v48  ;;  %v4162_v15 = vmul.u32.u64.high %v4119_v24, %v2055_v48, %v4161_v61  ;;  %vm4169_vm7 = vcmp.le.f32.partialorder %v1904_v55, 0.7853982  ;;  %v1972_v5 = vclz %v2665_v38 }
 0x2a2   : > { %v2047_v30 = vsel %vm2041_vm11, %v2044_v56, %v2046_v59  ;;  %v1696_v13 = vand.u32 2147483647, %v4123_v23  ;;  %vm1376_vm13 = vcmp.eq.s32.totalorder %v1374_v21, 0  ;;  %vm1379_vm14 = vcmp.eq.s32.totalorder %v1374_v21, 2 }
 0x2a3   : > { %v2066_v9 = vadd.s32 1, %v4154_v57  ;;  %v1700_v32 = vshrl.u32 %v1699_v18, 23  ;;  %v1960_v17 = vadd.s32 %v4099_v10, %v4096_v36  ;;  %v2666_v22 = vadd.s32 4294967294, %v1972_v5 }
 0x2a4   : > { %v1990_v55 = vsub.s32 4, %v4137_v49  ;;  %v4180_v54 = vadd.f32 %v4108_v51, %v1657_v52  ;;  %v2063_v8 = vmul.u32 %v4119_v24, %v2047_v30  ;;  %vm2065_vm1 = vc.u32 %v4162_v15, %v4153_v44 }
 0x2a5   : > { %v2875_v6 = vpop.eup %2874  ;;  %v2656_v0 = vadd.s32 4294967169, %v1700_v32  ;;  %vm2667_vm9 = vcmp.lt.s32.totalorder %v2666_v22, 0  ;;  %v2067_v4 = vsel %vm2065_vm1, %v2066_v9, %v4154_v57  ;;  %v1703_v36 = vand.u32 8388607, %v1696_v13 }
 0x2a6   : > { %v2877_v62 = vpop.eup %2876  ;;  %v1380_v46 = vxor.u32 2147483648, %v2875_v6  ;;  %v1975_v12 = vsel %vm2667_vm9, 0, %v2666_v22  ;;  %v2068_v51 = vadd.s32 %v2067_v4, %v2063_v8  ;;  %v1991_v29 = vsel %vm1906_vm0, %v1990_v55, %v4137_v49 }
 0x2a7   : > { %v1377_v39 = vxor.u32 2147483648, %v2877_v62  ;;  %v1706_v37 = vadd.s32 1, %v2656_v0  ;;  %v1976_v3 = vsub.s32 32, %v1975_v12  ;;  %v1980_v24 = vsub.s32 4294967266, %v1975_v12 }
 0x2a8   : > { %v1381_v10 = vsel %vm1379_vm14, %v1380_v46, %v2877_v62  ;;  %v1977_v1 = vshll.u32 %v4144_v42, %v1975_v12  ;;  %v2069_v31 = vadd.s32 536870912, %v2068_v51  ;;  %v1993_v56 = vsel %vm4169_vm7, 0, %v1991_v29 }
 0x2a9   : > { %v1378_v33 = vsel %vm1376_vm13, %v2875_v6, %v1377_v39  ;;  %vm1707_vm5 = vcmp.gt.s32.totalorder %v1706_v37, 0  ;;  %v1978_v47 = vshrl.u32 %v1960_v17, %v1976_v3  ;;  %v1981_v16 = vadd.s32 127, %v1980_v24 }
 0x2aa   : > { %v1382_v25 = vsel %vm1375_vm4, %v1378_v33, %v1381_v10  ;;  %v1708_v60 = vsel %vm1707_vm5, %v1706_v37, 0  ;;  %v2070_v20 = vshrl.u32 %v2069_v31, 30  ;;  %v1704_v58 = vor.u32 8388608, %v1703_v36 }
 0x2ab   : > { %v1383_v35 = vsel %vm1372_vm12, nan, %v1382_v25  ;;  %v1710_v59 = vand.u32 31, %v1708_v60  ;;  %v1979_v49 = vor.u32 %v1978_v47, %v1977_v1  ;;  %v1982_v21 = vshll.u32 %v1981_v16, 23 }
 0x2ac   : > { %1391 = vst [vmem:[%s3681_s7 + $0x38] sm:$0xff] %v1383_v35  ;;  %vm2010_vm15 = vcmp.lt.s32.totalorder %v4035_v40, 0  ;;  %v2071_v42 = vshll.u32 %v2070_v20, 30  ;;  %v4200_v38 = vadd.s32 3, %v1993_v56  ;;  %v2064_v34 = vadd.s32 %v4153_v44, %v4162_v15 }
 0x2ad   : > { %v1711_v63 = vsub.s32 32, %v1710_v59  ;;  %v1983_v57 = vor.u32 4788187, %v1982_v21  ;;  %v1803_v48 = vand.u32 2139095040, %v4180_v54  ;;  %v1709_v52 = vshrl.u32 %v1708_v60, 5 }
 0x2ae   : > { %v4204_v61 = vsub.s32 %v2068_v51, %v2071_v42  ;;  %v4207_v5 = vshll.u32 %v1704_v58, 8  ;;  %v1986_v9 = vcvt.s32.f32 %v1979_v49  ;;  %v2094_v22 = vsub.s32 4, %v2070_v20 }
 0x2af   : > { %v1714_v18 = vshrl.u32 %v2987_v11, %v1711_v63  ;;  %v1984_v30 = vand.u32 2147483647, %v1983_v57  ;;  %v1717_v32 = vshrl.u32 %v2988_v53, %v1711_v63  ;;  %v1720_v6 = vshrl.u32 %v2989_v26, %v1711_v63 }
 0x2b0   : > { %v2074_v17 = vsub.s32 0, %v4204_v61  ;;  %v1713_v44 = vshll.u32 %v2986_v19, %v1710_v59  ;;  %v1716_v15 = vshll.u32 %v2987_v11, %v1710_v59  ;;  %v1719_v62 = vshll.u32 %v2988_v53, %v1710_v59 }
 0x2b1   : > { %v1987_v55 = vmul.f32 %v1986_v9, %v1984_v30  ;;  %v1722_v46 = vshll.u32 %v2989_v26, %v1710_v59  ;;  %v1723_v8 = vshrl.u32 %v4730_v43, %v1711_v63  ;;  %v1726_v36 = vshrl.u32 %v4731_v50, %v1711_v63 }
 0x2b2   : > { %v2669_v0 = vmin.u32 %v2074_v17, %v4204_v61  ;;  %v1715_v39 = vor.u32 %v1714_v18, %v1713_v44  ;;  %v1718_v4 = vor.u32 %v1717_v32, %v1716_v15  ;;  %v1721_v12 = vor.u32 %v1720_v6, %v1719_v62 }
 0x2b3   : > { %v1988_v10 = vxor.u32 2147483648, %v1987_v55  ;;  %v1724_v51 = vor.u32 %v1723_v8, %v1722_v46  ;;  %v1725_v37 = vshll.u32 %v4730_v43, %v1710_v59  ;;  %v2095_v3 = vsel %vm2010_vm15, %v2094_v22, %v2070_v20 }
 0x2b4   : > { %v2076_v33 = vclz %v2669_v0  ;;  %v1712_v24 = vshrl.u32 %v2986_v19, %v1711_v63  ;;  %v1804_v29 = vshrl.u32 %v1803_v48, 23  ;;  %vm1728_vm6 = vcmp.lt.s32.totalorder %v1709_v52, 1 }
 0x2b5   : > { %v1989_v25 = vsel %vm1906_vm0, %v1988_v10, %v1987_v55  ;;  %v1727_v1 = vor.u32 %v1726_v36, %v1725_v37  ;;  %vm1729_vm2 = vcmp.lt.s32.totalorder %v1709_v52, 2  ;;  %vm1730_vm10 = vcmp.lt.s32.totalorder %v1709_v52, 3 }
 0x2b6   : > { %v1992_v31 = vsel %vm4169_vm7, %v3998_v14, %v1989_v25  ;;  %v2670_v35 = vadd.s32 4294967294, %v2076_v33  ;;  %vm1731_vm3 = vcmp.lt.s32.totalorder %v1709_v52, 4  ;;  %v1736_v16 = vsel %vm1728_vm6, %v1715_v39, %v1718_v4 }
 0x2b7   : > { %2878 = vcosq.f32 %v1992_v31  ;;  %v1733_v47 = vsel %vm1731_vm3, %v1721_v12, 2102212464  ;;  %v1737_v60 = vsel %vm1731_vm3, %v1724_v51, 920167782  ;;  %v1732_v56 = vsel %vm1728_vm6, %v1712_v24, %v1715_v39 }
 0x2b8   : > { %2880 = vsinq.f32 %v1992_v31  ;;  %vm2671_vm8 = vcmp.lt.s32.totalorder %v2670_v35, 0  ;;  %v1738_v20 = vsel %vm1730_vm10, %v1721_v12, %v1737_v60  ;;  %v1740_v41 = vsel %vm1728_vm6, %v1718_v4, %v1721_v12 }
 0x2b9   : > { %v2079_v58 = vsel %vm2671_vm8, 0, %v2670_v35  ;;  %v1739_v59 = vsel %vm1729_vm2, %v1736_v16, %v1738_v20  ;;  %v1741_v49 = vsel %vm1731_vm3, %v1727_v1, 1326507024  ;;  %v1734_v63 = vsel %vm1730_vm10, %v1718_v4, %v1733_v47 }
 0x2ba   : > { %v2080_v21 = vsub.s32 32, %v2079_v58  ;;  %v2084_v42 = vsub.s32 4294967266, %v2079_v58  ;;  %v1742_v57 = vsel %vm1730_vm10, %v1724_v51, %v1741_v49  ;;  %v2081_v48 = vshll.u32 %v4204_v61, %v2079_v58 }
 0x2bb   : > { %v1743_v18 = vsel %vm1729_vm2, %v1740_v41, %v1742_v57  ;;  %v4238_v30 = vmul.u32.u64.low %v4207_v5, %v1739_v59  ;;  %v4239_v9 = vmul.u32.u64.high %v4207_v5, %v1739_v59, %v4238_v30  ;;  %vm4248_vm11 = vcmp.le.f32.partialorder %v2008_v28, 0.7853982 }
 0x2bc   : > { %v2082_v32 = vshrl.u32 %v2064_v34, %v2080_v21  ;;  %v2085_v6 = vadd.s32 127, %v2084_v42  ;;  %v4243_v17 = vmul.u32.u64.low %v4207_v5, %v1743_v18  ;;  %v4244_v22 = vmul.u32.u64.high %v4207_v5, %v1743_v18, %v4243_v17 }
 0x2bd   : > { %v1735_v61 = vsel %vm1729_vm2, %v1732_v56, %v1734_v63  ;;  %v2660_v15 = vadd.s32 4294967169, %v1804_v29  ;;  %v2097_v46 = vsel %vm4248_vm11, 0, %v2095_v3  ;;  %v1998_v34 = vand.u32 3, %v4200_v38 }
 0x2be   : > { %v2083_v55 = vor.u32 %v2082_v32, %v2081_v48  ;;  %v2086_v62 = vshll.u32 %v2085_v6, 23  ;;  %v1754_v8 = vadd.s32 1, %v4239_v9  ;;  %v1800_v0 = vand.u32 2147483647, %v4180_v54 }
 0x2bf   : > { %v1810_v39 = vadd.s32 1, %v2660_v15  ;;  %v1751_v28 = vmul.u32 %v4207_v5, %v1735_v61  ;;  %vm1753_vm0 = vc.u32 %v4244_v22, %v4238_v30  ;;  %v2101_v10 = vadd.s32 3, %v2097_v46  ;;  %v4288_v61 = vpop.permute.xlu0 %1685 }
 0x2c0   : > { %v2087_v4 = vor.u32 4788187, %v2086_v62  ;;  %v2090_v36 = vcvt.s32.f32 %v2083_v55  ;;  %v1755_v12 = vsel %vm1753_vm0, %v1754_v8, %v4239_v9  ;;  %vm2003_vm4 = vcmp.eq.s32.totalorder %v1998_v34, 2 }
 0x2c1   : > { %v2879_v52 = vpop.eup %2878  ;;  %vm1811_vm12 = vcmp.gt.s32.totalorder %v1810_v39, 0  ;;  %v1756_v33 = vadd.s32 %v1755_v12, %v1751_v28  ;;  %v1807_v29 = vand.u32 8388607, %v1800_v0  ;;  %vm2000_vm7 = vcmp.eq.s32.totalorder %v1998_v34, 0 }
 0x2c2   : > { %v2881_v51 = vpop.eup %2880  ;;  %v2004_v37 = vxor.u32 2147483648, %v2879_v52  ;;  %v2088_v38 = vand.u32 2147483647, %v2087_v4  ;;  %v1812_v3 = vsel %vm1811_vm12, %v1810_v39, 0  ;;  %vm1996_vm13 = vweird.f32 %v3998_v14 }
 0x2c3   : > { %v2001_v24 = vxor.u32 2147483648, %v2881_v51  ;;  %v1814_v5 = vand.u32 31, %v1812_v3  ;;  %v1757_v31 = vadd.s32 536870912, %v1756_v33  ;;  %vm1999_vm14 = vcmp.lt.s32.totalorder %v1998_v34, 2 }
 0x2c4   : > { %v2005_v25 = vsel %vm2003_vm4, %v2004_v37, %v2881_v51  ;;  %v2091_v1 = vmul.f32 %v2090_v36, %v2088_v38  ;;  %v4265_v56 = vand.u32 3, %v2101_v10  ;;  %v1808_v59 = vor.u32 8388608, %v1807_v29 }
 0x2c5   : > { %v2002_v35 = vsel %vm2000_vm7, %v2879_v52, %v2001_v24  ;;  %v1815_v47 = vsub.s32 32, %v1814_v5  ;;  %v4267_v20 = vshrl.u32 %v1757_v31, 30  ;;  %v1817_v42 = vshll.u32 %v2986_v19, %v1814_v5 }
 0x2c6   : > { %v2006_v16 = vsel %vm1999_vm14, %v2002_v35, %v2005_v25  ;;  %v2092_v60 = vxor.u32 2147483648, %v2091_v1  ;;  %v4280_v48 = vshrl.u32 %v1812_v3, 5  ;;  %v1820_v18 = vshll.u32 %v2987_v11, %v1814_v5 }
 0x2c7   : > { %v2007_v58 = vsel %vm1996_vm13, nan, %v2006_v16  ;;  %v1818_v41 = vshrl.u32 %v2987_v11, %v1815_v47  ;;  %v1821_v49 = vshrl.u32 %v2988_v53, %v1815_v47  ;;  %v1759_v14 = vshll.u32 %v4267_v20, 30 }
 0x2c8   : > { %v2093_v21 = vsel %vm2010_vm15, %v2092_v60, %v2091_v1  ;;  %2530 = vst [vmem:[%s3681_s7 + $0x50] sm:$0xff] %v2007_v58  ;;  %v1824_v63 = vshrl.u32 %v2989_v26, %v1815_v47  ;;  %v1662_v9 = vmul.f32 %v3235_v45, %v3948_v27  ;;  %v1823_v17 = vshll.u32 %v2988_v53, %v1814_v5 }
 0x2c9   : > { %v2096_v57 = vsel %vm4248_vm11, %v4035_v40, %v2093_v21  ;;  %v4285_v32 = vsub.s32 %v1756_v33, %v1759_v14  ;;  %v1819_v6 = vor.u32 %v1818_v41, %v1817_v42  ;;  %v1822_v15 = vor.u32 %v1821_v49, %v1820_v18 }
 0x2ca   : > { %2882 = vcosq.f32 %v2096_v57  ;;  %v1826_v44 = vshll.u32 %v2989_v26, %v1814_v5  ;;  %v1827_v55 = vshrl.u32 %v4730_v43, %v1815_v47  ;;  %v1825_v46 = vor.u32 %v1824_v63, %v1823_v17 }
 0x2cb   : > { %2884 = vsinq.f32 %v2096_v57  ;;  %v1762_v62 = vsub.s32 0, %v4285_v32  ;;  %v1829_v34 = vshll.u32 %v4730_v43, %v1814_v5  ;;  %v1830_v8 = vshrl.u32 %v4731_v50, %v1815_v47 }
 0x2cc   : > { %v1828_v39 = vor.u32 %v1827_v55, %v1826_v44  ;;  %v4295_v4 = vshll.u32 %v1808_v59, 8  ;;  %v4299_v28 = vmul.f32 %v3235_v45, %v3979_v2  ;;  %v4302_v52 = vadd.f32 %v4288_v61, %v1662_v9 }
 0x2cd   : > { %vm2107_vm1 = vcmp.eq.s32.totalorder %v4265_v56, 2  ;;  %vm1698_vm9 = vcmp.lt.s32.totalorder %v4123_v23, 0  ;;  %v2657_v36 = vmin.u32 %v1762_v62, %v4285_v32  ;;  %v1831_v10 = vor.u32 %v1830_v8, %v1829_v34 }
 0x2ce   : > { %vm1832_vm5 = vcmp.lt.s32.totalorder %v4280_v48, 1  ;;  %vm1835_vm15 = vcmp.lt.s32.totalorder %v4280_v48, 4  ;;  %vm2104_vm6 = vcmp.eq.s32.totalorder %v4265_v56, 0  ;;  %v1782_v12 = vsub.s32 4, %v4267_v20 }
 0x2cf   : > { %v1816_v45 = vshrl.u32 %v2986_v19, %v1815_v47  ;;  %v1840_v51 = vsel %vm1832_vm5, %v1819_v6, %v1822_v15  ;;  %v1841_v37 = vsel %vm1835_vm15, %v1828_v39, 920167782  ;;  %vm2103_vm2 = vcmp.lt.s32.totalorder %v4265_v56, 2 }
 0x2d0   : > { %v1764_v38 = vclz %v2657_v36  ;;  %vm1834_vm10 = vcmp.lt.s32.totalorder %v4280_v48, 3  ;;  %v1837_v33 = vsel %vm1835_vm15, %v1825_v46, 2102212464  ;;  %v1844_v3 = vsel %vm1832_vm5, %v1822_v15, %v1825_v46 }
 0x2d1   : > { %vm2100_vm3 = vweird.f32 %v4035_v40  ;;  %vm1833_vm8 = vcmp.lt.s32.totalorder %v4280_v48, 2  ;;  %v1842_v24 = vsel %vm1834_vm10, %v1825_v46, %v1841_v37  ;;  %v1845_v29 = vsel %vm1835_vm15, %v1831_v10, 1326507024 }
 0x2d2   : > { %v2323_v5 = vand.u32 2139095040, %v4302_v52  ;;  %v2658_v25 = vadd.s32 4294967294, %v1764_v38  ;;  %v1836_v1 = vsel %vm1832_vm5, %v1816_v45, %v1819_v6  ;;  %v1843_v31 = vsel %vm1833_vm8, %v1840_v51, %v1842_v24 }
 0x2d3   : > { %v1846_v35 = vsel %vm1834_vm10, %v1828_v39, %v1845_v29  ;;  %v1838_v47 = vsel %vm1834_vm10, %v1822_v15, %v1837_v33  ;;  %v4328_v60 = vmul.u32.u64.low %v4295_v4, %v1843_v31  ;;  %v4329_v58 = vmul.u32.u64.high %v4295_v4, %v1843_v31, %v4328_v60 }
 0x2d4   : > { %v1847_v16 = vsel %vm1833_vm8, %v1844_v3, %v1846_v35  ;;  %v2883_v59 = vpop.eup %2882  ;;  %vm2659_vm11 = vcmp.lt.s32.totalorder %v2658_v25, 0  ;;  %v2324_v21 = vshrl.u32 %v2323_v5, 23  ;;  %v1752_v63 = vadd.s32 %v4238_v30, %v4244_v22 }
 0x2d5   : > { %v4333_v41 = vmul.u32.u64.low %v4295_v4, %v1847_v16  ;;  %v4334_v49 = vmul.u32.u64.high %v4295_v4, %v1847_v16, %v4333_v41  ;;  %v2885_v14 = vpop.eup %2884  ;;  %v2108_v42 = vxor.u32 2147483648, %v2883_v59  ;;  %v1767_v57 = vsel %vm2659_vm11, 0, %v2658_v25 }
 0x2d6   : > { %v2320_v18 = vand.u32 2147483647, %v4302_v52  ;;  %v2105_v9 = vxor.u32 2147483648, %v2885_v14  ;;  %v1768_v6 = vsub.s32 32, %v1767_v57  ;;  %v1772_v17 = vsub.s32 4294967266, %v1767_v57 }
 0x2d7   : > { %v1839_v15 = vsel %vm1833_vm8, %v1836_v1, %v1838_v47  ;;  %v2109_v44 = vsel %vm2107_vm1, %v2108_v42, %v2885_v14  ;;  %v1783_v55 = vsel %vm1698_vm9, %v1782_v12, %v4267_v20  ;;  %v1858_v62 = vadd.s32 1, %v4329_v58 }
 0x2d8   : > { %v2680_v30 = vadd.s32 4294967169, %v2324_v21  ;;  %v2106_v22 = vsel %vm2104_vm6, %v2883_v59, %v2105_v9  ;;  %v1769_v46 = vshll.u32 %v4285_v32, %v1767_v57  ;;  %v1770_v34 = vshrl.u32 %v1752_v63, %v1768_v6 }
 0x2d9   : > { %v1773_v8 = vadd.s32 127, %v1772_v17  ;;  %v2110_v48 = vsel %vm2103_vm2, %v2106_v22, %v2109_v44  ;;  %v1855_v39 = vmul.u32 %v4295_v4, %v1839_v15  ;;  %vm1857_vm0 = vc.u32 %v4334_v49, %v4328_v60 }
 0x2da   : > { %v2330_v36 = vadd.s32 1, %v2680_v30  ;;  %v2111_v20 = vsel %vm2100_vm3, nan, %v2110_v48  ;;  %v1771_v10 = vor.u32 %v1770_v34, %v1769_v46  ;;  %v1859_v45 = vsel %vm1857_vm0, %v1858_v62, %v4329_v58 }
 0x2db   : > { %v1774_v12 = vshll.u32 %v1773_v8, 23  ;;  %2531 = vst [vmem:[%s3681_s7 + $0x58] sm:$0xff] %v2111_v20  ;;  %vm4361_vm12 = vcmp.le.f32.partialorder %v1696_v13, 0.7853982  ;;  %v1860_v56 = vadd.s32 %v1859_v45, %v1855_v39  ;;  %v4367_v51 = vadd.f32 %v4288_v61, %v4299_v28 }
 0x2dc   : > { %vm2331_vm4 = vcmp.gt.s32.totalorder %v2330_v36, 0  ;;  %v2327_v40 = vand.u32 8388607, %v2320_v18  ;;  %v1785_v38 = vsel %vm4361_vm12, 0, %v1783_v55  ;;  %v1778_v24 = vcvt.s32.f32 %v1771_v10 }
 0x2dd   : > { %v1775_v4 = vor.u32 4788187, %v1774_v12  ;;  %v2332_v37 = vsel %vm2331_vm4, %v2330_v36, 0  ;;  %v1861_v33 = vadd.s32 536870912, %v1860_v56  ;;  %v1789_v1 = vadd.s32 3, %v1785_v38 }
 0x2de   : > { %v2334_v3 = vand.u32 31, %v2332_v37  ;;  %v2328_v31 = vor.u32 8388608, %v2327_v40  ;;  %v2427_v61 = vand.u32 2139095040, %v4367_v51  ;;  %v2333_v35 = vshrl.u32 %v2332_v37, 5 }
 0x2df   : > { %v1776_v13 = vand.u32 2147483647, %v1775_v4  ;;  %v4373_v29 = vshrl.u32 %v1861_v33, 30  ;;  %v4395_v22 = vand.u32 3, %v1789_v1  ;;  %vm1802_vm7 = vcmp.lt.s32.totalorder %v4180_v54, 0 }
 0x2e0   : > { %v2335_v5 = vsub.s32 32, %v2334_v3  ;;  %v2337_v47 = vshll.u32 %v2986_v19, %v2334_v3  ;;  %v2340_v42 = vshll.u32 %v2987_v11, %v2334_v3  ;;  %v2343_v63 = vshll.u32 %v2988_v53, %v2334_v3 }
 0x2e1   : > { %v1779_v25 = vmul.f32 %v1778_v24, %v1776_v13  ;;  %v1863_v28 = vshll.u32 %v4373_v29, 30  ;;  %v2346_v17 = vshll.u32 %v2989_v26, %v2334_v3  ;;  %v2349_v15 = vshll.u32 %v4730_v43, %v2334_v3 }
 0x2e2   : > { %v2338_v16 = vshrl.u32 %v2987_v11, %v2335_v5  ;;  %v2341_v59 = vshrl.u32 %v2988_v53, %v2335_v5  ;;  %v2344_v41 = vshrl.u32 %v2989_v26, %v2335_v5  ;;  %v2347_v21 = vshrl.u32 %v4730_v43, %v2335_v5 }
 0x2e3   : > { %v1780_v58 = vxor.u32 2147483648, %v1779_v25  ;;  %v4382_v14 = vsub.s32 %v1860_v56, %v1863_v28  ;;  %v2350_v57 = vshrl.u32 %v4731_v50, %v2335_v5  ;;  %v2368_v48 = vshll.u32 %v2328_v31, 8 }
 0x2e4   : > { %v2339_v6 = vor.u32 %v2338_v16, %v2337_v47  ;;  %v2342_v62 = vor.u32 %v2341_v59, %v2340_v42  ;;  %v2345_v30 = vor.u32 %v2344_v41, %v2343_v63  ;;  %v2348_v46 = vor.u32 %v2347_v21, %v2346_v17 }
 0x2e5   : > { %v1781_v9 = vsel %vm1698_vm9, %v1780_v58, %v1779_v25  ;;  %v1866_v55 = vsub.s32 0, %v4382_v14  ;;  %v2351_v34 = vor.u32 %v2350_v57, %v2349_v15  ;;  %v2428_v39 = vshrl.u32 %v2427_v61, 23 }
 0x2e6   : > { %v1784_v44 = vsel %vm4361_vm12, %v4123_v23, %v1781_v9  ;;  %v2336_v36 = vshrl.u32 %v2986_v19, %v2335_v5  ;;  %vm2352_vm13 = vcmp.lt.s32.totalorder %v2333_v35, 1  ;;  %vm2353_vm14 = vcmp.lt.s32.totalorder %v2333_v35, 2 }
 0x2e7   : > { %2886 = vcosq.f32 %v1784_v44  ;;  %v2661_v8 = vmin.u32 %v1866_v55, %v4382_v14  ;;  %vm2354_vm1 = vcmp.lt.s32.totalorder %v2333_v35, 3  ;;  %vm2355_vm9 = vcmp.lt.s32.totalorder %v2333_v35, 4 }
 0x2e8   : > { %2888 = vsinq.f32 %v1784_v44  ;;  %v2360_v10 = vsel %vm2352_vm13, %v2339_v6, %v2342_v62  ;;  %v2364_v12 = vsel %vm2352_vm13, %v2342_v62, %v2345_v30  ;;  %v2356_v45 = vsel %vm2352_vm13, %v2336_v36, %v2339_v6 }
 0x2e9   : > { %v1868_v20 = vclz %v2661_v8  ;;  %v2357_v32 = vsel %vm2355_vm9, %v2345_v30, 2102212464  ;;  %v2361_v56 = vsel %vm2355_vm9, %v2348_v46, 920167782  ;;  %v2365_v4 = vsel %vm2355_vm9, %v2351_v34, 1326507024 }
 0x2ea   : > { %vm4402_vm5 = vcmp.le.f32.partialorder %v1800_v0, 0.7853982  ;;  %v2358_v38 = vsel %vm2354_vm1, %v2342_v62, %v2357_v32  ;;  %v2362_v33 = vsel %vm2354_vm1, %v2345_v30, %v2361_v56  ;;  %v2366_v3 = vsel %vm2354_vm1, %v2348_v46, %v2365_v4 }
 0x2eb   : > { %v2662_v37 = vadd.s32 4294967294, %v1868_v20  ;;  %vm1791_vm15 = vcmp.lt.s32.totalorder %v4395_v22, 2  ;;  %v1886_v13 = vsub.s32 4, %v4373_v29  ;;  %v2363_v24 = vsel %vm2353_vm14, %v2360_v10, %v2362_v33 }
 0x2ec   : > { %v2367_v5 = vsel %vm2353_vm14, %v2364_v12, %v2366_v3  ;;  %v2684_v25 = vadd.s32 4294967169, %v2428_v39  ;;  %vm1788_vm6 = vweird.f32 %v4123_v23  ;;  %v2359_v0 = vsel %vm2353_vm14, %v2356_v45, %v2358_v38 }
 0x2ed   : > { %vm2663_vm2 = vcmp.lt.s32.totalorder %v2662_v37, 0  ;;  %v4412_v1 = vmul.u32.u64.low %v2368_v48, %v2367_v5  ;;  %v4413_v31 = vmul.u32.u64.high %v2368_v48, %v2367_v5, %v4412_v1  ;;  %vm1792_vm10 = vcmp.eq.s32.totalorder %v4395_v22, 0 }
 0x2ee   : > { %v1871_v61 = vsel %vm2663_vm2, 0, %v2662_v37  ;;  %v4416_v28 = vmul.u32.u64.low %v2368_v48, %v2363_v24  ;;  %v4417_v47 = vmul.u32.u64.high %v2368_v48, %v2363_v24, %v4416_v28  ;;  %v1856_v16 = vadd.s32 %v4328_v60, %v4334_v49 }
 0x2ef   : > { %v1872_v58 = vsub.s32 32, %v1871_v61  ;;  %v1876_v59 = vsub.s32 4294967266, %v1871_v61  ;;  %v2434_v41 = vadd.s32 1, %v2684_v25  ;;  %vm1795_vm3 = vcmp.eq.s32.totalorder %v4395_v22, 2 }
 0x2f0   : > { %v1887_v35 = vsel %vm1802_vm7, %v1886_v13, %v4373_v29  ;;  %v2375_v42 = vmul.u32 %v2368_v48, %v2359_v0  ;;  %v2424_v63 = vand.u32 2147483647, %v4367_v51  ;;  %v1873_v6 = vshll.u32 %v4382_v14, %v1871_v61  ;;  %v1681_v0 = vpop.permute.xlu1 %1680 }
 0x2f1   : > { %v2887_v21 = vpop.eup %2886  ;;  %v1874_v17 = vshrl.u32 %v1856_v16, %v1872_v58  ;;  %v1877_v15 = vadd.s32 127, %v1876_v59  ;;  %vm2377_vm8 = vc.u32 %v4413_v31, %v4416_v28  ;;  %v2378_v49 = vadd.s32 1, %v4417_v47 }
 0x2f2   : > { %v2889_v57 = vpop.eup %2888  ;;  %v1796_v9 = vxor.u32 2147483648, %v2887_v21  ;;  %vm2435_vm11 = vcmp.gt.s32.totalorder %v2434_v41, 0  ;;  %v1889_v14 = vsel %vm4402_vm5, 0, %v1887_v35  ;;  %v1660_v36 = vmul.f32 %v3173_v7, %v3948_v27 }
 0x2f3   : > { %v1793_v60 = vxor.u32 2147483648, %v2889_v57  ;;  %v1875_v55 = vor.u32 %v1874_v17, %v1873_v6  ;;  %v1878_v62 = vshll.u32 %v1877_v15, 23  ;;  %v2436_v29 = vsel %vm2435_vm11, %v2434_v41, 0 }
 0x2f4   : > { %v1797_v44 = vsel %vm1795_vm3, %v1796_v9, %v2889_v57  ;;  %v2379_v46 = vsel %vm2377_vm8, %v2378_v49, %v4417_v47  ;;  %v2438_v34 = vand.u32 31, %v2436_v29  ;;  %v2431_v10 = vand.u32 8388607, %v2424_v63 }
 0x2f5   : > { %v1794_v30 = vsel %vm1792_vm10, %v2887_v21, %v1793_v60  ;;  %v1879_v48 = vor.u32 4788187, %v1878_v62  ;;  %v2380_v39 = vadd.s32 %v2379_v46, %v2375_v42  ;;  %v4446_v45 = vmul.f32 %v3173_v7, %v3979_v2 }
 0x2f6   : > { %v1798_v8 = vsel %vm1791_vm15, %v1794_v30, %v1797_v44  ;;  %v2439_v12 = vsub.s32 32, %v2438_v34  ;;  %v1882_v56 = vcvt.s32.f32 %v1875_v55  ;;  %v1893_v22 = vadd.s32 3, %v1889_v14 }
 0x2f7   : > { %v1799_v20 = vsel %vm1788_vm6, nan, %v1798_v8  ;;  %v1880_v32 = vand.u32 2147483647, %v1879_v48  ;;  %v2381_v4 = vadd.s32 536870912, %v2380_v39  ;;  %v2437_v37 = vshrl.u32 %v2436_v29, 5 }
 0x2f8   : > { %2528 = vst [vmem:[%s3681_s7 + $0x40] sm:$0xff] %v1799_v20  ;;  %v2442_v38 = vshrl.u32 %v2987_v11, %v2439_v12  ;;  %v2445_v27 = vshrl.u32 %v2988_v53, %v2439_v12  ;;  %v2448_v23 = vshrl.u32 %v2989_v26, %v2439_v12  ;;  %v2441_v13 = vshll.u32 %v2986_v19, %v2438_v34 }
 0x2f9   : > { %v1883_v33 = vmul.f32 %v1882_v56, %v1880_v32  ;;  %v2382_v3 = vshrl.u32 %v2381_v4, 30  ;;  %v2451_v24 = vshrl.u32 %v4730_v43, %v2439_v12  ;;  %v2444_v7 = vshll.u32 %v2987_v11, %v2438_v34 }
 0x2fa   : > { %v2447_v2 = vshll.u32 %v2988_v53, %v2438_v34  ;;  %v2450_v5 = vshll.u32 %v2989_v26, %v2438_v34  ;;  %v2454_v25 = vshrl.u32 %v4731_v50, %v2439_v12  ;;  %v4458_v61 = vand.u32 3, %v1893_v22 }
 0x2fb   : > { %v1884_v1 = vxor.u32 2147483648, %v1883_v33  ;;  %v2383_v47 = vshll.u32 %v2382_v3, 30  ;;  %v2453_v16 = vshll.u32 %v4730_v43, %v2438_v34  ;;  %v2443_v58 = vor.u32 %v2442_v38, %v2441_v13 }
 0x2fc   : > { %v2446_v59 = vor.u32 %v2445_v27, %v2444_v7  ;;  %v2449_v41 = vor.u32 %v2448_v23, %v2447_v2  ;;  %v2452_v21 = vor.u32 %v2451_v24, %v2450_v5  ;;  %v2432_v57 = vor.u32 8388608, %v2431_v10 }
 0x2fd   : > { %v1885_v35 = vsel %vm1802_vm7, %v1884_v1, %v1883_v33  ;;  %v4463_v42 = vsub.s32 %v2380_v39, %v2383_v47  ;;  %v4465_v9 = vadd.f32 %v1681_v0, %v1660_v36  ;;  %v2440_v17 = vshrl.u32 %v2986_v19, %v2439_v12 }
 0x2fe   : > { %v1888_v6 = vsel %vm4402_vm5, %v4180_v54, %v1885_v35  ;;  %v2455_v15 = vor.u32 %v2454_v25, %v2453_v16  ;;  %vm2456_vm0 = vcmp.lt.s32.totalorder %v2437_v37, 1  ;;  %vm2458_vm12 = vcmp.lt.s32.totalorder %v2437_v37, 3 }
 0x2ff   : > { %2890 = vcosq.f32 %v1888_v6  ;;  %v2386_v60 = vsub.s32 0, %v4463_v42  ;;  %vm2459_vm4 = vcmp.lt.s32.totalorder %v2437_v37, 4  ;;  %vm4474_vm7 = vcmp.le.f32.partialorder %v2320_v18, 0.7853982 }
 0x300   : > { %2892 = vsinq.f32 %v1888_v6  ;;  %v2461_v44 = vsel %vm2459_vm4, %v2449_v41, 2102212464  ;;  %v2464_v40 = vsel %vm2456_vm0, %v2443_v58, %v2446_v59  ;;  %v2465_v55 = vsel %vm2459_vm4, %v2452_v21, 920167782 }
 0x301   : > { %v2681_v62 = vmin.u32 %v2386_v60, %v4463_v42  ;;  %v2406_v29 = vsub.s32 4, %v2382_v3  ;;  %vm2457_vm13 = vcmp.lt.s32.totalorder %v2437_v37, 2  ;;  %v2466_v30 = vsel %vm2458_vm12, %v2449_v41, %v2465_v55 }
 0x302   : > { %v2467_v14 = vsel %vm2457_vm13, %v2464_v40, %v2466_v30  ;;  %v2468_v46 = vsel %vm2456_vm0, %v2446_v59, %v2449_v41  ;;  %v2469_v34 = vsel %vm2459_vm4, %v2455_v15, 1326507024  ;;  %v2472_v8 = vshll.u32 %v2432_v57, 8 }
 0x303   : > { %vm2322_vm14 = vcmp.lt.s32.totalorder %v4302_v52, 0  ;;  %v2388_v18 = vclz %v2681_v62  ;;  %v2460_v48 = vsel %vm2456_vm0, %v2440_v17, %v2443_v58  ;;  %v2462_v39 = vsel %vm2458_vm12, %v2446_v59, %v2461_v44 }
 0x304   : > { %v2470_v36 = vsel %vm2458_vm12, %v2452_v21, %v2469_v34  ;;  %v4487_v20 = vmul.u32.u64.low %v2472_v8, %v2467_v14  ;;  %v4488_v10 = vmul.u32.u64.high %v2472_v8, %v2467_v14, %v4487_v20  ;;  %v2115_v12 = vand.u32 2139095040, %v4465_v9 }
 0x305   : > { %vm1895_vm1 = vcmp.lt.s32.totalorder %v4458_v61, 2  ;;  %vm1896_vm9 = vcmp.eq.s32.totalorder %v4458_v61, 0  ;;  %v2682_v32 = vadd.s32 4294967294, %v2388_v18  ;;  %v2407_v56 = vsel %vm2322_vm14, %v2406_v29, %v2382_v3 }
 0x306   : > { %v2471_v22 = vsel %vm2457_vm13, %v2468_v46, %v2470_v36  ;;  %vm1892_vm5 = vweird.f32 %v4180_v54  ;;  %v2463_v4 = vsel %vm2457_vm13, %v2460_v48, %v2462_v39  ;;  %v2116_v23 = vshrl.u32 %v2115_v12, 23 }
 0x307   : > { %v4499_v38 = vmul.u32.u64.low %v2472_v8, %v2471_v22  ;;  %v4500_v27 = vmul.u32.u64.high %v2472_v8, %v2471_v22, %v4499_v38  ;;  %vm1899_vm15 = vcmp.eq.s32.totalorder %v4458_v61, 2  ;;  %vm2683_vm6 = vcmp.lt.s32.totalorder %v2682_v32, 0 }
 0x308   : > { %v4504_v33 = vadd.f32 %v1681_v0, %v4446_v45  ;;  %v2112_v13 = vand.u32 2147483647, %v4465_v9  ;;  %v2376_v3 = vadd.s32 %v4416_v28, %v4413_v31  ;;  %v2391_v24 = vsel %vm2683_vm6, 0, %v2682_v32 }
 0x309   : > { %v2482_v7 = vadd.s32 1, %v4488_v10  ;;  %v2672_v37 = vadd.s32 4294967169, %v2116_v23  ;;  %v2891_v2 = vpop.eup %2890  ;;  %v2392_v5 = vsub.s32 32, %v2391_v24  ;;  %v2396_v25 = vsub.s32 4294967266, %v2391_v24 }
 0x30a   : > { %v2409_v1 = vsel %vm4474_vm7, 0, %v2407_v56  ;;  %v2479_v47 = vmul.u32 %v2472_v8, %v2463_v4  ;;  %v2893_v16 = vpop.eup %2892  ;;  %v1900_v58 = vxor.u32 2147483648, %v2891_v2  ;;  %v2393_v45 = vshll.u32 %v4463_v42, %v2391_v24 }
 0x30b   : > { %vm2481_vm2 = vc.u32 %v4500_v27, %v4487_v20  ;;  %v2122_v0 = vadd.s32 1, %v2672_v37  ;;  %v1897_v31 = vxor.u32 2147483648, %v2893_v16  ;;  %v2394_v28 = vshrl.u32 %v2376_v3, %v2392_v5 }
 0x30c   : > { %v2397_v59 = vadd.s32 127, %v2396_v25  ;;  %v2483_v41 = vsel %vm2481_vm2, %v2482_v7, %v4488_v10  ;;  %v1901_v21 = vsel %vm1899_vm15, %v1900_v58, %v2893_v16  ;;  %v2119_v57 = vand.u32 8388607, %v2112_v13 }
 0x30d   : > { %v2484_v35 = vadd.s32 %v2483_v41, %v2479_v47  ;;  %vm2123_vm10 = vcmp.gt.s32.totalorder %v2122_v0, 0  ;;  %v1898_v42 = vsel %vm1896_vm9, %v2891_v2, %v1897_v31  ;;  %v2395_v6 = vor.u32 %v2394_v28, %v2393_v45 }
 0x30e   : > { %v2398_v17 = vshll.u32 %v2397_v59, 23  ;;  %v2124_v15 = vsel %vm2123_vm10, %v2122_v0, 0  ;;  %v1902_v60 = vsel %vm1895_vm1, %v1898_v42, %v1901_v21  ;;  %v2219_v55 = vand.u32 2139095040, %v4504_v33 }
 0x30f   : > { %v2485_v44 = vadd.s32 536870912, %v2484_v35  ;;  %v2126_v40 = vand.u32 31, %v2124_v15  ;;  %v1903_v62 = vsel %vm1892_vm5, nan, %v1902_v60  ;;  %v2402_v34 = vcvt.s32.f32 %v2395_v6 }
 0x310   : > { %v2399_v29 = vor.u32 4788187, %v2398_v17  ;;  %2529 = vst [vmem:[%s3681_s7 + $0x48] sm:$0xff] %v1903_v62  ;;  %v2413_v8 = vadd.s32 3, %v2409_v1  ;;  %v2120_v18 = vor.u32 8388608, %v2119_v57  ;;  %v2220_v36 = vshrl.u32 %v2219_v55, 23 }
 0x311   : > { %v4528_v30 = vshrl.u32 %v2485_v44, 30  ;;  %v2127_v14 = vsub.s32 32, %v2126_v40  ;;  %v2129_v61 = vshll.u32 %v2986_v19, %v2126_v40  ;;  %v2132_v22 = vshll.u32 %v2987_v11, %v2126_v40 }
 0x312   : > { %v2400_v46 = vand.u32 2147483647, %v2399_v29  ;;  %v2135_v4 = vshll.u32 %v2988_v53, %v2126_v40  ;;  %v2125_v3 = vshrl.u32 %v2124_v15, 5  ;;  %v2138_v24 = vshll.u32 %v2989_v26, %v2126_v40 }
 0x313   : > { %v2487_v48 = vshll.u32 %v4528_v30, 30  ;;  %v2130_v39 = vshrl.u32 %v2987_v11, %v2127_v14  ;;  %v2133_v54 = vshrl.u32 %v2988_v53, %v2127_v14  ;;  %v2136_v12 = vshrl.u32 %v2989_v26, %v2127_v14 }
 0x314   : > { %v2403_v10 = vmul.f32 %v2402_v34, %v2400_v46  ;;  %v2139_v32 = vshrl.u32 %v4730_v43, %v2127_v14  ;;  %v2142_v38 = vshrl.u32 %v4731_v50, %v2127_v14  ;;  %v2141_v7 = vshll.u32 %v4730_v43, %v2126_v40 }
 0x315   : > { %v4536_v56 = vsub.s32 %v2484_v35, %v2487_v48  ;;  %v2131_v2 = vor.u32 %v2130_v39, %v2129_v61  ;;  %v2134_v5 = vor.u32 %v2133_v54, %v2132_v22  ;;  %v2137_v25 = vor.u32 %v2136_v12, %v2135_v4 }
 0x316   : > { %v2404_v23 = vxor.u32 2147483648, %v2403_v10  ;;  %v4546_v47 = vand.u32 3, %v2413_v8  ;;  %v2140_v16 = vor.u32 %v2139_v32, %v2138_v24  ;;  %v2160_v58 = vshll.u32 %v2120_v18, 8 }
 0x317   : > { %v2490_v37 = vsub.s32 0, %v4536_v56  ;;  %v2480_v0 = vadd.s32 %v4487_v20, %v4500_v27  ;;  %v2143_v28 = vor.u32 %v2142_v38, %v2141_v7  ;;  %vm2144_vm3 = vcmp.lt.s32.totalorder %v2125_v3, 1 }
 0x318   : > { %v2405_v1 = vsel %vm2322_vm14, %v2404_v23, %v2403_v10  ;;  %vm2147_vm8 = vcmp.lt.s32.totalorder %v2125_v3, 4  ;;  %v2676_v59 = vadd.s32 4294967169, %v2220_v36  ;;  %v2152_v35 = vsel %vm2144_vm3, %v2131_v2, %v2134_v5 }
 0x319   : > { %v2408_v45 = vsel %vm4474_vm7, %v4302_v52, %v2405_v1  ;;  %v2685_v31 = vmin.u32 %v2490_v37, %v4536_v56  ;;  %v2149_v21 = vsel %vm2147_vm8, %v2137_v25, 2102212464  ;;  %v2128_v57 = vshrl.u32 %v2986_v19, %v2127_v14 }
 0x31a   : > { %2894 = vcosq.f32 %v2408_v45  ;;  %vm2146_vm11 = vcmp.lt.s32.totalorder %v2125_v3, 3  ;;  %v2153_v42 = vsel %vm2147_vm8, %v2140_v16, 920167782  ;;  %v2156_v49 = vsel %vm2144_vm3, %v2134_v5, %v2137_v25 }
 0x31b   : > { %2896 = vsinq.f32 %v2408_v45  ;;  %v2492_v41 = vclz %v2685_v31  ;;  %vm2145_vm0 = vcmp.lt.s32.totalorder %v2125_v3, 2  ;;  %v2154_v17 = vsel %vm2146_vm11, %v2137_v25, %v2153_v42 }
 0x31c   : > { %v2157_v20 = vsel %vm2147_vm8, %v2143_v28, 1326507024  ;;  %v2148_v27 = vsel %vm2144_vm3, %v2128_v57, %v2131_v2  ;;  %v2150_v15 = vsel %vm2146_vm11, %v2134_v5, %v2149_v21  ;;  %v2155_v60 = vsel %vm2145_vm0, %v2152_v35, %v2154_v17 }
 0x31d   : > { %v2686_v6 = vadd.s32 4294967294, %v2492_v41  ;;  %v2158_v44 = vsel %vm2146_vm11, %v2140_v16, %v2157_v20  ;;  %v4555_v55 = vmul.u32.u64.low %v2160_v58, %v2155_v60  ;;  %v4556_v62 = vmul.u32.u64.high %v2160_v58, %v2155_v60, %v4555_v55 }
 0x31e   : > { %v2159_v40 = vsel %vm2145_vm0, %v2156_v49, %v2158_v44  ;;  %v2510_v14 = vsub.s32 4, %v4528_v30  ;;  %v2151_v48 = vsel %vm2145_vm0, %v2148_v27, %v2150_v15  ;;  %v2226_v61 = vadd.s32 1, %v2676_v59 }
 0x31f   : > { %vm2687_vm12 = vcmp.lt.s32.totalorder %v2686_v6, 0  ;;  %v4560_v46 = vmul.u32.u64.low %v2160_v58, %v2159_v40  ;;  %v4561_v34 = vmul.u32.u64.high %v2160_v58, %v2159_v40, %v4560_v46  ;;  %vm2415_vm4 = vcmp.lt.s32.totalorder %v4546_v47, 2 }
 0x320   : > { %v2495_v29 = vsel %vm2687_vm12, 0, %v2686_v6  ;;  %vm4566_vm7 = vcmp.le.f32.partialorder %v2424_v63, 0.7853982  ;;  %vm2426_vm13 = vcmp.lt.s32.totalorder %v4367_v51, 0  ;;  %v2170_v12 = vadd.s32 1, %v4556_v62 }
 0x321   : > { %v2496_v8 = vsub.s32 32, %v2495_v29  ;;  %v2500_v18 = vsub.s32 4294967266, %v2495_v29  ;;  %v2497_v36 = vshll.u32 %v4536_v56, %v2495_v29  ;;  %vm2227_vm14 = vcmp.gt.s32.totalorder %v2226_v61, 0 }
 0x322   : > { %v2511_v22 = vsel %vm2426_vm13, %v2510_v14, %v4528_v30  ;;  %v2167_v4 = vmul.u32 %v2160_v58, %v2151_v48  ;;  %vm2169_vm1 = vc.u32 %v4561_v34, %v4555_v55  ;;  %v2228_v63 = vsel %vm2227_vm14, %v2226_v61, 0 }
 0x323   : > { %v2498_v10 = vshrl.u32 %v2480_v0, %v2496_v8  ;;  %v2501_v54 = vadd.s32 127, %v2500_v18  ;;  %v2171_v56 = vsel %vm2169_vm1, %v2170_v12, %v4556_v62  ;;  %vm2419_vm9 = vcmp.eq.s32.totalorder %v4546_v47, 2 }
 0x324   : > { %v2895_v32 = vpop.eup %2894  ;;  %v2172_v37 = vadd.s32 %v2171_v56, %v2167_v4  ;;  %v2230_v2 = vand.u32 31, %v2228_v63  ;;  %vm2416_vm5 = vcmp.eq.s32.totalorder %v4546_v47, 0  ;;  %v2216_v25 = vand.u32 2147483647, %v4504_v33 }
 0x325   : > { %v2897_v38 = vpop.eup %2896  ;;  %v2420_v23 = vxor.u32 2147483648, %v2895_v32  ;;  %v2499_v3 = vor.u32 %v2498_v10, %v2497_v36  ;;  %v2502_v24 = vshll.u32 %v2501_v54, 23  ;;  %v2513_v16 = vsel %vm4566_vm7, 0, %v2511_v22 }
 0x326   : > { %v2417_v7 = vxor.u32 2147483648, %v2897_v38  ;;  %v2173_v58 = vadd.s32 536870912, %v2172_v37  ;;  %v2231_v45 = vsub.s32 32, %v2230_v2  ;;  %vm2412_vm15 = vweird.f32 %v4302_v52 }
 0x327   : > { %v2421_v5 = vsel %vm2419_vm9, %v2420_v23, %v2897_v38  ;;  %v2503_v30 = vor.u32 4788187, %v2502_v24  ;;  %v2506_v28 = vcvt.s32.f32 %v2499_v3  ;;  %v2517_v57 = vadd.s32 3, %v2513_v16 }
 0x328   : > { %v2418_v1 = vsel %vm2416_vm5, %v2895_v32, %v2417_v7  ;;  %v4587_v41 = vshrl.u32 %v2173_v58, 30  ;;  %v2234_v21 = vshrl.u32 %v2987_v11, %v2231_v45  ;;  %v2223_v42 = vand.u32 8388607, %v2216_v25 }
 0x329   : > { %v2422_v0 = vsel %vm2415_vm4, %v2418_v1, %v2421_v5  ;;  %v2504_v31 = vand.u32 2147483647, %v2503_v30  ;;  %v2237_v49 = vshrl.u32 %v2988_v53, %v2231_v45  ;;  %v2233_v47 = vshll.u32 %v2986_v19, %v2230_v2 }
 0x32a   : > { %v2423_v59 = vsel %vm2412_vm15, nan, %v2422_v0  ;;  %v2175_v52 = vshll.u32 %v4587_v41, 30  ;;  %v2240_v6 = vshrl.u32 %v2989_v26, %v2231_v45  ;;  %v2243_v17 = vshrl.u32 %v4730_v43, %v2231_v45 }
 0x32b   : > { %v2507_v35 = vmul.f32 %v2506_v28, %v2504_v31  ;;  %2534 = vst [vmem:[%s3681_s7 + $0x70] sm:$0xff] %v2423_v59  ;;  %v2229_v27 = vshrl.u32 %v2228_v63, 5  ;;  %v2236_v15 = vshll.u32 %v2987_v11, %v2230_v2  ;;  %v2242_v60 = vshll.u32 %v2989_v26, %v2230_v2 }
 0x32c   : > { %v2176_v44 = vsub.s32 %v2172_v37, %v2175_v52  ;;  %v2235_v40 = vor.u32 %v2234_v21, %v2233_v47  ;;  %v2239_v62 = vshll.u32 %v2988_v53, %v2230_v2  ;;  %v2246_v29 = vshrl.u32 %v4731_v50, %v2231_v45 }
 0x32d   : > { %v2508_v20 = vxor.u32 2147483648, %v2507_v35  ;;  %v2238_v46 = vor.u32 %v2237_v49, %v2236_v15  ;;  %v2244_v8 = vor.u32 %v2243_v17, %v2242_v60  ;;  %v2245_v18 = vshll.u32 %v4730_v43, %v2230_v2 }
 0x32e   : > { %v2178_v11 = vsub.s32 0, %v2176_v44  ;;  %v2241_v61 = vor.u32 %v2240_v6, %v2239_v62  ;;  %v2224_v26 = vor.u32 8388608, %v2223_v42  ;;  %vm2248_vm6 = vcmp.lt.s32.totalorder %v2229_v27, 1 }
 0x32f   : > { %v2509_v14 = vsel %vm2426_vm13, %v2508_v20, %v2507_v35  ;;  %v2247_v36 = vor.u32 %v2246_v29, %v2245_v18  ;;  %vm2251_vm2 = vcmp.lt.s32.totalorder %v2229_v27, 4  ;;  %v2518_v50 = vand.u32 3, %v2517_v57 }
 0x330   : > { %v2512_v48 = vsel %vm4566_vm7, %v4367_v51, %v2509_v14  ;;  %v2673_v53 = vmin.u32 %v2178_v11, %v2176_v44  ;;  %v2232_v10 = vshrl.u32 %v2986_v19, %v2231_v45  ;;  %v2256_v54 = vsel %vm2248_vm6, %v2235_v40, %v2238_v46 }
 0x331   : > { %2898 = vcosq.f32 %v2512_v48  ;;  %v2257_v12 = vsel %vm2251_vm2, %v2244_v8, 920167782  ;;  %vm2250_vm10 = vcmp.lt.s32.totalorder %v2229_v27, 3  ;;  %v2253_v43 = vsel %vm2251_vm2, %v2241_v61, 2102212464 }
 0x332   : > { %2900 = vsinq.f32 %v2512_v48  ;;  %v2180_v32 = vclz %v2673_v53  ;;  %v2260_v22 = vsel %vm2248_vm6, %v2238_v46, %v2241_v61  ;;  %vm2249_vm3 = vcmp.lt.s32.totalorder %v2229_v27, 2 }
 0x333   : > { %v2258_v39 = vsel %vm2250_vm10, %v2241_v61, %v2257_v12  ;;  %v2261_v4 = vsel %vm2251_vm2, %v2247_v36, 1326507024  ;;  %v2264_v63 = vshll.u32 %v2224_v26, 8  ;;  %v2252_v23 = vsel %vm2248_vm6, %v2232_v10, %v2235_v40 }
 0x334   : > { %v2674_v38 = vadd.s32 4294967294, %v2180_v32  ;;  %v2259_v3 = vsel %vm2249_vm3, %v2256_v54, %v2258_v39  ;;  %v2262_v24 = vsel %vm2250_vm10, %v2244_v8, %v2261_v4  ;;  %v2254_v56 = vsel %vm2250_vm10, %v2238_v46, %v2253_v43 }
 0x335   : > { %v2263_v7 = vsel %vm2249_vm3, %v2260_v22, %v2262_v24  ;;  %v4611_v37 = vmul.u32.u64.low %v2264_v63, %v2259_v3  ;;  %v4612_v19 = vmul.u32.u64.high %v2264_v63, %v2259_v3, %v4611_v37  ;;  %v2168_v1 = vadd.s32 %v4555_v55, %v4561_v34 }
 0x336   : > { %vm2675_vm8 = vcmp.lt.s32.totalorder %v2674_v38, 0  ;;  %v4614_v2 = vmul.u32.u64.low %v2264_v63, %v2263_v7  ;;  %v4615_v5 = vmul.u32.u64.high %v2264_v63, %v2263_v7, %v4614_v2  ;;  %v2255_v45 = vsel %vm2249_vm3, %v2252_v23, %v2254_v56 }
 0x337   : > { %v2183_v30 = vsel %vm2675_vm8, 0, %v2674_v38  ;;  %vm2520_vm11 = vcmp.eq.s32.totalorder %v2518_v50, 0  ;;  %v2274_v31 = vadd.s32 1, %v4612_v19  ;;  %vm2523_vm0 = vcmp.eq.s32.totalorder %v2518_v50, 2 }
 0x338   : > { %v2184_v16 = vsub.s32 32, %v2183_v30  ;;  %v2188_v58 = vsub.s32 4294967266, %v2183_v30  ;;  %v2185_v21 = vshll.u32 %v2176_v44, %v2183_v30  ;;  %v2271_v49 = vmul.u32 %v2264_v63, %v2255_v45 }
 0x339   : > { %vm2273_vm12 = vc.u32 %v4615_v5, %v4611_v37  ;;  %vm2519_vm4 = vcmp.lt.s32.totalorder %v2518_v50, 2  ;;  %vm2516_vm7 = vweird.f32 %v4367_v51  ;;  %v2198_v14 = vsub.s32 4, %v4587_v41 }
 0x33a   : > { %v2186_v35 = vshrl.u32 %v2168_v1, %v2184_v16  ;;  %v2189_v57 = vadd.s32 127, %v2188_v58  ;;  %v2275_v47 = vsel %vm2273_vm12, %v2274_v31, %v4612_v19  ;;  %vm2114_vm13 = vcmp.lt.s32.totalorder %v4465_v9, 0 }
 0x33b   : > { %v2899_v0 = vpop.eup %2898  ;;  %v2276_v17 = vadd.s32 %v2275_v47, %v2271_v49  ;;  %vm2113_vm14 = vcmp.le.f32.partialorder %v2112_v13, 0.7853982  ;;  %v2199_v48 = vsel %vm2114_vm13, %v2198_v14, %v4587_v41  ;;  %v2272_v32 = vadd.s32 %v4611_v37, %v4615_v5 }
 0x33c   : > { %v2901_v28 = vpop.eup %2900  ;;  %v2524_v59 = vxor.u32 2147483648, %v2899_v0  ;;  %v2187_v34 = vor.u32 %v2186_v35, %v2185_v21  ;;  %v2190_v52 = vshll.u32 %v2189_v57, 23  ;;  %v2201_v26 = vsel %vm2113_vm14, 0, %v2199_v48 }
 0x33d   : > { %v2521_v42 = vxor.u32 2147483648, %v2901_v28  ;;  %v2277_v60 = vadd.s32 536870912, %v2276_v17  ;;  %v2205_v50 = vadd.s32 3, %v2201_v26  ;;  %vm2204_vm6 = vweird.f32 %v4465_v9 }
 0x33e   : > { %v2525_v55 = vsel %vm2523_vm0, %v2524_v59, %v2901_v28  ;;  %v2191_v27 = vor.u32 4788187, %v2190_v52  ;;  %v2194_v40 = vcvt.s32.f32 %v2187_v34  ;;  %vm2218_vm2 = vcmp.lt.s32.totalorder %v4504_v33, 0 }
 0x33f   : > { %v2522_v6 = vsel %vm2520_vm11, %v2899_v0, %v2521_v42  ;;  %v2278_v62 = vshrl.u32 %v2277_v60, 30  ;;  %v2206_v54 = vand.u32 3, %v2205_v50  ;;  %vm2217_vm10 = vcmp.le.f32.partialorder %v2216_v25, 0.7853982 }
 0x340   : > { %v2526_v20 = vsel %vm2519_vm4, %v2522_v6, %v2525_v55  ;;  %v2192_v44 = vand.u32 2147483647, %v2191_v27  ;;  %vm2308_vm0 = vweird.f32 %v4504_v33 }
 0x341   : > { %v2527_v15 = vsel %vm2516_vm7, nan, %v2526_v20  ;;  %v2279_v46 = vshll.u32 %v2278_v62, 30  ;;  %vm2211_vm9 = vcmp.eq.s32.totalorder %v2206_v54, 2  ;;  %vm2208_vm5 = vcmp.eq.s32.totalorder %v2206_v54, 0 }
 0x342   : > { %2535 = vst [vmem:[%s3681_s7 + $0x78] sm:$0xff] %v2527_v15  ;;  %v2195_v29 = vmul.f32 %v2194_v40, %v2192_v44  ;;  %vm2207_vm15 = vcmp.lt.s32.totalorder %v2206_v54, 2  ;;  %v2302_v16 = vsub.s32 4, %v2278_v62 }
 0x343   : > { %v2280_v18 = vsub.s32 %v2276_v17, %v2279_v46 }
 0x344   : > { %v2196_v8 = vxor.u32 2147483648, %v2195_v29  ;;  %v2303_v0 = vsel %vm2218_vm2, %v2302_v16, %v2278_v62 }
 0x345   : > { %v2282_v61 = vsub.s32 0, %v2280_v18  ;;  %v2305_v31 = vsel %vm2217_vm10, 0, %v2303_v0 }
 0x346   : > { %v2197_v51 = vsel %vm2114_vm13, %v2196_v8, %v2195_v29  ;;  %v2309_v28 = vadd.s32 3, %v2305_v31 }
 0x347   : > { %v2200_v11 = vsel %vm2113_vm14, %v4465_v9, %v2197_v51  ;;  %v2677_v36 = vmin.u32 %v2282_v61, %v2280_v18 }
 0x348   : > { %2902 = vcosq.f32 %v2200_v11  ;;  %v2310_v59 = vand.u32 3, %v2309_v28 }
 0x349   : > { %2904 = vsinq.f32 %v2200_v11  ;;  %v2284_v53 = vclz %v2677_v36 }
 0x34a   : > { %vm2315_vm3 = vcmp.eq.s32.totalorder %v2310_v59, 2  ;;  %vm2312_vm8 = vcmp.eq.s32.totalorder %v2310_v59, 0  ;;  %vm2311_vm11 = vcmp.lt.s32.totalorder %v2310_v59, 2 }
 0x34b   : > { %v2678_v10 = vadd.s32 4294967294, %v2284_v53 }
 0x34d   : > { %vm2679_vm1 = vcmp.lt.s32.totalorder %v2678_v10, 0 }
 0x34e   : > { %v2287_v12 = vsel %vm2679_vm1, 0, %v2678_v10 }
 0x34f   : > { %v2288_v43 = vsub.s32 32, %v2287_v12  ;;  %v2292_v13 = vsub.s32 4294967266, %v2287_v12  ;;  %v2289_v4 = vshll.u32 %v2280_v18, %v2287_v12 }
 0x351   : > { %v2290_v63 = vshrl.u32 %v2272_v32, %v2288_v43  ;;  %v2293_v38 = vadd.s32 127, %v2292_v13 }
 0x352   : > { %v2903_v22 = vpop.eup %2902 }
 0x353   : > { %v2905_v39 = vpop.eup %2904  ;;  %v2212_v41 = vxor.u32 2147483648, %v2903_v22  ;;  %v2291_v24 = vor.u32 %v2290_v63, %v2289_v4  ;;  %v2294_v56 = vshll.u32 %v2293_v38, 23 }
 0x354   : > { %v2209_v23 = vxor.u32 2147483648, %v2905_v39 }
 0x355   : > { %v2213_v3 = vsel %vm2211_vm9, %v2212_v41, %v2905_v39  ;;  %v2295_v19 = vor.u32 4788187, %v2294_v56  ;;  %v2298_v30 = vcvt.s32.f32 %v2291_v24 }
 0x356   : > { %v2210_v7 = vsel %vm2208_vm5, %v2903_v22, %v2209_v23 }
 0x357   : > { %v2214_v37 = vsel %vm2207_vm15, %v2210_v7, %v2213_v3  ;;  %v2296_v5 = vand.u32 2147483647, %v2295_v19 }
 0x358   : > { %v2215_v2 = vsel %vm2204_vm6, nan, %v2214_v37 }
 0x359   : > { %2532 = vst [vmem:[%s3681_s7 + $0x60] sm:$0xff] %v2215_v2  ;;  %v2299_v1 = vmul.f32 %v2298_v30, %v2296_v5 }
 0x35b   : > { %v2300_v58 = vxor.u32 2147483648, %v2299_v1 }
 0x35d   : > { %v2301_v45 = vsel %vm2218_vm2, %v2300_v58, %v2299_v1 }
 0x35e   : > { %v2304_v9 = vsel %vm2217_vm10, %v4504_v33, %v2301_v45 }
 0x35f   : > { %2906 = vcosq.f32 %v2304_v9 }
 0x360   : > { %2908 = vsinq.f32 %v2304_v9 }
 0x369   : > { %v2907_v21 = vpop.eup %2906 }
 0x36a   : > { %v2909_v35 = vpop.eup %2908  ;;  %v2316_v57 = vxor.u32 2147483648, %v2907_v21 }
 0x36b   : > { %v2313_v42 = vxor.u32 2147483648, %v2909_v35 }
 0x36c   : > { %v2317_v25 = vsel %vm2315_vm3, %v2316_v57, %v2909_v35 }
 0x36d   : > { %v2314_v49 = vsel %vm2312_vm8, %v2907_v21, %v2313_v42 }
 0x36e   : > { %v2318_v55 = vsel %vm2311_vm11, %v2314_v49, %v2317_v25 }
 0x36f   : > { %v2319_v34 = vsel %vm2308_vm0, nan, %v2318_v55 }
 0x370   : > { %2533 = vst [vmem:[%s3681_s7 + $0x68] sm:$0xff] %v2319_v34 }
 0x371   : > { %2923 = shalt.err (!%p2920_p3)
}
 0x372   : > { %s2924_s23 = scalar_lea.hbm %s4644_s13, 2048  ;;  %s2928_s30 = scalar_lea.hbm %s4699_s5, 4096 }
 0x373   : > { %p2925_p4 = scmp.ne.s32.totalorder %s4644_s13, %s2924_s23  ;;  %p2929_p9 = scmp.lt.u32.totalorder %s4644_s13, %s4699_s5 }
 0x374   : > { %p2930_p10 = scmp.lt.u32.totalorder %s2928_s30, %s2924_s23  ;;  %p2932_p12 = scmp.lt.u32.totalorder %s2924_s23, %s4644_s13 }
 0x375   : > { %p2926_p7 = pnand %p2925_p4, %p3062_p5 }
 0x376   : > { %p2931_p11 = por %p2930_p10, %p2929_p9 }
 0x377   : > { %p2927_p8 = pneg %p2926_p7 }
 0x378   : > { %p2933_p13 = por %p2932_p12, %p2931_p11 }
 0x37a   : > { %p2934_p0 = pnand %p2933_p13, %p2927_p8 }
 0x37c   : > { %2937 = shalt.err (!%p2934_p0)
}
 0x37d   : > { %s2993_s8 = smov 256  }
 0x37e   : > { %2775 = dma.vmem_to_hbm [thread:$0]  (%p3062_p5), %s4647_s9, 2048, %s4644_s13, %s4652_s22, %s2993_s8, %s2993_s8, %s2979_s10  }
 0x37f PF: > { %p2781_p1 = scmp.ge.s32.totalorder %s2972_s21, 2  ;;  %s2565_s11 = sand.u32 1, %s2960_s18  }
 0x380   : > { %s2566_s12 = scalar_lea.sflag [#allocation4], %s2565_s11 }
 0x381   : > { %p2778_p2 = pnand %p2781_p1, %p3066_p6 }
 0x383   : > { %2955 = dma.done.wait (!%p2778_p2), %s2566_s12, 2048  }
 0x384   : > { %2957 = vsyncadd (!%p2778_p2), %s2566_s12, 4294965248  ;;  %p15_p3 = scmp.ge.s32.totalorder %s3049_s24, 4   ;;  %s4760_s18 = smov %s2964_s19 }
 0x385   : > { %s4761_s19 = smov %s2968_s20  ;;  %s4762_s20 = smov %s3060_s27 }
 0x386   : > { %s4763_s21 = smov %s3049_s24  ;;  %17 = sbr.rel (!%p15_p3) target bundleno = 3 (0x3), region = 75 }
 0x38d   :  { %2571 = vsyncpa [#allocation4], 1 }
 0x38e   :  { %2573 = vsyncpa [#allocation4 + $0x1], 1 }

</bundles_post_ra>
